<compile_context>
chip_gen: v7x
topology: tpu7x:2x2x1
jax: 0.10.0
libtpu: 0.0.40
codegen_flags: <defaults>
</compile_context>

<pallas_src>
import jax
import jax.numpy as jnp
from jax import lax
from jax.experimental import pallas as pl
from jax.experimental.pallas import tpu as pltpu

NUM_CLASSES = 18
IN_FEATURES = 224 * 224 * 3          # 150528


def _pick_tk():
    """Reduction tile size per TPU generation (all divide 150528 and 128)."""
    try:
        kind = jax.devices()[0].device_kind.lower()
    except Exception:
        kind = ""
    if "v6" in kind:
        return 75264   # 2 K-steps, ~19 MB double-buffered -> fits v6e 32 MiB scoped VMEM
    return 37632       # 4 K-steps, ~9.6 MB -> fits v5e 16 MiB default, safe on v7x


def _linear_kernel(x_ref, w_ref, b_ref, o_ref):
    """Grid step k: accumulate x_tile @ w_tile^T into the resident (B, N) output;
    add bias at the last reduction step."""
    k = pl.program_id(0)

    @pl.when(k == 0)
    def _():
        o_ref[...] = jnp.zeros_like(o_ref)

    # Contract the last dims of both operands (x @ W^T). Weight stays in its
    # compact (N, K) torch layout so no 18->128 lane padding is streamed.
    o_ref[...] += lax.dot_general(
        x_ref[...],
        w_ref[...],
        dimension_numbers=(((1,), (1,)), ((), ())),
        preferred_element_type=jnp.float32,
    )

    @pl.when(k == pl.num_programs(0) - 1)
    def _():
        o_ref[...] += b_ref[...]          # (1, N) broadcast over (B, N)


def vanilla_net_forward(x_nchw, weight_nk, bias_n):
    """x_nchw: (B, 3, 224, 224) f32; weight_nk: (N, K) torch layout; bias_n: (N,)."""
    B = x_nchw.shape[0]
    K = IN_FEATURES
    N = NUM_CLASSES
    assert weight_nk.shape == (N, K)

    tk = _pick_tk()
    assert K % tk == 0, "K must be divisible by TK (use pl.cdiv + masking otherwise)"
    n_k = K // tk

    x_flat = x_nchw.reshape(B, K)         # same flattening order as torch .view
    bias_2d = bias_n.reshape(1, N)

    out = pl.pallas_call(
        _linear_kernel,
        out_shape=jax.ShapeDtypeStruct((B, N), jnp.float32),
        grid_spec=pltpu.PrefetchScalarGridSpec(
            num_scalar_prefetch=0,
            grid=(n_k,),
            in_specs=[
                # activation tile (B, tk): K block index = k
                pl.BlockSpec((B, tk), lambda k: (0, k)),
                # weight tile (N, tk) in native torch layout
                pl.BlockSpec((N, tk), lambda k: (0, k)),
                # bias, tiny and constant across the reduction
                pl.BlockSpec((1, N), lambda k: (0, 0)),
            ],
            # output block resident in VMEM across the whole K reduction
            out_specs=pl.BlockSpec((B, N), lambda k: (0, 0)),
        ),
        compiler_params=pltpu.CompilerParams(
            dimension_semantics=("arbitrary",),
        ),
        cost_estimate=pl.CostEstimate(
            flops=2 * B * K * N,
            bytes_accessed=4 * (N * K + B * K + B * N + N),
            transcendentals=0,
        ),
    )(x_flat, weight_nk, bias_2d)

    return out.astype(x_nchw.dtype)


def init_params(key):
    """Deterministic init mimicking torch.nn.Linear default (U[-1/sqrt(fan_in), +1/sqrt(fan_in)])."""
    kw, kb = jax.random.split(key)
    bound = 1.0 / jnp.sqrt(jnp.float32(IN_FEATURES))
    # Stored in native torch layout (N, K); the kernel contracts over K (last dim).
    weight_nk = jax.random.uniform(
        kw, (NUM_CLASSES, IN_FEATURES), jnp.float32, minval=-bound, maxval=bound
    )
    bias_n = jax.random.uniform(
        kb, (NUM_CLASSES,), jnp.float32, minval=-bound, maxval=bound
    )
    return weight_nk, bias_n


if __name__ == "__main__":
    key = jax.random.PRNGKey(0)
    k_x, k_p = jax.random.split(key)

    batch = 2
    x = jax.random.normal(k_x, (batch, 3, 224, 224), jnp.float32)
    weight_nk, bias_n = init_params(k_p)

    out = vanilla_net_forward(x, weight_nk, bias_n)
    out = jax.block_until_ready(out)

    # Reference check against plain JAX (x @ W^T + b, torch Linear semantics).
    ref = x.reshape(batch, -1) @ weight_nk.T + bias_n
    assert out.shape == (batch, NUM_CLASSES)
    assert jnp.allclose(out, ref, atol=1e-3, rtol=1e-3)

    print("KERNEL_OK")
</pallas_src>

<mosaic_0001>
module attributes {stable_mosaic.version = 11 : i64} {
  func.func @_linear_kernel(%arg0: i32, %arg1: memref<2x37632xf32, #tpu.memory_space<vmem>>, %arg2: memref<18x37632xf32, #tpu.memory_space<vmem>>, %arg3: memref<1x18xf32, #tpu.memory_space<vmem>>, %arg4: memref<2x18xf32, #tpu.memory_space<vmem>>) attributes {dimension_semantics = [#tpu.dimension_semantics<arbitrary>], iteration_bounds = array<i64: 4>, scalar_prefetch = 0 : i64, scratch_operands = 0 : i64, tpu.core_type = #tpu.core_type<tc>, window_params = [{transform_indices = @transform_0, window_bounds = array<i64: 2, 37632>}, {transform_indices = @transform_1, window_bounds = array<i64: 18, 37632>}, {pipeline_mode = #tpu.pipeline_mode<synchronous>, transform_indices = @transform_2, window_bounds = array<i64: 1, 18>}, {pipeline_mode = #tpu.pipeline_mode<synchronous>, transform_indices = @transform_3, window_bounds = array<i64: 2, 18>}]} {
    %c0_i32 = arith.constant 0 : i32
    %0 = arith.cmpi eq, %arg0, %c0_i32 : i32
    %1 = arith.extui %0 : i1 to i32
    %c0_i32_0 = arith.constant 0 : i32
    %2 = arith.cmpi ne, %1, %c0_i32_0 : i32
    scf.if %2 {
      %cst_9 = arith.constant 0.000000e+00 : f32
      %12 = vector.broadcast %cst_9 : f32 to vector<2x18xf32>
      %c0_10 = arith.constant 0 : index
      %c0_11 = arith.constant 0 : index
      %13 = vector.load %arg4[%c0_10, %c0_11] : memref<2x18xf32, #tpu.memory_space<vmem>>, vector<2x18xf32>
      tpu.vector_store %arg4[%c0_10, %c0_11], %12 {strides = array<i32>} : memref<2x18xf32, #tpu.memory_space<vmem>>, vector<2x18xf32>,
    } else {
    }
    %c0 = arith.constant 0 : index
    %c0_1 = arith.constant 0 : index
    %3 = vector.load %arg4[%c0, %c0_1] : memref<2x18xf32, #tpu.memory_space<vmem>>, vector<2x18xf32>
    %c0_2 = arith.constant 0 : index
    %c0_3 = arith.constant 0 : index
    %4 = vector.load %arg1[%c0_2, %c0_3] : memref<2x37632xf32, #tpu.memory_space<vmem>>, vector<2x37632xf32>
    %c0_4 = arith.constant 0 : index
    %c0_5 = arith.constant 0 : index
    %5 = vector.load %arg2[%c0_4, %c0_5] : memref<18x37632xf32, #tpu.memory_space<vmem>>, vector<18x37632xf32>
    %cst = arith.constant dense<0.000000e+00> : vector<2x18xf32>
    %6 = tpu.matmul %4, %5, %cst {dimension_numbers = #tpu.dot_dimension_numbers<[1], [1], [0], [0], [0, 0, 1, 0], [], []>} : vector<2x37632xf32>, vector<18x37632xf32>, vector<2x18xf32> -> vector<2x18xf32>
    %7 = arith.addf %3, %6 : vector<2x18xf32>
    %c0_6 = arith.constant 0 : index
    %c0_7 = arith.constant 0 : index
    %8 = vector.load %arg4[%c0_6, %c0_7] : memref<2x18xf32, #tpu.memory_space<vmem>>, vector<2x18xf32>
    tpu.vector_store %arg4[%c0_6, %c0_7], %7 {strides = array<i32>} : memref<2x18xf32, #tpu.memory_space<vmem>>, vector<2x18xf32>,
    %c3_i32 = arith.constant 3 : i32
    %9 = arith.cmpi eq, %arg0, %c3_i32 : i32
    %10 = arith.extui %9 : i1 to i32
    %c0_i32_8 = arith.constant 0 : i32
    %11 = arith.cmpi ne, %10, %c0_i32_8 : i32
    scf.if %11 {
      %c0_9 = arith.constant 0 : index
      %c0_10 = arith.constant 0 : index
      %12 = vector.load %arg4[%c0_9, %c0_10] : memref<2x18xf32, #tpu.memory_space<vmem>>, vector<2x18xf32>
      %c0_11 = arith.constant 0 : index
      %c0_12 = arith.constant 0 : index
      %13 = vector.load %arg3[%c0_11, %c0_12] : memref<1x18xf32, #tpu.memory_space<vmem>>, vector<1x18xf32>
      %14 = vector.broadcast %13 : vector<1x18xf32> to vector<2x18xf32>
      %15 = arith.addf %12, %14 : vector<2x18xf32>
      %c0_13 = arith.constant 0 : index
      %c0_14 = arith.constant 0 : index
      %16 = vector.load %arg4[%c0_13, %c0_14] : memref<2x18xf32, #tpu.memory_space<vmem>>, vector<2x18xf32>
      tpu.vector_store %arg4[%c0_13, %c0_14], %15 {strides = array<i32>} : memref<2x18xf32, #tpu.memory_space<vmem>>, vector<2x18xf32>,
    } else {
    }
    return
  }
  func.func @transform_0(%arg0: i32) -> (i32, i32) {
    %c0_i32 = arith.constant 0 : i32
    %c0_i32_0 = arith.constant 0 : i32
    return %c0_i32, %arg0 : i32, i32
  }
  func.func @transform_1(%arg0: i32) -> (i32, i32) {
    %c0_i32 = arith.constant 0 : i32
    %c0_i32_0 = arith.constant 0 : i32
    return %c0_i32, %arg0 : i32, i32
  }
  func.func @transform_2(%arg0: i32) -> (i32, i32) {
    %c0_i32 = arith.constant 0 : i32
    %c0_i32_0 = arith.constant 0 : i32
    %c0_i32_1 = arith.constant 0 : i32
    return %c0_i32, %c0_i32_0 : i32, i32
  }
  func.func @transform_3(%arg0: i32) -> (i32, i32) {
    %c0_i32 = arith.constant 0 : i32
    %c0_i32_0 = arith.constant 0 : i32
    %c0_i32_1 = arith.constant 0 : i32
    return %c0_i32, %c0_i32_0 : i32, i32
  }
}

</mosaic_0001>

<bundles_post_ra>
// kernel: tpu_custom_call.1
= control target key start
LH: loop header
LB: loop body
LE: loop exit
PB: predicated region body
PF: predicated region fallthrough
CT: control target
= control target key end

     0   :  { %8 = vsyncpa [#allocation3], 0  ;;  %s15465_s0 = inlined_call_operand.hbm [shape: f32[2,150528], index: 0, kind: input, shape index: {}]   ;;  %s15466_s1 = inlined_call_operand.hbm [shape: f32[18,150528], index: 1, kind: input, shape index: {}]   ;;  %s15467_s2 = inlined_call_operand.hbm [shape: f32[1,18], index: 2, kind: input, shape index: {}]   ;;  %s15468_s3 = inlined_call_operand.hbm [shape: f32[2,18], index: 3, kind: output, shape index: {}]  }
   0x1   :  { %10 = vsyncpa [#allocation3 + $0x1], 0 }
   0x2   :  { %11 = vsyncpa [#allocation6], 0 }
   0x3   :  { %13 = vsyncpa [#allocation6 + $0x1], 0 }
   0x4   :  { %14 = vsyncpa [#allocation4], 0  ;;  %s14146_s12 = smov 0   ;;  %s14148_s13 = smov 0  }
   0x5   :  { %s14150_s14 = smov 0   ;;  %s14152_s15 = smov 0  }
   0x6 LB: > { %s14165_s16 = sadd.s32 4294967295, %s14115_s15   ;;  %s14168_s17 = sadd.s32 1, %s14115_s15   ;;  %s14115_s15 = sphi %s14152_s15, %s15486_s15   ;;  %s14111_s14 = sphi %s14150_s14, %s15485_s14   ;;  %s14107_s13 = sphi %s14148_s13, %s15484_s13   ;;  %s14103_s12 = sphi %s14146_s12, %s15483_s12  }
   0x7   : > { %s24_s18 = ssub.s32 %s14115_s15, %s14168_s17  ;;  %s27_s19 = sadd.s32 1, %s14111_s14 }
   0x8   : > { %p25_p0 = scmp.eq.s32.totalorder %s24_s18, 0  ;;  %p34_p1 = scmp.ne.s32.totalorder %s14111_s14, %s14107_s13 }
   0x9   : > { %p40_p2 = scmp.ne.s32.totalorder %s14107_s13, %s14103_s12  ;;  %p15469_p3 = scmp.eq.s32.totalorder %s14165_s16, 0 }
   0xa   : > { %s14178_s20 = scalar_select %p25_p0, %s14111_s14, %s27_s19  }
   0xb   : > { %p14182_p4 = por %p15469_p3, %p40_p2  ;;  %p13206_p5 = scmp.ge.s32.totalorder %s14115_s15, 1 }
   0xc   : > { %p119_p6 = scmp.lt.s32.totalorder %s14115_s15, 5  ;;  %s14117_s23 = smov [#allocation7]  }
   0xd   : > { %s15473_s21 = scalar_select %p14182_p4, 1, 0 }
   0xe   : > { %p14189_p8 = pnand %p13206_p5, %p119_p6  ;;  %s132_s24 = sshll.u32 %s14117_s23, 4  ;;  %s133_s24 = int_to_ptr.vmem [resolvable:$true] %s132_s24 }
   0xf   : > { %p35_p9 = scmp.eq.s32.totalorder %s14115_s15, 0  ;;  %p13839_p11 = scmp.lt.s32.totalorder %s14115_s15, 4 }
  0x10   : > { %s15474_s22 = scalar_select %p14189_p8, 1, 0 }
  0x11   : > { %p13827_p10 = pneg %p14189_p8  ;;  %p36_p12 = por %p35_p9, %p34_p1 }
  0x12   : > { %s14201_s25 = sand.u32 1, %s14111_s14   ;;  %s13221_s29 = smul.u32 9408, %s14115_s15 }
  0x13   : > { %p14205_p13 = pnand %p13827_p10, %p15469_p3  ;;  %s13811_s27 = smul.u32 588, %s14201_s25 }
  0x14   : > { %p14210_p0 = pnand %p13839_p11, %p36_p12  ;;  %s13955_s5 = scalar_lea.hbm %s15467_s2, 16 }
  0x15   : > { %p13956_p1 = scmp.ne.s32.totalorder %s15467_s2, %s13955_s5  ;;  %p13957_p2 = pneg %p14205_p13 }
  0x16   : > { %s15476_s28 = scalar_select %p14210_p0, 1, 0 }
  0x17   : > { %p13958_p5 = pnand %p13957_p2, %p13956_p1  ;;  %p13962_p9 = scmp.lt.u32.totalorder %s13955_s5, %s15467_s2 }
  0x19   : > { %p13959_p6 = pneg %p13958_p5 }
  0x1b   : > { %p13964_p10 = pnand %p13962_p9, %p13959_p6 }
  0x1d   : > { %13967 = shalt.err (!%p13964_p10)
}
  0x1e   : > { %s13968_s10 = scalar_lea.vmem %s133_s24, 16  ;;  %s13975_s11 = scalar_lea.vmem %s133_s24, 32 }
  0x1f   : > { %p13969_p11 = scmp.ne.s32.totalorder %s133_s24, %s13968_s10  ;;  %p13976_p3 = scmp.lt.s32.totalorder %s133_s24, %s133_s24 }
  0x20   : > { %p13977_p4 = scmp.lt.s32.totalorder %s13975_s11, %s13968_s10 }
  0x21   : > { %p13971_p12 = pnand %p13969_p11, %p13957_p2 }
  0x22   : > { %p13978_p8 = por %p13977_p4, %p13976_p3 }
  0x23   : > { %p13972_p7 = pneg %p13971_p12 }
  0x25   : > { %p13979_p0 = pnand %p13978_p8, %p13972_p7 }
  0x27   : > { %13982 = shalt.err (!%p13979_p0)
}
  0x28   : > { %13830 = dma.hbm_to_vmem [thread:$0]  (!%p14205_p13), %s15467_s2, 16, %s133_s24, [#allocation6]  }
  0x29   : > { %s14234_s30 = scalar_lea.hbm %s15465_s0, %s13221_s29  ;;  %s147_s4 = scalar_lea.vmem [#allocation2], %s13811_s27 }
  0x2a   : > { %s155_s5 = sshll.u32 %s147_s4, 4  ;;  %s13812_s26 = smul.u32 7056, %s14201_s25  ;;  %s14236_s5 = int_to_ptr.vmem [resolvable:$true] %s155_s5 }
  0x2b   : > { %s144_s6 = scalar_lea.sflag [#allocation3], %s14201_s25  ;;  %s13983_s7 = scalar_lea.hbm %s14234_s30, 9408 }
  0x2c   : > { %p13984_p3 = scmp.ne.s32.totalorder %s14234_s30, %s13983_s7  ;;  %p15477_p4 = scmp.ne.s32.totalorder %s15476_s28, 0 }
  0x2d   : > { %s13988_s8 = scalar_lea.hbm %s15465_s0, 37632  ;;  %p13989_p0 = scmp.lt.u32.totalorder %s14234_s30, %s15465_s0 }
  0x2e   : > { %p13985_p7 = pneg %p15477_p4  ;;  %p13990_p1 = scmp.lt.u32.totalorder %s13988_s8, %s13983_s7 }
  0x2f   : > { %p13992_p5 = scmp.lt.u32.totalorder %s13983_s7, %s14234_s30 }
  0x30   : > { %p13986_p8 = pnand %p13985_p7, %p13984_p3  ;;  %p13991_p2 = por %p13990_p1, %p13989_p0 }
  0x32   : > { %p13987_p13 = pneg %p13986_p8  ;;  %p13993_p6 = por %p13992_p5, %p13991_p2 }
  0x34   : > { %p13994_p9 = pnand %p13993_p6, %p13987_p13 }
  0x36   : > { %13997 = shalt.err (!%p13994_p9)
}
  0x37   : > { %s13998_s27 = scalar_lea.vmem %s14236_s5, 9408  ;;  %s14118_s11 = smov [#allocation2]  }
  0x38   : > { %p13999_p10 = scmp.ne.s32.totalorder %s14236_s5, %s13998_s27  ;;  %s14003_s12 = sshll.u32 %s14118_s11, 4  ;;  %s14004_s12 = int_to_ptr.vmem [resolvable:$false] %s14003_s12 }
  0x39   : > { %s14005_s18 = scalar_lea.vmem %s14004_s12, 18816  ;;  %p14006_p3 = scmp.lt.s32.totalorder %s14236_s5, %s14004_s12 }
  0x3a   : > { %p14001_p11 = pnand %p13999_p10, %p13985_p7  ;;  %p14007_p8 = scmp.lt.s32.totalorder %s14005_s18, %s13998_s27 }
  0x3c   : > { %p14002_p12 = pneg %p14001_p11  ;;  %p14008_p0 = por %p14007_p8, %p14006_p3 }
  0x3e   : > { %p14009_p1 = pnand %p14008_p0, %p14002_p12 }
  0x40   : > { %14012 = shalt.err (!%p14009_p1)
}
  0x41   : > { %13834 = dma.hbm_to_vmem [thread:$0]  (!%p15477_p4), %s14234_s30, 9408, %s14236_s5, %s144_s6  }
  0x42   : > { %s162_s19 = sand.u32 1, %s14115_s15   ;;  %s166_s23 = scalar_lea.vmem [#allocation5], %s13812_s26 }
  0x43   : > { %s173_s4 = sshll.u32 %s166_s23, 4  ;;  %s13222_s7 = smul.u32 37632, %s14115_s15  ;;  %s14268_s4 = int_to_ptr.vmem [resolvable:$true] %s173_s4 }
  0x44   : > { %s14276_s9 = scalar_lea.sflag [#allocation6], %s162_s19  ;;  %s14018_s15 = scalar_lea.hbm %s15466_s1, 451584 }
  0x45   : > { %s14274_s8 = scalar_lea.hbm %s15466_s1, %s13222_s7 }
  0x46   : > { %s14013_s10 = scalar_lea.hbm %s14274_s8, 112896  ;;  %p14019_p6 = scmp.lt.u32.totalorder %s14274_s8, %s15466_s1 }
  0x47   : > { %p14014_p13 = scmp.ne.s32.totalorder %s14274_s8, %s14013_s10  ;;  %p14020_p9 = scmp.lt.u32.totalorder %s14018_s15, %s14013_s10 }
  0x48   : > { %p14022_p11 = scmp.lt.u32.totalorder %s14013_s10, %s14274_s8 }
  0x49   : > { %p14016_p2 = pnand %p14014_p13, %p13985_p7  ;;  %p14021_p10 = por %p14020_p9, %p14019_p6 }
  0x4b   : > { %p14017_p5 = pneg %p14016_p2  ;;  %p14023_p12 = por %p14022_p11, %p14021_p10 }
  0x4d   : > { %p14024_p3 = pnand %p14023_p12, %p14017_p5 }
  0x4f   : > { %14027 = shalt.err (!%p14024_p3)
}
  0x50   : > { %s14028_s6 = scalar_lea.vmem %s14268_s4, 112896  ;;  %s14119_s27 = smov [#allocation5]  }
  0x51   : > { %p14029_p8 = scmp.ne.s32.totalorder %s14268_s4, %s14028_s6  ;;  %s14033_s11 = sshll.u32 %s14119_s27, 4  ;;  %s14034_s11 = int_to_ptr.vmem [resolvable:$false] %s14033_s11 }
  0x52   : > { %s14035_s12 = scalar_lea.vmem %s14034_s11, 225792  ;;  %p14036_p13 = scmp.lt.s32.totalorder %s14268_s4, %s14034_s11 }
  0x53   : > { %p14031_p0 = pnand %p14029_p8, %p13985_p7  ;;  %p14037_p2 = scmp.lt.s32.totalorder %s14035_s12, %s14028_s6 }
  0x55   : > { %p14032_p1 = pneg %p14031_p0  ;;  %p14038_p6 = por %p14037_p2, %p14036_p13 }
  0x57   : > { %p14039_p9 = pnand %p14038_p6, %p14032_p1 }
  0x59   : > { %14042 = shalt.err (!%p14039_p9)
}
  0x5a   : > { %s14120_s18 = smov 150528   ;;  %s14121_s19 = smov 37632  }
  0x5b   : > { %s14122_s23 = smov 2352   ;;  %p15478_p7 = scmp.ne.s32.totalorder %s15474_s22, 0 }
  0x5c   : > { %13837 = dma.hbm_to_vmem [thread:$0]  (!%p15477_p4), %s14274_s8, 112896, %s14268_s4, %s14276_s9, %s14120_s18, %s14121_s19, %s14122_s23  }
  0x5d   : > { %185 = sbr.rel (%p15478_p7) target bundleno = 1260 (0x4ec), region = 32  ;;  %s187_s7 = sand.u32 (!%p15478_p7), 1, %s14107_s13  }
  0x5e   : > { %s13813_s24 = smul.u32 (!%p15478_p7), 588, %s187_s7  ;;  %s188_s29 = scalar_lea.sflag (!%p15478_p7), [#allocation3], %s187_s7 }
  0x5f   : > { %p15479_p5 = scmp.ne.s32.totalorder (!%p15478_p7), %s15473_s21, 0 }
  0x60   : > { %s14305_s10 = scalar_lea.vmem (!%p15478_p7), [#allocation2], %s13813_s24 }
  0x64   : > { %14086 = dma.done.wait (%p15479_p5), %s188_s29, 9408  }
  0x65   : > { %14088 = vsyncadd (%p15479_p5), %s188_s29, 4294957888  ;;  %s196_s25 = sand.u32 1, %s14165_s16   ;;  %s13814_s28 = smul.u32 7056, %s187_s7 }
  0x66   : > { %s197_s4 = scalar_lea.sflag [#allocation6], %s196_s25 }
  0x67   : > { %s14312_s8 = scalar_lea.vmem [#allocation5], %s13814_s28 }
  0x68   : > { %14090 = dma.done.wait (%p15479_p5), %s197_s4, 112896  }
  0x69   : > { %14092 = vsyncadd (%p15479_p5), %s197_s4, 4294854400  ;;  %p15480_p4 = scmp.eq.s32.totalorder %s14165_s16, 0 }
  0x6b   : > { %14094 = dma.done.wait (%p15480_p4), [#allocation6], 16   ;;  %p15481_p10 = pmov %p15480_p4 }
  0x6c   : > { %p15482_p11 = scmp.ne.s32.totalorder %s14165_s16, 0 }
  0x6d   : > { %14096 = vsyncadd (%p15481_p10), [#allocation6], 4294967280  ;;  %vm233_vm0 = vcmask (!%p15482_p11), 140288   ;;  %v14123_v0 = vmov (!%p15482_p11), 0.0  }
  0x6e   : > { %232 = sbr.rel (%p15482_p11) target bundleno = 117 (0x75), region = 48  ;;  %234 = vst.msk [vmem:[#allocation8] sm:$0x3] (!%p15482_p11), %vm233_vm0, %v14123_v0 }
  0x75 PF: > { %v311_v1 = vld [vmem:[%s14312_s8 + $0x8] sm:$0xff]  ;;  %v605_v2 = vld [vmem:[%s14312_s8 + $0x938] sm:$0xff]  ;;  %v310_v3 = vld [vmem:[%s14312_s8] sm:$0xff]  ;;  %v1270_v4 = vlaneseq  ;;  %v14124_v9 = vmov 1983009808   ;;  %vm13100_vm1 = vcmask 140288  }
  0x76   : > { %v13223_v5 = vpack.c.bf16 %v605_v2, %v311_v1  ;;  %v604_v6 = vld [vmem:[%s14312_s8 + $0x930] sm:$0xff]  ;;  %v313_v7 = vld [vmem:[%s14312_s8 + $0x18] sm:$0xff]  ;;  %v607_v8 = vld [vmem:[%s14312_s8 + $0x948] sm:$0xff]  ;;  %v1268_v10 = vunpack.c.l.s4 %v14124_v9  ;;  %p13215_p12 = scmp.ne.s32.totalorder %s14165_s16, 3 }
  0x77   : > { %v13225_v11 = vpack.c.bf16 %v604_v6, %v310_v3  ;;  %v13227_v12 = vpack.c.bf16 %v607_v8, %v313_v7  ;;  %v312_v13 = vld [vmem:[%s14312_s8 + $0x10] sm:$0xff]  ;;  %v606_v14 = vld [vmem:[%s14312_s8 + $0x940] sm:$0xff]  ;;  %v899_v15 = vld [vmem:[%s14312_s8 + $0x1268] sm:$0x3]  ;;  %v1271_v16 = vshrl.u32 %v1270_v4, 7 }
  0x78   : > { %13224 = vmatprep.subr.bf16.mxu0 %v13223_v5  ;;  %v13229_v17 = vpack.c.bf16 %v606_v14, %v312_v13  ;;  %v901_v18 = vld [vmem:[%s14312_s8 + $0x1278] sm:$0x3]  ;;  %v1269_v19 = vunpack.c.0.s8 %v1268_v10  ;;  %v236_v20 = vld [vmem:[%s14305_s10] sm:$0xff]  ;;  %v237_v29 = vld [vmem:[%s14305_s10 + $0x8] sm:$0xff] }
  0x79   : > { %13226 = vmatpush1.bf16.xpose.msra.mxu0 %v13225_v11  ;;  %13228 = vmatprep.subr.bf16.mxu1 %v13227_v12  ;;  %v1266_v22 = vcombine.high %v236_v20, %v236_v20  ;;  %v315_v23 = vld [vmem:[%s14312_s8 + $0x28] sm:$0xff]  ;;  %v609_v24 = vld [vmem:[%s14312_s8 + $0x958] sm:$0xff]  ;;  %v898_v30 = vld [vmem:[%s14312_s8 + $0x1260] sm:$0x3]  ;;  %v1283_v36 = vcombine.high %v237_v29, %v237_v29 }
  0x7a   : > { %13230 = vmatpush1.bf16.xpose.msra.mxu1 %v13229_v17  ;;  %2813 = vmatprep.subr.mxu0 %v899_v15  ;;  %v14335_v21 = vsub.s32 %v1269_v19, %v1271_v16  ;;  %v317_v27 = vld [vmem:[%s14312_s8 + $0x38] sm:$0xff]  ;;  %v611_v28 = vld [vmem:[%s14312_s8 + $0x968] sm:$0xff]  ;;  %v13231_v33 = vpack.c.bf16 %v609_v24, %v315_v23  ;;  %v314_v34 = vld [vmem:[%s14312_s8 + $0x20] sm:$0xff] }
  0x7b   : > { %2883 = vmatprep.subr.mxu1 %v901_v18  ;;  %v608_v35 = vld [vmem:[%s14312_s8 + $0x950] sm:$0xff]  ;;  %v13235_v38 = vpack.c.bf16 %v611_v28, %v317_v27  ;;  %v610_v40 = vld [vmem:[%s14312_s8 + $0x960] sm:$0xff]  ;;  %v903_v45 = vld [vmem:[%s14312_s8 + $0x1288] sm:$0x3] }
  0x7c   : > { %v1273_v25 = vrot.slane %v236_v20, %v14335_v21  ;;  %v1280_v26 = vrot.slane %v1266_v22, %v14335_v21  ;;  %v900_v37 = vld [vmem:[%s14312_s8 + $0x1270] sm:$0x3]  ;;  %v1290_v41 = vrot.slane %v237_v29, %v14335_v21  ;;  %v1297_v42 = vrot.slane %v1283_v36, %v14335_v21  ;;  %v905_v47 = vld [vmem:[%s14312_s8 + $0x1298] sm:$0x3]  ;;  %v319_v50 = vld [vmem:[%s14312_s8 + $0x48] sm:$0xff] }
  0x7d   : > { %v316_v39 = vld [vmem:[%s14312_s8 + $0x30] sm:$0xff]  ;;  %v13233_v43 = vpack.c.bf16 %v608_v35, %v314_v34  ;;  %v613_v51 = vld [vmem:[%s14312_s8 + $0x978] sm:$0xff]  ;;  %v615_v53 = vld [vmem:[%s14312_s8 + $0x988] sm:$0xff] }
  0x7e   : > { %v1281_v31 = vcombine.high %v1273_v25, %v1273_v25  ;;  %v1282_v32 = vcombine.high %v1280_v26, %v1280_v26  ;;  %v13237_v44 = vpack.c.bf16 %v610_v40, %v316_v39  ;;  %v1298_v46 = vcombine.high %v1290_v41, %v1290_v41  ;;  %v238_v49 = vld [vmem:[%s14305_s10 + $0x10] sm:$0xff]  ;;  %v902_v55 = vld [vmem:[%s14312_s8 + $0x1280] sm:$0x3]  ;;  %v904_v59 = vld [vmem:[%s14312_s8 + $0x1290] sm:$0x3] }
  0x7f   : > { %v1299_v48 = vcombine.high %v1297_v42, %v1297_v42  ;;  %v321_v52 = vld [vmem:[%s14312_s8 + $0x58] sm:$0xff]  ;;  %v1300_v54 = vcombine.high %v238_v49, %v238_v49  ;;  %v13239_v56 = vpack.c.bf16 %v613_v51, %v319_v50  ;;  %v318_v57 = vld [vmem:[%s14312_s8 + $0x40] sm:$0xff]  ;;  %v612_v58 = vld [vmem:[%s14312_s8 + $0x970] sm:$0xff]  ;;  %v1307_v63 = vrot.slane %v238_v49, %v14335_v21 }
  0x80   : > { %2873 = vmatprep.mubr.f32.mxu0 %v1281_v31  ;;  %2943 = vmatprep.mubr.f32.mxu1 %v1282_v32  ;;  %v13243_v60 = vpack.c.bf16 %v615_v53, %v321_v52  ;;  %v320_v61 = vld [vmem:[%s14312_s8 + $0x50] sm:$0xff]  ;;  %v614_v62 = vld [vmem:[%s14312_s8 + $0x980] sm:$0xff]  ;;  %v13241_v1 = vpack.c.bf16 %v612_v58, %v318_v57  ;;  %v907_v3 = vld [vmem:[%s14312_s8 + $0x12a8] sm:$0x3] }
  0x81   : > { %2814 = vmatpush1.xpose.msra.mxu0 %v898_v30  ;;  %v1314_v0 = vrot.slane %v1300_v54, %v14335_v21  ;;  %v13245_v2 = vpack.c.bf16 %v614_v62, %v320_v61  ;;  %v1315_v4 = vcombine.high %v1307_v63, %v1307_v63  ;;  %v909_v5 = vld [vmem:[%s14312_s8 + $0x12b8] sm:$0x3]  ;;  %v239_v7 = vld [vmem:[%s14305_s10 + $0x18] sm:$0xff]  ;;  %v323_v8 = vld [vmem:[%s14312_s8 + $0x68] sm:$0xff] }
  0x82   : > { %2884 = vmatpush1.xpose.msra.mxu1 %v900_v37  ;;  %13232 = vmatprep.subr.bf16.mxu0 %v13231_v33  ;;  %v617_v9 = vld [vmem:[%s14312_s8 + $0x998] sm:$0xff]  ;;  %v619_v11 = vld [vmem:[%s14312_s8 + $0x9a8] sm:$0xff]  ;;  %v1317_v12 = vcombine.high %v239_v7, %v239_v7  ;;  %v906_v13 = vld [vmem:[%s14312_s8 + $0x12a0] sm:$0x3]  ;;  %v1324_v22 = vrot.slane %v239_v7, %v14335_v21 }
  0x83   : > { %13236 = vmatprep.subr.bf16.mxu1 %v13235_v38  ;;  %v1316_v6 = vcombine.high %v1314_v0, %v1314_v0  ;;  %v325_v10 = vld [vmem:[%s14312_s8 + $0x78] sm:$0xff]  ;;  %v13247_v14 = vpack.c.bf16 %v617_v9, %v323_v8  ;;  %v322_v15 = vld [vmem:[%s14312_s8 + $0x60] sm:$0xff]  ;;  %v616_v16 = vld [vmem:[%s14312_s8 + $0x990] sm:$0xff] }
  0x84   : > { %2874 = vmatmul.mubr.f32.vlgmr.msra.gmra.mrb[0].mxu0 %v1273_v25  ;;  %v908_v17 = vld [vmem:[%s14312_s8 + $0x12b0] sm:$0x3]  ;;  %v13251_v18 = vpack.c.bf16 %v619_v11, %v325_v10  ;;  %v618_v20 = vld [vmem:[%s14312_s8 + $0x9a0] sm:$0xff]  ;;  %v1331_v23 = vrot.slane %v1317_v12, %v14335_v21  ;;  %v13249_v24 = vpack.c.bf16 %v616_v16, %v322_v15  ;;  %v1332_v27 = vcombine.high %v1324_v22, %v1324_v22  ;;  %v913_v28 = vld [vmem:[%s14312_s8 + $0x12d8] sm:$0x3] }
  0x85   : > { %2944 = vmatmul.mubr.f32.vlgmr.msra.gmra.mrb[0].mxu1 %v1280_v26  ;;  %13234 = vmatpush1.bf16.xpose.msra.mxu0 %v13233_v43  ;;  %v324_v19 = vld [vmem:[%s14312_s8 + $0x70] sm:$0xff]  ;;  %v911_v26 = vld [vmem:[%s14312_s8 + $0x12c8] sm:$0x3]  ;;  %v621_v32 = vld [vmem:[%s14312_s8 + $0x9b8] sm:$0xff] }
  0x86   : > { %13238 = vmatpush1.bf16.xpose.msra.mxu1 %v13237_v44  ;;  %2953 = vmatprep.subr.mxu0 %v903_v45  ;;  %v13253_v25 = vpack.c.bf16 %v618_v20, %v324_v19  ;;  %v1333_v29 = vcombine.high %v1331_v23, %v1331_v23  ;;  %v240_v30 = vld [vmem:[%s14305_s10 + $0x20] sm:$0xff]  ;;  %v329_v33 = vld [vmem:[%s14312_s8 + $0x98] sm:$0xff]  ;;  %v910_v36 = vld [vmem:[%s14312_s8 + $0x12c0] sm:$0x3] }
  0x87   : > { %3023 = vmatprep.subr.mxu1 %v905_v47  ;;  %3013 = vmatprep.mubr.f32.mxu0 %v1298_v46  ;;  %v327_v31 = vld [vmem:[%s14312_s8 + $0x88] sm:$0xff]  ;;  %v1334_v35 = vcombine.high %v240_v30, %v240_v30  ;;  %v326_v38 = vld [vmem:[%s14312_s8 + $0x80] sm:$0xff]  ;;  %v620_v39 = vld [vmem:[%s14312_s8 + $0x9b0] sm:$0xff]  ;;  %v1341_v44 = vrot.slane %v240_v30, %v14335_v21 }
  0x88   : > { %3083 = vmatprep.mubr.f32.mxu1 %v1299_v48  ;;  %v623_v34 = vld [vmem:[%s14312_s8 + $0x9c8] sm:$0xff]  ;;  %v13255_v37 = vpack.c.bf16 %v621_v32, %v327_v31  ;;  %v912_v40 = vld [vmem:[%s14312_s8 + $0x12d0] sm:$0x3]  ;;  %v622_v43 = vld [vmem:[%s14312_s8 + $0x9c0] sm:$0xff]  ;;  %v13257_v46 = vpack.c.bf16 %v620_v39, %v326_v38 }
  0x89   : > { %v1348_v45 = vrot.slane %v1334_v35, %v14335_v21  ;;  %v915_v48 = vld [vmem:[%s14312_s8 + $0x12e8] sm:$0x3]  ;;  %v1349_v49 = vcombine.high %v1341_v44, %v1341_v44  ;;  %v917_v50 = vld [vmem:[%s14312_s8 + $0x12f8] sm:$0x3]  ;;  %v241_v52 = vld [vmem:[%s14305_s10 + $0x28] sm:$0xff] }
  0x8a   : > { %v331_v53 = vld [vmem:[%s14312_s8 + $0xa8] sm:$0xff]  ;;  %v625_v54 = vld [vmem:[%s14312_s8 + $0x9d8] sm:$0xff]  ;;  %v1351_v57 = vcombine.high %v241_v52, %v241_v52  ;;  %v914_v58 = vld [vmem:[%s14312_s8 + $0x12e0] sm:$0x3] }
  0x8b   : > { %v1350_v51 = vcombine.high %v1348_v45, %v1348_v45  ;;  %v624_v61 = vld [vmem:[%s14312_s8 + $0x9d0] sm:$0xff]  ;;  %v921_v8 = vld [vmem:[%s14312_s8 + $0x1318] sm:$0x3]  ;;  %v335_v11 = vld [vmem:[%s14312_s8 + $0xc8] sm:$0xff] }
  0x8c   : > { %v916_v62 = vld [vmem:[%s14312_s8 + $0x12f0] sm:$0x3]  ;;  %v242_v10 = vld [vmem:[%s14305_s10 + $0x30] sm:$0xff]  ;;  %v918_v16 = vld [vmem:[%s14312_s8 + $0x1300] sm:$0x3] }
  0x8d   : > { %2954 = vmatpush1.xpose.msra.mxu0 %v902_v55  ;;  %v333_v55 = vld [vmem:[%s14312_s8 + $0xb8] sm:$0xff]  ;;  %v1368_v15 = vcombine.high %v242_v10, %v242_v10  ;;  %v628_v19 = vld [vmem:[%s14312_s8 + $0x9f0] sm:$0xff]  ;;  %v922_v39 = vld [vmem:[%s14312_s8 + $0x1320] sm:$0x3] }
  0x8e   : > { %3024 = vmatpush1.xpose.msra.mxu1 %v904_v59  ;;  %13240 = vmatprep.subr.bf16.mxu0 %v13239_v56  ;;  %v627_v56 = vld [vmem:[%s14312_s8 + $0x9e8] sm:$0xff]  ;;  %v13263_v59 = vpack.c.bf16 %v625_v54, %v331_v53  ;;  %v629_v12 = vld [vmem:[%s14312_s8 + $0x9f8] sm:$0xff]  ;;  %v920_v20 = vld [vmem:[%s14312_s8 + $0x1310] sm:$0x3] }
  0x8f   : > { %13244 = vmatprep.subr.bf16.mxu1 %v13243_v60  ;;  %v330_v60 = vld [vmem:[%s14312_s8 + $0xa0] sm:$0xff]  ;;  %v925_v31 = vld [vmem:[%s14312_s8 + $0x1338] sm:$0x3] }
  0x90   : > { %3014 = vmatmul.mubr.f32.vlgmr.msra.gmra.mrb[2].mxu0 %v1290_v41  ;;  %v13259_v41 = vpack.c.bf16 %v623_v34, %v329_v33  ;;  %v243_v33 = vld [vmem:[%s14305_s10 + $0x38] sm:$0xff]  ;;  %v339_v34 = vld [vmem:[%s14312_s8 + $0xe8] sm:$0xff]  ;;  %v929_v53 = vld [vmem:[%s14312_s8 + $0x1358] sm:$0x3] }
  0x91   : > { %13242 = vmatpush1.bf16.xpose.msra.mxu0 %v13241_v1  ;;  %3084 = vmatmul.mubr.f32.vlgmr.msra.gmra.mrb[2].mxu1 %v1297_v42  ;;  %v328_v42 = vld [vmem:[%s14312_s8 + $0x90] sm:$0xff]  ;;  %v626_v1 = vld [vmem:[%s14312_s8 + $0x9e0] sm:$0xff]  ;;  %v633_v35 = vld [vmem:[%s14312_s8 + $0xa18] sm:$0xff]  ;;  %v1385_v38 = vcombine.high %v243_v33, %v243_v33 }
  0x92   : > { %13246 = vmatpush1.bf16.xpose.msra.mxu1 %v13245_v2  ;;  %3093 = vmatprep.subr.mxu0 %v907_v3  ;;  %v13261_v47 = vpack.c.bf16 %v622_v43, %v328_v42  ;;  %v1358_v2 = vrot.slane %v241_v52, %v14335_v21  ;;  %v1365_v3 = vrot.slane %v1351_v57, %v14335_v21  ;;  %v632_v42 = vld [vmem:[%s14312_s8 + $0xa10] sm:$0xff]  ;;  %v637_v57 = vld [vmem:[%s14312_s8 + $0xa38] sm:$0xff] }
  0x93   : > { %3163 = vmatprep.subr.mxu1 %v909_v5  ;;  %3153 = vmatprep.mubr.f32.mxu0 %v1315_v4  ;;  %v13265_v4 = vpack.c.bf16 %v624_v61, %v330_v60  ;;  %v924_v43 = vld [vmem:[%s14312_s8 + $0x1330] sm:$0x3]  ;;  %v926_v61 = vld [vmem:[%s14312_s8 + $0x1340] sm:$0x3] }
  0x94   : > { %3223 = vmatprep.mubr.f32.mxu1 %v1316_v6  ;;  %v919_v6 = vld [vmem:[%s14312_s8 + $0x1308] sm:$0x3]  ;;  %v1366_v7 = vcombine.high %v1358_v2, %v1358_v2  ;;  %v1367_v9 = vcombine.high %v1365_v3, %v1365_v3 }
  0x99   : > { %3094 = vmatpush1.xpose.msra.mxu0 %v906_v13  ;;  %v337_v13 = vld [vmem:[%s14312_s8 + $0xd8] sm:$0xff] }
  0x9a   : > { %3164 = vmatpush1.xpose.msra.mxu1 %v908_v17  ;;  %13248 = vmatprep.subr.bf16.mxu0 %v13247_v14  ;;  %v631_v14 = vld [vmem:[%s14312_s8 + $0xa08] sm:$0xff]  ;;  %v13271_v17 = vpack.c.bf16 %v629_v12, %v335_v11  ;;  %v933_v11 = vld [vmem:[%s14312_s8 + $0x1378] sm:$0x3] }
  0x9b   : > { %13252 = vmatprep.subr.bf16.mxu1 %v13251_v18  ;;  %v334_v18 = vld [vmem:[%s14312_s8 + $0xc0] sm:$0xff] }
  0x9c   : > { %3154 = vmatmul.mubr.f32.vlgmr.msra.gmra.mrb[4].mxu0 %v1307_v63  ;;  %v13267_v63 = vpack.c.bf16 %v627_v56, %v333_v55  ;;  %v244_v55 = vld [vmem:[%s14305_s10 + $0x40] sm:$0xff] }
  0x9d   : > { %13250 = vmatpush1.bf16.xpose.msra.mxu0 %v13249_v24  ;;  %3224 = vmatmul.mubr.f32.vlgmr.msra.gmra.mrb[4].mxu1 %v1314_v0  ;;  %v332_v0 = vld [vmem:[%s14312_s8 + $0xb0] sm:$0xff]  ;;  %v630_v24 = vld [vmem:[%s14312_s8 + $0xa00] sm:$0xff]  ;;  %v343_v56 = vld [vmem:[%s14312_s8 + $0x108] sm:$0xff]  ;;  %v1402_v60 = vcombine.high %v244_v55, %v244_v55 }
  0x9e   : > { %13254 = vmatpush1.bf16.xpose.msra.mxu1 %v13253_v25  ;;  %3233 = vmatprep.subr.mxu0 %v911_v26  ;;  %v13269_v5 = vpack.c.bf16 %v626_v1, %v332_v0  ;;  %v1375_v25 = vrot.slane %v242_v10, %v14335_v21  ;;  %v1382_v26 = vrot.slane %v1368_v15, %v14335_v21  ;;  %v636_v0 = vld [vmem:[%s14312_s8 + $0xa30] sm:$0xff]  ;;  %v641_v15 = vld [vmem:[%s14312_s8 + $0xa58] sm:$0xff] }
  0x9f   : > { %3303 = vmatprep.subr.mxu1 %v913_v28  ;;  %3293 = vmatprep.mubr.f32.mxu0 %v1332_v27  ;;  %v13273_v27 = vpack.c.bf16 %v628_v19, %v334_v18  ;;  %v928_v1 = vld [vmem:[%s14312_s8 + $0x1350] sm:$0x3]  ;;  %v930_v19 = vld [vmem:[%s14312_s8 + $0x1360] sm:$0x3] }
  0xa0   : > { %3363 = vmatprep.mubr.f32.mxu1 %v1333_v29  ;;  %v923_v29 = vld [vmem:[%s14312_s8 + $0x1328] sm:$0x3]  ;;  %v1383_v30 = vcombine.high %v1375_v25, %v1375_v25  ;;  %v1384_v32 = vcombine.high %v1382_v26, %v1382_v26 }
  0xa5   : > { %3234 = vmatpush1.xpose.msra.mxu0 %v910_v36  ;;  %v341_v36 = vld [vmem:[%s14312_s8 + $0xf8] sm:$0xff] }
  0xa6   : > { %3304 = vmatpush1.xpose.msra.mxu1 %v912_v40  ;;  %13256 = vmatprep.subr.bf16.mxu0 %v13255_v37  ;;  %v635_v37 = vld [vmem:[%s14312_s8 + $0xa28] sm:$0xff]  ;;  %v13279_v40 = vpack.c.bf16 %v633_v35, %v339_v34  ;;  %v937_v34 = vld [vmem:[%s14312_s8 + $0x1398] sm:$0x3] }
  0xa7   : > { %13260 = vmatprep.subr.bf16.mxu1 %v13259_v41  ;;  %v338_v41 = vld [vmem:[%s14312_s8 + $0xe0] sm:$0xff] }
  0xa8   : > { %3294 = vmatmul.mubr.f32.vlgmr.msra.gmra.mrb[6].mxu0 %v1324_v22  ;;  %v13275_v22 = vpack.c.bf16 %v631_v14, %v337_v13  ;;  %v245_v13 = vld [vmem:[%s14305_s10 + $0x48] sm:$0xff] }
  0xa9   : > { %13258 = vmatpush1.bf16.xpose.msra.mxu0 %v13257_v46  ;;  %3364 = vmatmul.mubr.f32.vlgmr.msra.gmra.mrb[6].mxu1 %v1331_v23  ;;  %v336_v23 = vld [vmem:[%s14312_s8 + $0xd0] sm:$0xff]  ;;  %v634_v46 = vld [vmem:[%s14312_s8 + $0xa20] sm:$0xff]  ;;  %v347_v14 = vld [vmem:[%s14312_s8 + $0x128] sm:$0xff]  ;;  %v1419_v18 = vcombine.high %v245_v13, %v245_v13 }
  0xaa   : > { %13262 = vmatpush1.bf16.xpose.msra.mxu1 %v13261_v47  ;;  %3373 = vmatprep.subr.mxu0 %v915_v48  ;;  %v13277_v28 = vpack.c.bf16 %v630_v24, %v336_v23  ;;  %v1392_v47 = vrot.slane %v243_v33, %v14335_v21  ;;  %v1399_v48 = vrot.slane %v1385_v38, %v14335_v21  ;;  %v640_v23 = vld [vmem:[%s14312_s8 + $0xa50] sm:$0xff]  ;;  %v645_v38 = vld [vmem:[%s14312_s8 + $0xa78] sm:$0xff] }
  0xab   : > { %3443 = vmatprep.subr.mxu1 %v917_v50  ;;  %3433 = vmatprep.mubr.f32.mxu0 %v1349_v49  ;;  %v13281_v49 = vpack.c.bf16 %v632_v42, %v338_v41  ;;  %v932_v24 = vld [vmem:[%s14312_s8 + $0x1370] sm:$0x3]  ;;  %v934_v42 = vld [vmem:[%s14312_s8 + $0x1380] sm:$0x3] }
  0xac   : > { %3503 = vmatprep.mubr.f32.mxu1 %v1350_v51  ;;  %v927_v51 = vld [vmem:[%s14312_s8 + $0x1348] sm:$0x3]  ;;  %v1400_v52 = vcombine.high %v1392_v47, %v1392_v47  ;;  %v1401_v54 = vcombine.high %v1399_v48, %v1399_v48 }
  0xb1   : > { %3374 = vmatpush1.xpose.msra.mxu0 %v914_v58  ;;  %v345_v58 = vld [vmem:[%s14312_s8 + $0x118] sm:$0xff] }
  0xb2   : > { %3444 = vmatpush1.xpose.msra.mxu1 %v916_v62  ;;  %13264 = vmatprep.subr.bf16.mxu0 %v13263_v59  ;;  %v639_v59 = vld [vmem:[%s14312_s8 + $0xa48] sm:$0xff]  ;;  %v13287_v62 = vpack.c.bf16 %v637_v57, %v343_v56  ;;  %v941_v56 = vld [vmem:[%s14312_s8 + $0x13b8] sm:$0x3] }
  0xb3   : > { %13268 = vmatprep.subr.bf16.mxu1 %v13267_v63  ;;  %v342_v63 = vld [vmem:[%s14312_s8 + $0x100] sm:$0xff] }
  0xb4   : > { %3434 = vmatmul.mubr.f32.vlgmr.msra.gmra.mrb[8].mxu0 %v1341_v44  ;;  %v13283_v44 = vpack.c.bf16 %v635_v37, %v341_v36  ;;  %v246_v36 = vld [vmem:[%s14305_s10 + $0x50] sm:$0xff]  ;;  %v351_v37 = vld [vmem:[%s14312_s8 + $0x148] sm:$0xff] }
  0xb5   : > { %13266 = vmatpush1.bf16.xpose.msra.mxu0 %v13265_v4  ;;  %3504 = vmatmul.mubr.f32.vlgmr.msra.gmra.mrb[8].mxu1 %v1348_v45  ;;  %v340_v45 = vld [vmem:[%s14312_s8 + $0xf0] sm:$0xff]  ;;  %v638_v4 = vld [vmem:[%s14312_s8 + $0xa40] sm:$0xff]  ;;  %v1436_v41 = vcombine.high %v246_v36, %v246_v36 }
  0xb6   : > { %13270 = vmatpush1.bf16.xpose.msra.mxu1 %v13269_v5  ;;  %3513 = vmatprep.subr.mxu0 %v919_v6  ;;  %v13285_v50 = vpack.c.bf16 %v634_v46, %v340_v45  ;;  %v1409_v5 = vrot.slane %v244_v55, %v14335_v21  ;;  %v1416_v6 = vrot.slane %v1402_v60, %v14335_v21  ;;  %v644_v45 = vld [vmem:[%s14312_s8 + $0xa70] sm:$0xff]  ;;  %v649_v60 = vld [vmem:[%s14312_s8 + $0xa98] sm:$0xff] }
  0xb7   : > { %3583 = vmatprep.subr.mxu1 %v921_v8  ;;  %3573 = vmatprep.mubr.f32.mxu0 %v1366_v7  ;;  %v13289_v7 = vpack.c.bf16 %v636_v0, %v342_v63  ;;  %v936_v46 = vld [vmem:[%s14312_s8 + $0x1390] sm:$0x3]  ;;  %v938_v0 = vld [vmem:[%s14312_s8 + $0x13a0] sm:$0x3] }
  0xb8   : > { %3643 = vmatprep.mubr.f32.mxu1 %v1367_v9  ;;  %v931_v9 = vld [vmem:[%s14312_s8 + $0x1368] sm:$0x3]  ;;  %v1417_v10 = vcombine.high %v1409_v5, %v1409_v5  ;;  %v1418_v12 = vcombine.high %v1416_v6, %v1416_v6 }
  0xbd   : > { %3514 = vmatpush1.xpose.msra.mxu0 %v918_v16  ;;  %v349_v16 = vld [vmem:[%s14312_s8 + $0x138] sm:$0xff] }
  0xbe   : > { %3584 = vmatpush1.xpose.msra.mxu1 %v920_v20  ;;  %13272 = vmatprep.subr.bf16.mxu0 %v13271_v17  ;;  %v643_v17 = vld [vmem:[%s14312_s8 + $0xa68] sm:$0xff]  ;;  %v13295_v20 = vpack.c.bf16 %v641_v15, %v347_v14  ;;  %v945_v14 = vld [vmem:[%s14312_s8 + $0x13d8] sm:$0x3] }
  0xbf   : > { %13276 = vmatprep.subr.bf16.mxu1 %v13275_v22  ;;  %v346_v22 = vld [vmem:[%s14312_s8 + $0x120] sm:$0xff] }
  0xc0   : > { %3574 = vmatmul.mubr.f32.vlgmr.msra.gmra.mrb[10].mxu0 %v1358_v2  ;;  %v13291_v2 = vpack.c.bf16 %v639_v59, %v345_v58  ;;  %v247_v58 = vld [vmem:[%s14305_s10 + $0x58] sm:$0xff]  ;;  %v355_v59 = vld [vmem:[%s14312_s8 + $0x168] sm:$0xff] }
  0xc1   : > { %13274 = vmatpush1.bf16.xpose.msra.mxu0 %v13273_v27  ;;  %3644 = vmatmul.mubr.f32.vlgmr.msra.gmra.mrb[10].mxu1 %v1365_v3  ;;  %v344_v3 = vld [vmem:[%s14312_s8 + $0x110] sm:$0xff]  ;;  %v642_v27 = vld [vmem:[%s14312_s8 + $0xa60] sm:$0xff]  ;;  %v1453_v63 = vcombine.high %v247_v58, %v247_v58 }
  0xc2   : > { %13278 = vmatpush1.bf16.xpose.msra.mxu1 %v13277_v28  ;;  %3653 = vmatprep.subr.mxu0 %v923_v29  ;;  %v13293_v8 = vpack.c.bf16 %v638_v4, %v344_v3  ;;  %v1426_v28 = vrot.slane %v245_v13, %v14335_v21  ;;  %v1433_v29 = vrot.slane %v1419_v18, %v14335_v21  ;;  %v648_v3 = vld [vmem:[%s14312_s8 + $0xa90] sm:$0xff]  ;;  %v653_v18 = vld [vmem:[%s14312_s8 + $0xab8] sm:$0xff] }
  0xc3   : > { %3723 = vmatprep.subr.mxu1 %v925_v31  ;;  %3713 = vmatprep.mubr.f32.mxu0 %v1383_v30  ;;  %v13297_v30 = vpack.c.bf16 %v640_v23, %v346_v22  ;;  %v940_v4 = vld [vmem:[%s14312_s8 + $0x13b0] sm:$0x3]  ;;  %v942_v23 = vld [vmem:[%s14312_s8 + $0x13c0] sm:$0x3] }
  0xc4   : > { %3783 = vmatprep.mubr.f32.mxu1 %v1384_v32  ;;  %v935_v32 = vld [vmem:[%s14312_s8 + $0x1388] sm:$0x3]  ;;  %v1434_v33 = vcombine.high %v1426_v28, %v1426_v28  ;;  %v1435_v35 = vcombine.high %v1433_v29, %v1433_v29 }
  0xc9   : > { %3654 = vmatpush1.xpose.msra.mxu0 %v922_v39  ;;  %v353_v39 = vld [vmem:[%s14312_s8 + $0x158] sm:$0xff] }
  0xca   : > { %3724 = vmatpush1.xpose.msra.mxu1 %v924_v43  ;;  %13280 = vmatprep.subr.bf16.mxu0 %v13279_v40  ;;  %v647_v40 = vld [vmem:[%s14312_s8 + $0xa88] sm:$0xff]  ;;  %v13303_v43 = vpack.c.bf16 %v645_v38, %v351_v37  ;;  %v949_v37 = vld [vmem:[%s14312_s8 + $0x13f8] sm:$0x3] }
  0xcb   : > { %13284 = vmatprep.subr.bf16.mxu1 %v13283_v44  ;;  %v350_v44 = vld [vmem:[%s14312_s8 + $0x140] sm:$0xff] }
  0xcc   : > { %3714 = vmatmul.mubr.f32.vlgmr.msra.gmra.mrb[12].mxu0 %v1375_v25  ;;  %v13299_v25 = vpack.c.bf16 %v643_v17, %v349_v16  ;;  %v248_v16 = vld [vmem:[%s14305_s10 + $0x60] sm:$0xff] }
  0xcd   : > { %13282 = vmatpush1.bf16.xpose.msra.mxu0 %v13281_v49  ;;  %3784 = vmatmul.mubr.f32.vlgmr.msra.gmra.mrb[12].mxu1 %v1382_v26  ;;  %v348_v26 = vld [vmem:[%s14312_s8 + $0x130] sm:$0xff]  ;;  %v646_v49 = vld [vmem:[%s14312_s8 + $0xa80] sm:$0xff]  ;;  %v359_v17 = vld [vmem:[%s14312_s8 + $0x188] sm:$0xff]  ;;  %v1470_v22 = vcombine.high %v248_v16, %v248_v16 }
  0xce   : > { %13286 = vmatpush1.bf16.xpose.msra.mxu1 %v13285_v50  ;;  %3793 = vmatprep.subr.mxu0 %v927_v51  ;;  %v13301_v31 = vpack.c.bf16 %v642_v27, %v348_v26  ;;  %v1443_v50 = vrot.slane %v246_v36, %v14335_v21  ;;  %v1450_v51 = vrot.slane %v1436_v41, %v14335_v21  ;;  %v652_v26 = vld [vmem:[%s14312_s8 + $0xab0] sm:$0xff]  ;;  %v657_v41 = vld [vmem:[%s14312_s8 + $0xad8] sm:$0xff] }
  0xcf   : > { %3863 = vmatprep.subr.mxu1 %v929_v53  ;;  %3853 = vmatprep.mubr.f32.mxu0 %v1400_v52  ;;  %v13305_v52 = vpack.c.bf16 %v644_v45, %v350_v44  ;;  %v944_v27 = vld [vmem:[%s14312_s8 + $0x13d0] sm:$0x3]  ;;  %v946_v45 = vld [vmem:[%s14312_s8 + $0x13e0] sm:$0x3] }
  0xd0   : > { %3923 = vmatprep.mubr.f32.mxu1 %v1401_v54  ;;  %v939_v54 = vld [vmem:[%s14312_s8 + $0x13a8] sm:$0x3]  ;;  %v1451_v55 = vcombine.high %v1443_v50, %v1443_v50  ;;  %v1452_v57 = vcombine.high %v1450_v51, %v1450_v51 }
  0xd5   : > { %3794 = vmatpush1.xpose.msra.mxu0 %v926_v61  ;;  %v357_v61 = vld [vmem:[%s14312_s8 + $0x178] sm:$0xff] }
  0xd6   : > { %3864 = vmatpush1.xpose.msra.mxu1 %v928_v1  ;;  %13288 = vmatprep.subr.bf16.mxu0 %v13287_v62  ;;  %v651_v62 = vld [vmem:[%s14312_s8 + $0xaa8] sm:$0xff]  ;;  %v13311_v1 = vpack.c.bf16 %v649_v60, %v355_v59  ;;  %v953_v59 = vld [vmem:[%s14312_s8 + $0x1418] sm:$0x3] }
  0xd7   : > { %13292 = vmatprep.subr.bf16.mxu1 %v13291_v2  ;;  %v354_v2 = vld [vmem:[%s14312_s8 + $0x160] sm:$0xff] }
  0xd8   : > { %3854 = vmatmul.mubr.f32.vlgmr.msra.gmra.mrb[14].mxu0 %v1392_v47  ;;  %v13307_v47 = vpack.c.bf16 %v647_v40, %v353_v39  ;;  %v249_v39 = vld [vmem:[%s14305_s10 + $0x68] sm:$0xff] }
  0xd9   : > { %13290 = vmatpush1.bf16.xpose.msra.mxu0 %v13289_v7  ;;  %3924 = vmatmul.mubr.f32.vlgmr.msra.gmra.mrb[14].mxu1 %v1399_v48  ;;  %v352_v48 = vld [vmem:[%s14312_s8 + $0x150] sm:$0xff]  ;;  %v650_v7 = vld [vmem:[%s14312_s8 + $0xaa0] sm:$0xff]  ;;  %v363_v40 = vld [vmem:[%s14312_s8 + $0x1a8] sm:$0xff]  ;;  %v1487_v44 = vcombine.high %v249_v39, %v249_v39 }
  0xda   : > { %13294 = vmatpush1.bf16.xpose.msra.mxu1 %v13293_v8  ;;  %3933 = vmatprep.subr.mxu0 %v931_v9  ;;  %v13309_v53 = vpack.c.bf16 %v646_v49, %v352_v48  ;;  %v1460_v8 = vrot.slane %v247_v58, %v14335_v21  ;;  %v1467_v9 = vrot.slane %v1453_v63, %v14335_v21  ;;  %v656_v48 = vld [vmem:[%s14312_s8 + $0xad0] sm:$0xff]  ;;  %v661_v63 = vld [vmem:[%s14312_s8 + $0xaf8] sm:$0xff] }
  0xdb   : > { %4003 = vmatprep.subr.mxu1 %v933_v11  ;;  %3993 = vmatprep.mubr.f32.mxu0 %v1417_v10  ;;  %v13313_v10 = vpack.c.bf16 %v648_v3, %v354_v2  ;;  %v948_v49 = vld [vmem:[%s14312_s8 + $0x13f0] sm:$0x3]  ;;  %v950_v3 = vld [vmem:[%s14312_s8 + $0x1400] sm:$0x3] }
  0xdc   : > { %4063 = vmatprep.mubr.f32.mxu1 %v1418_v12  ;;  %v943_v12 = vld [vmem:[%s14312_s8 + $0x13c8] sm:$0x3]  ;;  %v1468_v13 = vcombine.high %v1460_v8, %v1460_v8  ;;  %v1469_v15 = vcombine.high %v1467_v9, %v1467_v9 }
  0xe1   : > { %3934 = vmatpush1.xpose.msra.mxu0 %v930_v19  ;;  %v361_v19 = vld [vmem:[%s14312_s8 + $0x198] sm:$0xff] }
  0xe2   : > { %4004 = vmatpush1.xpose.msra.mxu1 %v932_v24  ;;  %13296 = vmatprep.subr.bf16.mxu0 %v13295_v20  ;;  %v655_v20 = vld [vmem:[%s14312_s8 + $0xac8] sm:$0xff]  ;;  %v13319_v24 = vpack.c.bf16 %v653_v18, %v359_v17  ;;  %v957_v17 = vld [vmem:[%s14312_s8 + $0x1438] sm:$0x3] }
  0xe3   : > { %13300 = vmatprep.subr.bf16.mxu1 %v13299_v25  ;;  %v358_v25 = vld [vmem:[%s14312_s8 + $0x180] sm:$0xff] }
  0xe4   : > { %3994 = vmatmul.mubr.f32.vlgmr.msra.gmra.mrb[16].mxu0 %v1409_v5  ;;  %v13315_v5 = vpack.c.bf16 %v651_v62, %v357_v61  ;;  %v250_v61 = vld [vmem:[%s14305_s10 + $0x70] sm:$0xff]  ;;  %v367_v62 = vld [vmem:[%s14312_s8 + $0x1c8] sm:$0xff] }
  0xe5   : > { %13298 = vmatpush1.bf16.xpose.msra.mxu0 %v13297_v30  ;;  %4064 = vmatmul.mubr.f32.vlgmr.msra.gmra.mrb[16].mxu1 %v1416_v6  ;;  %v356_v6 = vld [vmem:[%s14312_s8 + $0x170] sm:$0xff]  ;;  %v654_v30 = vld [vmem:[%s14312_s8 + $0xac0] sm:$0xff]  ;;  %v1504_v2 = vcombine.high %v250_v61, %v250_v61 }
  0xe6   : > { %13302 = vmatpush1.bf16.xpose.msra.mxu1 %v13301_v31  ;;  %4073 = vmatprep.subr.mxu0 %v935_v32  ;;  %v13317_v11 = vpack.c.bf16 %v650_v7, %v356_v6  ;;  %v1477_v31 = vrot.slane %v248_v16, %v14335_v21  ;;  %v1484_v32 = vrot.slane %v1470_v22, %v14335_v21  ;;  %v660_v6 = vld [vmem:[%s14312_s8 + $0xaf0] sm:$0xff]  ;;  %v665_v22 = vld [vmem:[%s14312_s8 + $0xb18] sm:$0xff] }
  0xe7   : > { %4143 = vmatprep.subr.mxu1 %v937_v34  ;;  %4133 = vmatprep.mubr.f32.mxu0 %v1434_v33  ;;  %v13321_v33 = vpack.c.bf16 %v652_v26, %v358_v25  ;;  %v952_v7 = vld [vmem:[%s14312_s8 + $0x1410] sm:$0x3]  ;;  %v954_v26 = vld [vmem:[%s14312_s8 + $0x1420] sm:$0x3] }
  0xe8   : > { %4203 = vmatprep.mubr.f32.mxu1 %v1435_v35  ;;  %v947_v35 = vld [vmem:[%s14312_s8 + $0x13e8] sm:$0x3]  ;;  %v1485_v36 = vcombine.high %v1477_v31, %v1477_v31  ;;  %v1486_v38 = vcombine.high %v1484_v32, %v1484_v32 }
  0xed   : > { %4074 = vmatpush1.xpose.msra.mxu0 %v934_v42  ;;  %v365_v42 = vld [vmem:[%s14312_s8 + $0x1b8] sm:$0xff] }
  0xee   : > { %4144 = vmatpush1.xpose.msra.mxu1 %v936_v46  ;;  %13304 = vmatprep.subr.bf16.mxu0 %v13303_v43  ;;  %v659_v43 = vld [vmem:[%s14312_s8 + $0xae8] sm:$0xff]  ;;  %v13327_v46 = vpack.c.bf16 %v657_v41, %v363_v40  ;;  %v961_v40 = vld [vmem:[%s14312_s8 + $0x1458] sm:$0x3] }
  0xef   : > { %13308 = vmatprep.subr.bf16.mxu1 %v13307_v47  ;;  %v362_v47 = vld [vmem:[%s14312_s8 + $0x1a0] sm:$0xff] }
  0xf0   : > { %4134 = vmatmul.mubr.f32.vlgmr.msra.gmra.mrb[18].mxu0 %v1426_v28  ;;  %v13323_v28 = vpack.c.bf16 %v655_v20, %v361_v19  ;;  %v251_v19 = vld [vmem:[%s14305_s10 + $0x78] sm:$0xff]  ;;  %v371_v20 = vld [vmem:[%s14312_s8 + $0x1e8] sm:$0xff] }
  0xf1   : > { %13306 = vmatpush1.bf16.xpose.msra.mxu0 %v13305_v52  ;;  %4204 = vmatmul.mubr.f32.vlgmr.msra.gmra.mrb[18].mxu1 %v1433_v29  ;;  %v360_v29 = vld [vmem:[%s14312_s8 + $0x190] sm:$0xff]  ;;  %v658_v52 = vld [vmem:[%s14312_s8 + $0xae0] sm:$0xff]  ;;  %v1521_v25 = vcombine.high %v251_v19, %v251_v19 }
  0xf2   : > { %13310 = vmatpush1.bf16.xpose.msra.mxu1 %v13309_v53  ;;  %4213 = vmatprep.subr.mxu0 %v939_v54  ;;  %v13325_v34 = vpack.c.bf16 %v654_v30, %v360_v29  ;;  %v1494_v53 = vrot.slane %v249_v39, %v14335_v21  ;;  %v1501_v54 = vrot.slane %v1487_v44, %v14335_v21  ;;  %v664_v29 = vld [vmem:[%s14312_s8 + $0xb10] sm:$0xff]  ;;  %v669_v44 = vld [vmem:[%s14312_s8 + $0xb38] sm:$0xff] }
  0xf3   : > { %4283 = vmatprep.subr.mxu1 %v941_v56  ;;  %4273 = vmatprep.mubr.f32.mxu0 %v1451_v55  ;;  %v13329_v55 = vpack.c.bf16 %v656_v48, %v362_v47  ;;  %v956_v30 = vld [vmem:[%s14312_s8 + $0x1430] sm:$0x3]  ;;  %v958_v48 = vld [vmem:[%s14312_s8 + $0x1440] sm:$0x3] }
  0xf4   : > { %4343 = vmatprep.mubr.f32.mxu1 %v1452_v57  ;;  %v951_v57 = vld [vmem:[%s14312_s8 + $0x1408] sm:$0x3]  ;;  %v1502_v58 = vcombine.high %v1494_v53, %v1494_v53  ;;  %v1503_v60 = vcombine.high %v1501_v54, %v1501_v54 }
  0xf9   : > { %4214 = vmatpush1.xpose.msra.mxu0 %v938_v0  ;;  %v369_v0 = vld [vmem:[%s14312_s8 + $0x1d8] sm:$0xff] }
  0xfa   : > { %4284 = vmatpush1.xpose.msra.mxu1 %v940_v4  ;;  %13312 = vmatprep.subr.bf16.mxu0 %v13311_v1  ;;  %v663_v1 = vld [vmem:[%s14312_s8 + $0xb08] sm:$0xff]  ;;  %v13335_v4 = vpack.c.bf16 %v661_v63, %v367_v62  ;;  %v965_v62 = vld [vmem:[%s14312_s8 + $0x1478] sm:$0x3] }
  0xfb   : > { %13316 = vmatprep.subr.bf16.mxu1 %v13315_v5  ;;  %v366_v5 = vld [vmem:[%s14312_s8 + $0x1c0] sm:$0xff] }
  0xfc   : > { %4274 = vmatmul.mubr.f32.vlgmr.msra.gmra.mrb[20].mxu0 %v1443_v50  ;;  %v13331_v50 = vpack.c.bf16 %v659_v43, %v365_v42  ;;  %v252_v42 = vld [vmem:[%s14305_s10 + $0x80] sm:$0xff] }
  0xfd   : > { %13314 = vmatpush1.bf16.xpose.msra.mxu0 %v13313_v10  ;;  %4344 = vmatmul.mubr.f32.vlgmr.msra.gmra.mrb[20].mxu1 %v1450_v51  ;;  %v364_v51 = vld [vmem:[%s14312_s8 + $0x1b0] sm:$0xff]  ;;  %v662_v10 = vld [vmem:[%s14312_s8 + $0xb00] sm:$0xff]  ;;  %v375_v43 = vld [vmem:[%s14312_s8 + $0x208] sm:$0xff]  ;;  %v1538_v47 = vcombine.high %v252_v42, %v252_v42 }
  0xfe   : > { %13318 = vmatpush1.bf16.xpose.msra.mxu1 %v13317_v11  ;;  %4353 = vmatprep.subr.mxu0 %v943_v12  ;;  %v13333_v56 = vpack.c.bf16 %v658_v52, %v364_v51  ;;  %v1511_v11 = vrot.slane %v250_v61, %v14335_v21  ;;  %v1518_v12 = vrot.slane %v1504_v2, %v14335_v21  ;;  %v668_v51 = vld [vmem:[%s14312_s8 + $0xb30] sm:$0xff]  ;;  %v673_v2 = vld [vmem:[%s14312_s8 + $0xb58] sm:$0xff] }
  0xff   : > { %4423 = vmatprep.subr.mxu1 %v945_v14  ;;  %4413 = vmatprep.mubr.f32.mxu0 %v1468_v13  ;;  %v13337_v13 = vpack.c.bf16 %v660_v6, %v366_v5  ;;  %v960_v52 = vld [vmem:[%s14312_s8 + $0x1450] sm:$0x3]  ;;  %v962_v6 = vld [vmem:[%s14312_s8 + $0x1460] sm:$0x3] }
 0x100   : > { %4483 = vmatprep.mubr.f32.mxu1 %v1469_v15  ;;  %v955_v15 = vld [vmem:[%s14312_s8 + $0x1428] sm:$0x3]  ;;  %v1519_v16 = vcombine.high %v1511_v11, %v1511_v11  ;;  %v1520_v18 = vcombine.high %v1518_v12, %v1518_v12 }
 0x105   : > { %4354 = vmatpush1.xpose.msra.mxu0 %v942_v23  ;;  %v373_v23 = vld [vmem:[%s14312_s8 + $0x1f8] sm:$0xff] }
 0x106   : > { %4424 = vmatpush1.xpose.msra.mxu1 %v944_v27  ;;  %13320 = vmatprep.subr.bf16.mxu0 %v13319_v24  ;;  %v667_v24 = vld [vmem:[%s14312_s8 + $0xb28] sm:$0xff]  ;;  %v13343_v27 = vpack.c.bf16 %v665_v22, %v371_v20  ;;  %v969_v20 = vld [vmem:[%s14312_s8 + $0x1498] sm:$0x3] }
 0x107   : > { %13324 = vmatprep.subr.bf16.mxu1 %v13323_v28  ;;  %v370_v28 = vld [vmem:[%s14312_s8 + $0x1e0] sm:$0xff] }
 0x108   : > { %4414 = vmatmul.mubr.f32.vlgmr.msra.gmra.mrb[22].mxu0 %v1460_v8  ;;  %v13339_v8 = vpack.c.bf16 %v663_v1, %v369_v0  ;;  %v253_v0 = vld [vmem:[%s14305_s10 + $0x88] sm:$0xff] }
 0x109   : > { %13322 = vmatpush1.bf16.xpose.msra.mxu0 %v13321_v33  ;;  %4484 = vmatmul.mubr.f32.vlgmr.msra.gmra.mrb[22].mxu1 %v1467_v9  ;;  %v368_v9 = vld [vmem:[%s14312_s8 + $0x1d0] sm:$0xff]  ;;  %v666_v33 = vld [vmem:[%s14312_s8 + $0xb20] sm:$0xff]  ;;  %v379_v1 = vld [vmem:[%s14312_s8 + $0x228] sm:$0xff]  ;;  %v1555_v5 = vcombine.high %v253_v0, %v253_v0 }
 0x10a   : > { %13326 = vmatpush1.bf16.xpose.msra.mxu1 %v13325_v34  ;;  %4493 = vmatprep.subr.mxu0 %v947_v35  ;;  %v13341_v14 = vpack.c.bf16 %v662_v10, %v368_v9  ;;  %v1528_v34 = vrot.slane %v251_v19, %v14335_v21  ;;  %v1535_v35 = vrot.slane %v1521_v25, %v14335_v21  ;;  %v672_v9 = vld [vmem:[%s14312_s8 + $0xb50] sm:$0xff]  ;;  %v677_v25 = vld [vmem:[%s14312_s8 + $0xb78] sm:$0xff] }
 0x10b   : > { %4563 = vmatprep.subr.mxu1 %v949_v37  ;;  %4553 = vmatprep.mubr.f32.mxu0 %v1485_v36  ;;  %v13345_v36 = vpack.c.bf16 %v664_v29, %v370_v28  ;;  %v964_v10 = vld [vmem:[%s14312_s8 + $0x1470] sm:$0x3]  ;;  %v966_v29 = vld [vmem:[%s14312_s8 + $0x1480] sm:$0x3] }
 0x10c   : > { %4623 = vmatprep.mubr.f32.mxu1 %v1486_v38  ;;  %v959_v38 = vld [vmem:[%s14312_s8 + $0x1448] sm:$0x3]  ;;  %v1536_v39 = vcombine.high %v1528_v34, %v1528_v34  ;;  %v1537_v41 = vcombine.high %v1535_v35, %v1535_v35 }
 0x111   : > { %4494 = vmatpush1.xpose.msra.mxu0 %v946_v45  ;;  %v377_v45 = vld [vmem:[%s14312_s8 + $0x218] sm:$0xff] }
 0x112   : > { %4564 = vmatpush1.xpose.msra.mxu1 %v948_v49  ;;  %13328 = vmatprep.subr.bf16.mxu0 %v13327_v46  ;;  %v671_v46 = vld [vmem:[%s14312_s8 + $0xb48] sm:$0xff]  ;;  %v13351_v49 = vpack.c.bf16 %v669_v44, %v375_v43  ;;  %v973_v43 = vld [vmem:[%s14312_s8 + $0x14b8] sm:$0x3] }
 0x113   : > { %13332 = vmatprep.subr.bf16.mxu1 %v13331_v50  ;;  %v374_v50 = vld [vmem:[%s14312_s8 + $0x200] sm:$0xff] }
 0x114   : > { %4554 = vmatmul.mubr.f32.vlgmr.msra.gmra.mrb[24].mxu0 %v1477_v31  ;;  %v13347_v31 = vpack.c.bf16 %v667_v24, %v373_v23  ;;  %v254_v23 = vld [vmem:[%s14305_s10 + $0x90] sm:$0xff]  ;;  %v383_v24 = vld [vmem:[%s14312_s8 + $0x248] sm:$0xff] }
 0x115   : > { %13330 = vmatpush1.bf16.xpose.msra.mxu0 %v13329_v55  ;;  %4624 = vmatmul.mubr.f32.vlgmr.msra.gmra.mrb[24].mxu1 %v1484_v32  ;;  %v372_v32 = vld [vmem:[%s14312_s8 + $0x1f0] sm:$0xff]  ;;  %v670_v55 = vld [vmem:[%s14312_s8 + $0xb40] sm:$0xff]  ;;  %v1572_v28 = vcombine.high %v254_v23, %v254_v23 }
 0x116   : > { %13334 = vmatpush1.bf16.xpose.msra.mxu1 %v13333_v56  ;;  %4633 = vmatprep.subr.mxu0 %v951_v57  ;;  %v13349_v37 = vpack.c.bf16 %v666_v33, %v372_v32  ;;  %v1545_v56 = vrot.slane %v252_v42, %v14335_v21  ;;  %v1552_v57 = vrot.slane %v1538_v47, %v14335_v21  ;;  %v676_v32 = vld [vmem:[%s14312_s8 + $0xb70] sm:$0xff]  ;;  %v681_v47 = vld [vmem:[%s14312_s8 + $0xb98] sm:$0xff] }
 0x117   : > { %4703 = vmatprep.subr.mxu1 %v953_v59  ;;  %4693 = vmatprep.mubr.f32.mxu0 %v1502_v58  ;;  %v13353_v58 = vpack.c.bf16 %v668_v51, %v374_v50  ;;  %v968_v33 = vld [vmem:[%s14312_s8 + $0x1490] sm:$0x3]  ;;  %v970_v51 = vld [vmem:[%s14312_s8 + $0x14a0] sm:$0x3] }
 0x118   : > { %4763 = vmatprep.mubr.f32.mxu1 %v1503_v60  ;;  %v963_v60 = vld [vmem:[%s14312_s8 + $0x1468] sm:$0x3]  ;;  %v1553_v61 = vcombine.high %v1545_v56, %v1545_v56  ;;  %v1554_v63 = vcombine.high %v1552_v57, %v1552_v57 }
 0x11d   : > { %4634 = vmatpush1.xpose.msra.mxu0 %v950_v3  ;;  %v381_v3 = vld [vmem:[%s14312_s8 + $0x238] sm:$0xff] }
 0x11e   : > { %4704 = vmatpush1.xpose.msra.mxu1 %v952_v7  ;;  %13336 = vmatprep.subr.bf16.mxu0 %v13335_v4  ;;  %v675_v4 = vld [vmem:[%s14312_s8 + $0xb68] sm:$0xff]  ;;  %v13359_v7 = vpack.c.bf16 %v673_v2, %v379_v1 }
 0x11f   : > { %13340 = vmatprep.subr.bf16.mxu1 %v13339_v8  ;;  %v378_v8 = vld [vmem:[%s14312_s8 + $0x220] sm:$0xff] }
 0x120   : > { %4694 = vmatmul.mubr.f32.vlgmr.msra.gmra.mrb[26].mxu0 %v1494_v53  ;;  %v13355_v53 = vpack.c.bf16 %v671_v46, %v377_v45  ;;  %v255_v45 = vld [vmem:[%s14305_s10 + $0x98] sm:$0xff]  ;;  %v387_v46 = vld [vmem:[%s14312_s8 + $0x268] sm:$0xff] }
 0x121   : > { %13338 = vmatpush1.bf16.xpose.msra.mxu0 %v13337_v13  ;;  %4764 = vmatmul.mubr.f32.vlgmr.msra.gmra.mrb[26].mxu1 %v1501_v54  ;;  %v376_v54 = vld [vmem:[%s14312_s8 + $0x210] sm:$0xff]  ;;  %v674_v13 = vld [vmem:[%s14312_s8 + $0xb60] sm:$0xff]  ;;  %v1589_v50 = vcombine.high %v255_v45, %v255_v45 }
 0x122   : > { %13342 = vmatpush1.bf16.xpose.msra.mxu1 %v13341_v14  ;;  %4773 = vmatprep.subr.mxu0 %v955_v15  ;;  %v13357_v59 = vpack.c.bf16 %v670_v55, %v376_v54  ;;  %v1562_v14 = vrot.slane %v253_v0, %v14335_v21  ;;  %v1569_v15 = vrot.slane %v1555_v5, %v14335_v21  ;;  %v680_v54 = vld [vmem:[%s14312_s8 + $0xb90] sm:$0xff] }
 0x123   : > { %4843 = vmatprep.subr.mxu1 %v957_v17  ;;  %4833 = vmatprep.mubr.f32.mxu0 %v1519_v16  ;;  %v13361_v16 = vpack.c.bf16 %v672_v9, %v378_v8  ;;  %v256_v8 = vld [vmem:[%s14305_s10 + $0xa0] sm:$0xff] }
 0x124   : > { %4903 = vmatprep.mubr.f32.mxu1 %v1520_v18  ;;  %v967_v18 = vld [vmem:[%s14312_s8 + $0x1488] sm:$0x3]  ;;  %v1570_v19 = vcombine.high %v1562_v14, %v1562_v14  ;;  %v1571_v22 = vcombine.high %v1569_v15, %v1569_v15 }
 0x125   : > { %v391_v9 = vld [vmem:[%s14312_s8 + $0x288] sm:$0xff] }
 0x129   : > { %4774 = vmatpush1.xpose.msra.mxu0 %v954_v26  ;;  %v385_v26 = vld [vmem:[%s14312_s8 + $0x258] sm:$0xff] }
 0x12a   : > { %4844 = vmatpush1.xpose.msra.mxu1 %v956_v30  ;;  %13344 = vmatprep.subr.bf16.mxu0 %v13343_v27  ;;  %v679_v27 = vld [vmem:[%s14312_s8 + $0xb88] sm:$0xff]  ;;  %v13367_v30 = vpack.c.bf16 %v677_v25, %v383_v24  ;;  %v1613_v24 = vrot.slane %v256_v8, %v14335_v21 }
 0x12b   : > { %13348 = vmatprep.subr.bf16.mxu1 %v13347_v31  ;;  %v382_v31 = vld [vmem:[%s14312_s8 + $0x240] sm:$0xff] }
 0x12c   : > { %4834 = vmatmul.mubr.f32.vlgmr.msra.gmra.mrb[28].mxu0 %v1511_v11  ;;  %v13363_v11 = vpack.c.bf16 %v675_v4, %v381_v3  ;;  %v975_v4 = vld [vmem:[%s14312_s8 + $0x14c8] sm:$0x3] }
 0x12d   : > { %13346 = vmatpush1.bf16.xpose.msra.mxu0 %v13345_v36  ;;  %4904 = vmatmul.mubr.f32.vlgmr.msra.gmra.mrb[28].mxu1 %v1518_v12  ;;  %v380_v12 = vld [vmem:[%s14312_s8 + $0x230] sm:$0xff]  ;;  %v678_v36 = vld [vmem:[%s14312_s8 + $0xb80] sm:$0xff] }
 0x12e   : > { %13350 = vmatpush1.bf16.xpose.msra.mxu1 %v13349_v37  ;;  %4913 = vmatprep.subr.mxu0 %v959_v38  ;;  %v13365_v17 = vpack.c.bf16 %v674_v13, %v380_v12  ;;  %v1579_v37 = vrot.slane %v254_v23, %v14335_v21  ;;  %v1586_v38 = vrot.slane %v1572_v28, %v14335_v21  ;;  %v687_v12 = vld [vmem:[%s14312_s8 + $0xbc8] sm:$0xff]  ;;  %v686_v23 = vld [vmem:[%s14312_s8 + $0xbc0] sm:$0xff] }
 0x12f   : > { %4983 = vmatprep.subr.mxu1 %v961_v40  ;;  %4973 = vmatprep.mubr.f32.mxu0 %v1536_v39  ;;  %v13369_v39 = vpack.c.bf16 %v676_v32, %v382_v31  ;;  %v1606_v13 = vcombine.high %v256_v8, %v256_v8 }
 0x130   : > { %5043 = vmatprep.mubr.f32.mxu1 %v1537_v41  ;;  %v971_v41 = vld [vmem:[%s14312_s8 + $0x14a8] sm:$0x3]  ;;  %v1587_v42 = vcombine.high %v1579_v37, %v1579_v37  ;;  %v1588_v44 = vcombine.high %v1586_v38, %v1586_v38 }
 0x131   : > { %v1620_v28 = vrot.slane %v1606_v13, %v14335_v21 }
 0x135   : > { %4914 = vmatpush1.xpose.msra.mxu0 %v958_v48  ;;  %v389_v48 = vld [vmem:[%s14312_s8 + $0x278] sm:$0xff] }
 0x136   : > { %4984 = vmatpush1.xpose.msra.mxu1 %v960_v52  ;;  %13352 = vmatprep.subr.bf16.mxu0 %v13351_v49  ;;  %v683_v49 = vld [vmem:[%s14312_s8 + $0xba8] sm:$0xff]  ;;  %v13375_v52 = vpack.c.bf16 %v681_v47, %v387_v46  ;;  %v688_v46 = vld [vmem:[%s14312_s8 + $0xbd0] sm:$0xff] }
 0x137   : > { %13356 = vmatprep.subr.bf16.mxu1 %v13355_v53  ;;  %v386_v53 = vld [vmem:[%s14312_s8 + $0x260] sm:$0xff] }
 0x138   : > { %4974 = vmatmul.mubr.f32.vlgmr.msra.gmra.mrb[30].mxu0 %v1528_v34  ;;  %v13371_v34 = vpack.c.bf16 %v679_v27, %v385_v26  ;;  %v13377_v1 = vpack.c.bf16 %v680_v54, %v386_v53 }
 0x139   : > { %13354 = vmatpush1.bf16.xpose.msra.mxu0 %v13353_v58  ;;  %5044 = vmatmul.mubr.f32.vlgmr.msra.gmra.mrb[30].mxu1 %v1535_v35  ;;  %v384_v35 = vld [vmem:[%s14312_s8 + $0x250] sm:$0xff] }
 0x13a   : > { %13358 = vmatpush1.bf16.xpose.msra.mxu1 %v13357_v59  ;;  %5053 = vmatprep.subr.mxu0 %v963_v60  ;;  %v13373_v40 = vpack.c.bf16 %v678_v36, %v384_v35  ;;  %v388_v58 = vld [vmem:[%s14312_s8 + $0x270] sm:$0xff]  ;;  %v682_v59 = vld [vmem:[%s14312_s8 + $0xba0] sm:$0xff]  ;;  %v1596_v60 = vrot.slane %v255_v45, %v14335_v21  ;;  %v981_v35 = vld [vmem:[%s14312_s8 + $0x14f8] sm:$0x3]  ;;  %v1622_v36 = vcombine.high %v1620_v28, %v1620_v28 }
 0x13b   : > { %5123 = vmatprep.subr.mxu1 %v965_v62  ;;  %5113 = vmatprep.mubr.f32.mxu0 %v1553_v61  ;;  %v13381_v3 = vpack.c.bf16 %v682_v59, %v388_v58  ;;  %v394_v45 = vld [vmem:[%s14312_s8 + $0x2a0] sm:$0xff] }
 0x13c   : > { %5183 = vmatprep.mubr.f32.mxu1 %v1554_v63  ;;  %v1603_v63 = vrot.slane %v1589_v50, %v14335_v21  ;;  %v1604_v5 = vcombine.high %v1596_v60, %v1596_v60  ;;  %v396_v50 = vld [vmem:[%s14312_s8 + $0x2b0] sm:$0xff] }
 0x141   : > { %5054 = vmatpush1.xpose.msra.mxu0 %v962_v6  ;;  %v977_v6 = vld [vmem:[%s14312_s8 + $0x14d8] sm:$0x3] }
 0x142   : > { %5124 = vmatpush1.xpose.msra.mxu1 %v964_v10  ;;  %13360 = vmatprep.subr.bf16.mxu0 %v13359_v7  ;;  %v1605_v7 = vcombine.high %v1603_v63, %v1603_v63  ;;  %v685_v10 = vld [vmem:[%s14312_s8 + $0xbb8] sm:$0xff] }
 0x143   : > { %13364 = vmatprep.subr.bf16.mxu1 %v13363_v11  ;;  %v393_v11 = vld [vmem:[%s14312_s8 + $0x298] sm:$0xff] }
 0x144   : > { %5114 = vmatmul.mubr.f32.vlgmr.msra.gmra.mrb[32].mxu0 %v1545_v56  ;;  %v972_v56 = vld [vmem:[%s14312_s8 + $0x14b0] sm:$0x3] }
 0x145   : > { %13362 = vmatpush1.bf16.xpose.msra.mxu0 %v13361_v16  ;;  %5184 = vmatmul.mubr.f32.vlgmr.msra.gmra.mrb[32].mxu1 %v1552_v57  ;;  %v13379_v57 = vpack.c.bf16 %v683_v49, %v389_v48  ;;  %v390_v16 = vld [vmem:[%s14312_s8 + $0x280] sm:$0xff]  ;;  %v980_v48 = vld [vmem:[%s14312_s8 + $0x14f0] sm:$0x3] }
 0x146   : > { %13366 = vmatpush1.bf16.xpose.msra.mxu1 %v13365_v17  ;;  %5193 = vmatprep.subr.mxu0 %v967_v18  ;;  %v684_v17 = vld [vmem:[%s14312_s8 + $0xbb0] sm:$0xff] }
 0x147   : > { %5263 = vmatprep.subr.mxu1 %v969_v20  ;;  %5253 = vmatprep.mubr.f32.mxu0 %v1570_v19  ;;  %v976_v19 = vld [vmem:[%s14312_s8 + $0x14d0] sm:$0x3]  ;;  %v13387_v20 = vpack.c.bf16 %v687_v12, %v393_v11 }
 0x148   : > { %5323 = vmatprep.mubr.f32.mxu1 %v1571_v22  ;;  %v392_v22 = vld [vmem:[%s14312_s8 + $0x290] sm:$0xff] }
 0x149   : > { %v13389_v32 = vpack.c.bf16 %v686_v23, %v392_v22  ;;  %v984_v12 = vld [vmem:[%s14312_s8 + $0x1510] sm:$0x3] }
 0x14d   : > { %5194 = vmatpush1.xpose.msra.mxu0 %v966_v29  ;;  %v13385_v29 = vpack.c.bf16 %v684_v17, %v390_v16 }
 0x14e   : > { %5264 = vmatpush1.xpose.msra.mxu1 %v968_v33  ;;  %13368 = vmatprep.subr.bf16.mxu0 %v13367_v30  ;;  %v979_v33 = vld [vmem:[%s14312_s8 + $0x14e8] sm:$0x3] }
 0x14f   : > { %13372 = vmatprep.subr.bf16.mxu1 %v13371_v34  ;;  %v1621_v34 = vcombine.high %v1613_v24, %v1613_v24 }
 0x150   : > { %5254 = vmatmul.mubr.f32.vlgmr.msra.gmra.mrb[34].mxu0 %v1562_v14  ;;  %v974_v14 = vld [vmem:[%s14312_s8 + $0x14c0] sm:$0x3] }
 0x151   : > { %13370 = vmatpush1.bf16.xpose.msra.mxu0 %v13369_v39  ;;  %5324 = vmatmul.mubr.f32.vlgmr.msra.gmra.mrb[34].mxu1 %v1569_v15  ;;  %v13383_v15 = vpack.c.bf16 %v685_v10, %v391_v9  ;;  %v689_v39 = vld [vmem:[%s14312_s8 + $0xbd8] sm:$0xff]  ;;  %v398_v9 = vld [vmem:[%s14312_s8 + $0x2c0] sm:$0xff]  ;;  %v692_v10 = vld [vmem:[%s14312_s8 + $0xbf0] sm:$0xff] }
 0x152   : > { %13374 = vmatpush1.bf16.xpose.msra.mxu1 %v13373_v40  ;;  %5333 = vmatprep.subr.mxu0 %v971_v41  ;;  %v397_v40 = vld [vmem:[%s14312_s8 + $0x2b8] sm:$0xff]  ;;  %v691_v41 = vld [vmem:[%s14312_s8 + $0xbe8] sm:$0xff]  ;;  %v13401_v22 = vpack.c.bf16 %v692_v10, %v398_v9 }
 0x153   : > { %5403 = vmatprep.subr.mxu1 %v973_v43  ;;  %5393 = vmatprep.mubr.f32.mxu0 %v1587_v42  ;;  %v978_v43 = vld [vmem:[%s14312_s8 + $0x14e0] sm:$0x3]  ;;  %v13395_v49 = vpack.c.bf16 %v691_v41, %v397_v40  ;;  %v988_v41 = vld [vmem:[%s14312_s8 + $0x1530] sm:$0x3] }
 0x154   : > { %5463 = vmatprep.mubr.f32.mxu1 %v1588_v44 }
 0x157   : > { %v2875_v55 = vpop.f32.mrb[0].mxu0 }
 0x158   : > { %v2877_v61 = vpop.f32.mrb[1].mxu0  ;;  %v2945_v62 = vpop.f32.mrb[0].mxu1 }
 0x159   : > { %v2946_v0 = vadd.f32 %v2945_v62, %v2875_v55  ;;  %5334 = vmatpush1.xpose.msra.mxu0 %v970_v51  ;;  %v2947_v2 = vpop.f32.mrb[1].mxu1  ;;  %v690_v51 = vld [vmem:[%s14312_s8 + $0xbe0] sm:$0xff]  ;;  %v983_v61 = vld [vmem:[%s14312_s8 + $0x1508] sm:$0x3] }
 0x15a   : > { %5404 = vmatpush1.xpose.msra.mxu1 %v972_v56  ;;  %13376 = vmatprep.subr.bf16.mxu0 %v13375_v52  ;;  %v399_v2 = vld [vmem:[%s14312_s8 + $0x2c8] sm:$0xff] }
 0x15b   : > { %13380 = vmatprep.subr.bf16.mxu1 %v13379_v57  ;;  %v13393_v57 = vpack.c.bf16 %v688_v46, %v394_v45 }
 0x15c   : > { %5394 = vmatmul.mubr.f32.vlgmr.msra.gmra.mrb[36].mxu0 %v1579_v37  ;;  %v257_v37 = vld [vmem:[%s14305_s10 + $0xa8] sm:$0xff] }
 0x15d   : > { %13378 = vmatpush1.bf16.xpose.msra.mxu0 %v13377_v1  ;;  %5464 = vmatmul.mubr.f32.vlgmr.msra.gmra.mrb[36].mxu1 %v1586_v38  ;;  %v395_v38 = vld [vmem:[%s14312_s8 + $0x2a8] sm:$0xff]  ;;  %v1623_v42 = vcombine.high %v257_v37, %v257_v37  ;;  %v1630_v52 = vrot.slane %v257_v37, %v14335_v21  ;;  %v258_v1 = vld [vmem:[%s14305_s10 + $0xb0] sm:$0xff] }
 0x15e   : > { %13382 = vmatpush1.bf16.xpose.msra.mxu1 %v13381_v3  ;;  %5473 = vmatprep.subr.mxu0 %v975_v4  ;;  %v13391_v44 = vpack.c.bf16 %v689_v39, %v395_v38  ;;  %v693_v3 = vld [vmem:[%s14312_s8 + $0xbf8] sm:$0xff]  ;;  %v1647_v16 = vrot.slane %v258_v1, %v14335_v21  ;;  %v402_v38 = vld [vmem:[%s14312_s8 + $0x2e0] sm:$0xff]  ;;  %v696_v39 = vld [vmem:[%s14312_s8 + $0xc10] sm:$0xff] }
 0x15f   : > { %5543 = vmatprep.subr.mxu1 %v977_v6  ;;  %5533 = vmatprep.mubr.f32.mxu0 %v1604_v5  ;;  %v1637_v56 = vrot.slane %v1623_v42, %v14335_v21  ;;  %v1638_v62 = vcombine.high %v1630_v52, %v1630_v52  ;;  %v401_v4 = vld [vmem:[%s14312_s8 + $0x2d8] sm:$0xff]  ;;  %v695_v5 = vld [vmem:[%s14312_s8 + $0xc08] sm:$0xff]  ;;  %v1640_v6 = vcombine.high %v258_v1, %v258_v1 }
 0x160   : > { %5603 = vmatprep.mubr.f32.mxu1 %v1605_v7  ;;  %v982_v7 = vld [vmem:[%s14312_s8 + $0x1500] sm:$0x3]  ;;  %v13399_v8 = vpack.c.bf16 %v693_v3, %v399_v2  ;;  %v13403_v13 = vpack.c.bf16 %v695_v5, %v401_v4  ;;  %v700_v3 = vld [vmem:[%s14312_s8 + $0xc30] sm:$0xff] }
 0x161   : > { %v406_v2 = vld [vmem:[%s14312_s8 + $0x300] sm:$0xff]  ;;  %v992_v5 = vld [vmem:[%s14312_s8 + $0x1550] sm:$0x3] }
 0x163   : > { %v3015_v18 = vpop.f32.mrb[2].mxu0 }
 0x164   : > { %v3016_v25 = vadd.f32 %v3015_v18, %v2946_v0  ;;  %v3017_v26 = vpop.f32.mrb[3].mxu0  ;;  %v3085_v27 = vpop.f32.mrb[2].mxu1  ;;  %v1639_v0 = vcombine.high %v1637_v56, %v1637_v56 }
 0x165   : > { %5474 = vmatpush1.xpose.msra.mxu0 %v974_v14  ;;  %v3087_v30 = vpop.f32.mrb[3].mxu1  ;;  %v400_v14 = vld [vmem:[%s14312_s8 + $0x2d0] sm:$0xff]  ;;  %v987_v26 = vld [vmem:[%s14312_s8 + $0x1528] sm:$0x3] }
 0x166   : > { %v3086_v31 = vadd.f32 %v3085_v27, %v3016_v25  ;;  %5544 = vmatpush1.xpose.msra.mxu1 %v976_v19  ;;  %13384 = vmatprep.subr.bf16.mxu0 %v13383_v15  ;;  %v694_v15 = vld [vmem:[%s14312_s8 + $0xc00] sm:$0xff]  ;;  %v1655_v27 = vcombine.high %v1647_v16, %v1647_v16 }
 0x167   : > { %13388 = vmatprep.subr.bf16.mxu1 %v13387_v20  ;;  %v1654_v20 = vrot.slane %v1640_v6, %v14335_v21  ;;  %v13405_v25 = vpack.c.bf16 %v694_v15, %v400_v14  ;;  %v259_v30 = vld [vmem:[%s14305_s10 + $0xb8] sm:$0xff]  ;;  %v13417_v14 = vpack.c.bf16 %v700_v3, %v406_v2 }
 0x168   : > { %5534 = vmatmul.mubr.f32.vlgmr.msra.gmra.mrb[38].mxu0 %v1596_v60  ;;  %v13397_v60 = vpack.c.bf16 %v690_v51, %v396_v50  ;;  %v1664_v45 = vrot.slane %v259_v30, %v14335_v21  ;;  %v13409_v50 = vpack.c.bf16 %v696_v39, %v402_v38 }
 0x169   : > { %13386 = vmatpush1.bf16.xpose.msra.mxu0 %v13385_v29  ;;  %5604 = vmatmul.mubr.f32.vlgmr.msra.gmra.mrb[38].mxu1 %v1603_v63  ;;  %v985_v63 = vld [vmem:[%s14312_s8 + $0x1518] sm:$0x3]  ;;  %v1656_v29 = vcombine.high %v1654_v20, %v1654_v20 }
 0x16a   : > { %13390 = vmatpush1.bf16.xpose.msra.mxu1 %v13389_v32  ;;  %5613 = vmatprep.subr.mxu0 %v979_v33  ;;  %v697_v32 = vld [vmem:[%s14312_s8 + $0xc18] sm:$0xff] }
 0x16b   : > { %5683 = vmatprep.subr.mxu1 %v981_v35  ;;  %5673 = vmatprep.mubr.f32.mxu0 %v1621_v34  ;;  %v405_v33 = vld [vmem:[%s14312_s8 + $0x2f8] sm:$0xff]  ;;  %v699_v34 = vld [vmem:[%s14312_s8 + $0xc28] sm:$0xff]  ;;  %v1657_v35 = vcombine.high %v259_v30, %v259_v30 }
 0x16c   : > { %5743 = vmatprep.mubr.f32.mxu1 %v1622_v36  ;;  %v986_v36 = vld [vmem:[%s14312_s8 + $0x1520] sm:$0x3]  ;;  %v13411_v42 = vpack.c.bf16 %v699_v34, %v405_v33  ;;  %v996_v34 = vld [vmem:[%s14312_s8 + $0x1570] sm:$0x3] }
 0x16f   : > { %v3155_v47 = vpop.f32.mrb[4].mxu0 }
 0x170   : > { %v3156_v53 = vadd.f32 %v3155_v47, %v3086_v31  ;;  %v3157_v54 = vpop.f32.mrb[5].mxu0  ;;  %v3225_v55 = vpop.f32.mrb[4].mxu1  ;;  %v403_v31 = vld [vmem:[%s14312_s8 + $0x2e8] sm:$0xff] }
 0x171   : > { %5614 = vmatpush1.xpose.msra.mxu0 %v978_v43  ;;  %v3227_v58 = vpop.f32.mrb[5].mxu1  ;;  %v13407_v37 = vpack.c.bf16 %v697_v32, %v403_v31  ;;  %v404_v43 = vld [vmem:[%s14312_s8 + $0x2f0] sm:$0xff]  ;;  %v991_v54 = vld [vmem:[%s14312_s8 + $0x1548] sm:$0x3]  ;;  %v410_v31 = vld [vmem:[%s14312_s8 + $0x320] sm:$0xff] }
 0x172   : > { %v3226_v59 = vadd.f32 %v3225_v55, %v3156_v53  ;;  %5684 = vmatpush1.xpose.msra.mxu1 %v980_v48  ;;  %13392 = vmatprep.subr.bf16.mxu0 %v13391_v44  ;;  %v698_v44 = vld [vmem:[%s14312_s8 + $0xc20] sm:$0xff]  ;;  %v1672_v55 = vcombine.high %v1664_v45, %v1664_v45  ;;  %v704_v32 = vld [vmem:[%s14312_s8 + $0xc50] sm:$0xff] }
 0x173   : > { %13396 = vmatprep.subr.bf16.mxu1 %v13395_v49  ;;  %v1671_v49 = vrot.slane %v1657_v35, %v14335_v21  ;;  %v13413_v53 = vpack.c.bf16 %v698_v44, %v404_v43  ;;  %v260_v58 = vld [vmem:[%s14305_s10 + $0xc0] sm:$0xff]  ;;  %v13425_v43 = vpack.c.bf16 %v704_v32, %v410_v31 }
 0x174   : > { %5674 = vmatmul.mubr.f32.vlgmr.msra.gmra.mrb[40].mxu0 %v1613_v24  ;;  %v1681_v9 = vrot.slane %v260_v58, %v14335_v21 }
 0x175   : > { %13394 = vmatpush1.bf16.xpose.msra.mxu0 %v13393_v57  ;;  %5744 = vmatmul.mubr.f32.vlgmr.msra.gmra.mrb[40].mxu1 %v1620_v28  ;;  %v989_v28 = vld [vmem:[%s14312_s8 + $0x1538] sm:$0x3]  ;;  %v1673_v57 = vcombine.high %v1671_v49, %v1671_v49 }
 0x176   : > { %13398 = vmatpush1.bf16.xpose.msra.mxu1 %v13397_v60  ;;  %5753 = vmatprep.subr.mxu0 %v983_v61  ;;  %v701_v60 = vld [vmem:[%s14312_s8 + $0xc38] sm:$0xff] }
 0x177   : > { %5823 = vmatprep.subr.mxu1 %v985_v63  ;;  %5813 = vmatprep.mubr.f32.mxu0 %v1638_v62  ;;  %v409_v61 = vld [vmem:[%s14312_s8 + $0x318] sm:$0xff]  ;;  %v703_v62 = vld [vmem:[%s14312_s8 + $0xc48] sm:$0xff]  ;;  %v1674_v63 = vcombine.high %v260_v58, %v260_v58 }
 0x178   : > { %5883 = vmatprep.mubr.f32.mxu1 %v1639_v0  ;;  %v990_v0 = vld [vmem:[%s14312_s8 + $0x1540] sm:$0x3]  ;;  %v13419_v6 = vpack.c.bf16 %v703_v62, %v409_v61  ;;  %v1000_v62 = vld [vmem:[%s14312_s8 + $0x1590] sm:$0x3] }
 0x17b   : > { %v3295_v11 = vpop.f32.mrb[6].mxu0 }
 0x17c   : > { %v3296_v17 = vadd.f32 %v3295_v11, %v3226_v59  ;;  %v3297_v18 = vpop.f32.mrb[7].mxu0  ;;  %v3365_v19 = vpop.f32.mrb[6].mxu1  ;;  %v407_v59 = vld [vmem:[%s14312_s8 + $0x308] sm:$0xff] }
 0x17d   : > { %5754 = vmatpush1.xpose.msra.mxu0 %v982_v7  ;;  %v3367_v23 = vpop.f32.mrb[7].mxu1  ;;  %v13415_v1 = vpack.c.bf16 %v701_v60, %v407_v59  ;;  %v408_v7 = vld [vmem:[%s14312_s8 + $0x310] sm:$0xff]  ;;  %v995_v18 = vld [vmem:[%s14312_s8 + $0x1568] sm:$0x3]  ;;  %v414_v59 = vld [vmem:[%s14312_s8 + $0x340] sm:$0xff] }
 0x17e   : > { %v3366_v24 = vadd.f32 %v3365_v19, %v3296_v17  ;;  %5824 = vmatpush1.xpose.msra.mxu1 %v984_v12  ;;  %13400 = vmatprep.subr.bf16.mxu0 %v13399_v8  ;;  %v702_v8 = vld [vmem:[%s14312_s8 + $0xc40] sm:$0xff]  ;;  %v1689_v19 = vcombine.high %v1681_v9, %v1681_v9  ;;  %v261_v23 = vld [vmem:[%s14305_s10 + $0xc8] sm:$0xff] }
 0x17f   : > { %13404 = vmatprep.subr.bf16.mxu1 %v13403_v13  ;;  %v1688_v13 = vrot.slane %v1674_v63, %v14335_v21  ;;  %v13421_v17 = vpack.c.bf16 %v702_v8, %v408_v7  ;;  %v1698_v38 = vrot.slane %v261_v23, %v14335_v21  ;;  %v708_v60 = vld [vmem:[%s14312_s8 + $0xc70] sm:$0xff] }
 0x180   : > { %5814 = vmatmul.mubr.f32.vlgmr.msra.gmra.mrb[42].mxu0 %v1630_v52  ;;  %v13433_v7 = vpack.c.bf16 %v708_v60, %v414_v59 }
 0x181   : > { %13402 = vmatpush1.bf16.xpose.msra.mxu0 %v13401_v22  ;;  %5884 = vmatmul.mubr.f32.vlgmr.msra.gmra.mrb[42].mxu1 %v1637_v56  ;;  %v993_v56 = vld [vmem:[%s14312_s8 + $0x1558] sm:$0x3]  ;;  %v1690_v22 = vcombine.high %v1688_v13, %v1688_v13 }
 0x182   : > { %13406 = vmatpush1.bf16.xpose.msra.mxu1 %v13405_v25  ;;  %5893 = vmatprep.subr.mxu0 %v987_v26  ;;  %v705_v25 = vld [vmem:[%s14312_s8 + $0xc58] sm:$0xff] }
 0x183   : > { %5963 = vmatprep.subr.mxu1 %v989_v28  ;;  %5953 = vmatprep.mubr.f32.mxu0 %v1655_v27  ;;  %v413_v26 = vld [vmem:[%s14312_s8 + $0x338] sm:$0xff]  ;;  %v707_v27 = vld [vmem:[%s14312_s8 + $0xc68] sm:$0xff]  ;;  %v1691_v28 = vcombine.high %v261_v23, %v261_v23 }
 0x184   : > { %6023 = vmatprep.mubr.f32.mxu1 %v1656_v29  ;;  %v994_v29 = vld [vmem:[%s14312_s8 + $0x1560] sm:$0x3]  ;;  %v13427_v35 = vpack.c.bf16 %v707_v27, %v413_v26  ;;  %v1004_v27 = vld [vmem:[%s14312_s8 + $0x15b0] sm:$0x3] }
 0x187   : > { %v3435_v40 = vpop.f32.mrb[8].mxu0 }
 0x188   : > { %v3436_v46 = vadd.f32 %v3435_v40, %v3366_v24  ;;  %v3437_v47 = vpop.f32.mrb[9].mxu0  ;;  %v3505_v48 = vpop.f32.mrb[8].mxu1  ;;  %v411_v24 = vld [vmem:[%s14312_s8 + $0x328] sm:$0xff] }
 0x189   : > { %5894 = vmatpush1.xpose.msra.mxu0 %v986_v36  ;;  %v3507_v51 = vpop.f32.mrb[9].mxu1  ;;  %v13423_v30 = vpack.c.bf16 %v705_v25, %v411_v24  ;;  %v412_v36 = vld [vmem:[%s14312_s8 + $0x330] sm:$0xff]  ;;  %v999_v47 = vld [vmem:[%s14312_s8 + $0x1588] sm:$0x3]  ;;  %v418_v24 = vld [vmem:[%s14312_s8 + $0x360] sm:$0xff] }
 0x18a   : > { %v3506_v52 = vadd.f32 %v3505_v48, %v3436_v46  ;;  %5964 = vmatpush1.xpose.msra.mxu1 %v988_v41  ;;  %13408 = vmatprep.subr.bf16.mxu0 %v13407_v37  ;;  %v706_v37 = vld [vmem:[%s14312_s8 + $0xc60] sm:$0xff]  ;;  %v1706_v48 = vcombine.high %v1698_v38, %v1698_v38  ;;  %v262_v51 = vld [vmem:[%s14305_s10 + $0xd0] sm:$0xff] }
 0x18b   : > { %13412 = vmatprep.subr.bf16.mxu1 %v13411_v42  ;;  %v1705_v42 = vrot.slane %v1691_v28, %v14335_v21  ;;  %v13429_v46 = vpack.c.bf16 %v706_v37, %v412_v36  ;;  %v1715_v2 = vrot.slane %v262_v51, %v14335_v21  ;;  %v712_v25 = vld [vmem:[%s14312_s8 + $0xc90] sm:$0xff] }
 0x18c   : > { %5954 = vmatmul.mubr.f32.vlgmr.msra.gmra.mrb[44].mxu0 %v1647_v16  ;;  %v13441_v36 = vpack.c.bf16 %v712_v25, %v418_v24 }
 0x18d   : > { %13410 = vmatpush1.bf16.xpose.msra.mxu0 %v13409_v50  ;;  %6024 = vmatmul.mubr.f32.vlgmr.msra.gmra.mrb[44].mxu1 %v1654_v20  ;;  %v997_v20 = vld [vmem:[%s14312_s8 + $0x1578] sm:$0x3]  ;;  %v1707_v50 = vcombine.high %v1705_v42, %v1705_v42 }
 0x18e   : > { %13414 = vmatpush1.bf16.xpose.msra.mxu1 %v13413_v53  ;;  %6033 = vmatprep.subr.mxu0 %v991_v54  ;;  %v709_v53 = vld [vmem:[%s14312_s8 + $0xc78] sm:$0xff] }
 0x18f   : > { %6103 = vmatprep.subr.mxu1 %v993_v56  ;;  %6093 = vmatprep.mubr.f32.mxu0 %v1672_v55  ;;  %v417_v54 = vld [vmem:[%s14312_s8 + $0x358] sm:$0xff]  ;;  %v711_v55 = vld [vmem:[%s14312_s8 + $0xc88] sm:$0xff]  ;;  %v1708_v56 = vcombine.high %v262_v51, %v262_v51 }
 0x190   : > { %6163 = vmatprep.mubr.f32.mxu1 %v1673_v57  ;;  %v998_v57 = vld [vmem:[%s14312_s8 + $0x1580] sm:$0x3]  ;;  %v13435_v63 = vpack.c.bf16 %v711_v55, %v417_v54  ;;  %v1008_v55 = vld [vmem:[%s14312_s8 + $0x15d0] sm:$0x3] }
 0x193   : > { %v3575_v4 = vpop.f32.mrb[10].mxu0 }
 0x194   : > { %v3576_v10 = vadd.f32 %v3575_v4, %v3506_v52  ;;  %v3577_v11 = vpop.f32.mrb[11].mxu0  ;;  %v3645_v12 = vpop.f32.mrb[10].mxu1  ;;  %v415_v52 = vld [vmem:[%s14312_s8 + $0x348] sm:$0xff] }
 0x195   : > { %6034 = vmatpush1.xpose.msra.mxu0 %v990_v0  ;;  %v3647_v15 = vpop.f32.mrb[11].mxu1  ;;  %v13431_v58 = vpack.c.bf16 %v709_v53, %v415_v52  ;;  %v416_v0 = vld [vmem:[%s14312_s8 + $0x350] sm:$0xff]  ;;  %v1003_v11 = vld [vmem:[%s14312_s8 + $0x15a8] sm:$0x3]  ;;  %v422_v52 = vld [vmem:[%s14312_s8 + $0x380] sm:$0xff] }
 0x196   : > { %v3646_v16 = vadd.f32 %v3645_v12, %v3576_v10  ;;  %6104 = vmatpush1.xpose.msra.mxu1 %v992_v5  ;;  %13416 = vmatprep.subr.bf16.mxu0 %v13415_v1  ;;  %v710_v1 = vld [vmem:[%s14312_s8 + $0xc80] sm:$0xff]  ;;  %v1723_v12 = vcombine.high %v1715_v2, %v1715_v2  ;;  %v716_v53 = vld [vmem:[%s14312_s8 + $0xcb0] sm:$0xff] }
 0x197   : > { %13420 = vmatprep.subr.bf16.mxu1 %v13419_v6  ;;  %v1722_v6 = vrot.slane %v1708_v56, %v14335_v21  ;;  %v13437_v10 = vpack.c.bf16 %v710_v1, %v416_v0  ;;  %v263_v15 = vld [vmem:[%s14305_s10 + $0xd8] sm:$0xff]  ;;  %v13449_v0 = vpack.c.bf16 %v716_v53, %v422_v52 }
 0x198   : > { %6094 = vmatmul.mubr.f32.vlgmr.msra.gmra.mrb[46].mxu0 %v1664_v45  ;;  %v1732_v31 = vrot.slane %v263_v15, %v14335_v21 }
 0x199   : > { %13418 = vmatpush1.bf16.xpose.msra.mxu0 %v13417_v14  ;;  %6164 = vmatmul.mubr.f32.vlgmr.msra.gmra.mrb[46].mxu1 %v1671_v49  ;;  %v1001_v49 = vld [vmem:[%s14312_s8 + $0x1598] sm:$0x3]  ;;  %v1724_v14 = vcombine.high %v1722_v6, %v1722_v6 }
 0x19a   : > { %13422 = vmatpush1.bf16.xpose.msra.mxu1 %v13421_v17  ;;  %6173 = vmatprep.subr.mxu0 %v995_v18  ;;  %v713_v17 = vld [vmem:[%s14312_s8 + $0xc98] sm:$0xff] }
 0x19b   : > { %6243 = vmatprep.subr.mxu1 %v997_v20  ;;  %6233 = vmatprep.mubr.f32.mxu0 %v1689_v19  ;;  %v421_v18 = vld [vmem:[%s14312_s8 + $0x378] sm:$0xff]  ;;  %v715_v19 = vld [vmem:[%s14312_s8 + $0xca8] sm:$0xff]  ;;  %v1725_v20 = vcombine.high %v263_v15, %v263_v15 }
 0x19c   : > { %6303 = vmatprep.mubr.f32.mxu1 %v1690_v22  ;;  %v1002_v22 = vld [vmem:[%s14312_s8 + $0x15a0] sm:$0x3]  ;;  %v13443_v28 = vpack.c.bf16 %v715_v19, %v421_v18  ;;  %v1012_v19 = vld [vmem:[%s14312_s8 + $0x15f0] sm:$0x3] }
 0x19f   : > { %v3715_v33 = vpop.f32.mrb[12].mxu0 }
 0x1a0   : > { %v3716_v39 = vadd.f32 %v3715_v33, %v3646_v16  ;;  %v3717_v40 = vpop.f32.mrb[13].mxu0  ;;  %v3785_v41 = vpop.f32.mrb[12].mxu1  ;;  %v419_v16 = vld [vmem:[%s14312_s8 + $0x368] sm:$0xff] }
 0x1a1   : > { %6174 = vmatpush1.xpose.msra.mxu0 %v994_v29  ;;  %v3787_v44 = vpop.f32.mrb[13].mxu1  ;;  %v13439_v23 = vpack.c.bf16 %v713_v17, %v419_v16  ;;  %v420_v29 = vld [vmem:[%s14312_s8 + $0x370] sm:$0xff]  ;;  %v1007_v40 = vld [vmem:[%s14312_s8 + $0x15c8] sm:$0x3]  ;;  %v426_v16 = vld [vmem:[%s14312_s8 + $0x3a0] sm:$0xff] }
 0x1a2   : > { %v3786_v45 = vadd.f32 %v3785_v41, %v3716_v39  ;;  %6244 = vmatpush1.xpose.msra.mxu1 %v996_v34  ;;  %13424 = vmatprep.subr.bf16.mxu0 %v13423_v30  ;;  %v714_v30 = vld [vmem:[%s14312_s8 + $0xca0] sm:$0xff]  ;;  %v1740_v41 = vcombine.high %v1732_v31, %v1732_v31  ;;  %v720_v17 = vld [vmem:[%s14312_s8 + $0xcd0] sm:$0xff] }
 0x1a3   : > { %13428 = vmatprep.subr.bf16.mxu1 %v13427_v35  ;;  %v1739_v35 = vrot.slane %v1725_v20, %v14335_v21  ;;  %v13445_v39 = vpack.c.bf16 %v714_v30, %v420_v29  ;;  %v264_v44 = vld [vmem:[%s14305_s10 + $0xe0] sm:$0xff]  ;;  %v13457_v29 = vpack.c.bf16 %v720_v17, %v426_v16 }
 0x1a4   : > { %6234 = vmatmul.mubr.f32.vlgmr.msra.gmra.mrb[48].mxu0 %v1681_v9  ;;  %v1749_v59 = vrot.slane %v264_v44, %v14335_v21 }
 0x1a5   : > { %13426 = vmatpush1.bf16.xpose.msra.mxu0 %v13425_v43  ;;  %6304 = vmatmul.mubr.f32.vlgmr.msra.gmra.mrb[48].mxu1 %v1688_v13  ;;  %v1005_v13 = vld [vmem:[%s14312_s8 + $0x15b8] sm:$0x3]  ;;  %v1741_v43 = vcombine.high %v1739_v35, %v1739_v35 }
 0x1a6   : > { %13430 = vmatpush1.bf16.xpose.msra.mxu1 %v13429_v46  ;;  %6313 = vmatprep.subr.mxu0 %v999_v47  ;;  %v717_v46 = vld [vmem:[%s14312_s8 + $0xcb8] sm:$0xff] }
 0x1a7   : > { %6383 = vmatprep.subr.mxu1 %v1001_v49  ;;  %6373 = vmatprep.mubr.f32.mxu0 %v1706_v48  ;;  %v425_v47 = vld [vmem:[%s14312_s8 + $0x398] sm:$0xff]  ;;  %v719_v48 = vld [vmem:[%s14312_s8 + $0xcc8] sm:$0xff]  ;;  %v1742_v49 = vcombine.high %v264_v44, %v264_v44 }
 0x1a8   : > { %6443 = vmatprep.mubr.f32.mxu1 %v1707_v50  ;;  %v1006_v50 = vld [vmem:[%s14312_s8 + $0x15c0] sm:$0x3]  ;;  %v13451_v56 = vpack.c.bf16 %v719_v48, %v425_v47  ;;  %v1016_v48 = vld [vmem:[%s14312_s8 + $0x1610] sm:$0x3] }
 0x1ab   : > { %v3855_v61 = vpop.f32.mrb[14].mxu0 }
 0x1ac   : > { %v3856_v3 = vadd.f32 %v3855_v61, %v3786_v45  ;;  %v3857_v4 = vpop.f32.mrb[15].mxu0  ;;  %v3925_v5 = vpop.f32.mrb[14].mxu1  ;;  %v423_v45 = vld [vmem:[%s14312_s8 + $0x388] sm:$0xff] }
 0x1ad   : > { %6314 = vmatpush1.xpose.msra.mxu0 %v998_v57  ;;  %v3927_v8 = vpop.f32.mrb[15].mxu1  ;;  %v13447_v51 = vpack.c.bf16 %v717_v46, %v423_v45  ;;  %v424_v57 = vld [vmem:[%s14312_s8 + $0x390] sm:$0xff]  ;;  %v1011_v4 = vld [vmem:[%s14312_s8 + $0x15e8] sm:$0x3]  ;;  %v430_v45 = vld [vmem:[%s14312_s8 + $0x3c0] sm:$0xff] }
 0x1ae   : > { %v3926_v9 = vadd.f32 %v3925_v5, %v3856_v3  ;;  %6384 = vmatpush1.xpose.msra.mxu1 %v1000_v62  ;;  %13432 = vmatprep.subr.bf16.mxu0 %v13431_v58  ;;  %v718_v58 = vld [vmem:[%s14312_s8 + $0xcc0] sm:$0xff]  ;;  %v1757_v5 = vcombine.high %v1749_v59, %v1749_v59  ;;  %v265_v8 = vld [vmem:[%s14305_s10 + $0xe8] sm:$0xff] }
 0x1af   : > { %13436 = vmatprep.subr.bf16.mxu1 %v13435_v63  ;;  %v1756_v63 = vrot.slane %v1742_v49, %v14335_v21  ;;  %v13453_v3 = vpack.c.bf16 %v718_v58, %v424_v57  ;;  %v1766_v24 = vrot.slane %v265_v8, %v14335_v21  ;;  %v724_v46 = vld [vmem:[%s14312_s8 + $0xcf0] sm:$0xff] }
 0x1b0   : > { %6374 = vmatmul.mubr.f32.vlgmr.msra.gmra.mrb[50].mxu0 %v1698_v38  ;;  %v13465_v57 = vpack.c.bf16 %v724_v46, %v430_v45 }
 0x1b1   : > { %13434 = vmatpush1.bf16.xpose.msra.mxu0 %v13433_v7  ;;  %6444 = vmatmul.mubr.f32.vlgmr.msra.gmra.mrb[50].mxu1 %v1705_v42  ;;  %v1009_v42 = vld [vmem:[%s14312_s8 + $0x15d8] sm:$0x3]  ;;  %v1758_v7 = vcombine.high %v1756_v63, %v1756_v63 }
 0x1b2   : > { %13438 = vmatpush1.bf16.xpose.msra.mxu1 %v13437_v10  ;;  %6453 = vmatprep.subr.mxu0 %v1003_v11  ;;  %v721_v10 = vld [vmem:[%s14312_s8 + $0xcd8] sm:$0xff] }
 0x1b3   : > { %6523 = vmatprep.subr.mxu1 %v1005_v13  ;;  %6513 = vmatprep.mubr.f32.mxu0 %v1723_v12  ;;  %v429_v11 = vld [vmem:[%s14312_s8 + $0x3b8] sm:$0xff]  ;;  %v723_v12 = vld [vmem:[%s14312_s8 + $0xce8] sm:$0xff]  ;;  %v1759_v13 = vcombine.high %v265_v8, %v265_v8 }
 0x1b4   : > { %6583 = vmatprep.mubr.f32.mxu1 %v1724_v14  ;;  %v1010_v14 = vld [vmem:[%s14312_s8 + $0x15e0] sm:$0x3]  ;;  %v13459_v20 = vpack.c.bf16 %v723_v12, %v429_v11  ;;  %v1020_v12 = vld [vmem:[%s14312_s8 + $0x1630] sm:$0x3] }
 0x1b7   : > { %v3995_v26 = vpop.f32.mrb[16].mxu0 }
 0x1b8   : > { %v3996_v32 = vadd.f32 %v3995_v26, %v3926_v9  ;;  %v3997_v33 = vpop.f32.mrb[17].mxu0  ;;  %v4065_v34 = vpop.f32.mrb[16].mxu1  ;;  %v427_v9 = vld [vmem:[%s14312_s8 + $0x3a8] sm:$0xff] }
 0x1b9   : > { %6454 = vmatpush1.xpose.msra.mxu0 %v1002_v22  ;;  %v4067_v37 = vpop.f32.mrb[17].mxu1  ;;  %v13455_v15 = vpack.c.bf16 %v721_v10, %v427_v9  ;;  %v428_v22 = vld [vmem:[%s14312_s8 + $0x3b0] sm:$0xff]  ;;  %v1015_v33 = vld [vmem:[%s14312_s8 + $0x1608] sm:$0x3]  ;;  %v434_v9 = vld [vmem:[%s14312_s8 + $0x3e0] sm:$0xff] }
 0x1ba   : > { %v4066_v38 = vadd.f32 %v4065_v34, %v3996_v32  ;;  %6524 = vmatpush1.xpose.msra.mxu1 %v1004_v27  ;;  %13440 = vmatprep.subr.bf16.mxu0 %v13439_v23  ;;  %v722_v23 = vld [vmem:[%s14312_s8 + $0xce0] sm:$0xff]  ;;  %v1774_v34 = vcombine.high %v1766_v24, %v1766_v24  ;;  %v266_v37 = vld [vmem:[%s14305_s10 + $0xf0] sm:$0xff] }
 0x1bb   : > { %13444 = vmatprep.subr.bf16.mxu1 %v13443_v28  ;;  %v1773_v28 = vrot.slane %v1759_v13, %v14335_v21  ;;  %v13461_v32 = vpack.c.bf16 %v722_v23, %v428_v22  ;;  %v1783_v52 = vrot.slane %v266_v37, %v14335_v21  ;;  %v728_v10 = vld [vmem:[%s14312_s8 + $0xd10] sm:$0xff] }
 0x1bc   : > { %6514 = vmatmul.mubr.f32.vlgmr.msra.gmra.mrb[52].mxu0 %v1715_v2  ;;  %v13473_v22 = vpack.c.bf16 %v728_v10, %v434_v9 }
 0x1bd   : > { %13442 = vmatpush1.bf16.xpose.msra.mxu0 %v13441_v36  ;;  %6584 = vmatmul.mubr.f32.vlgmr.msra.gmra.mrb[52].mxu1 %v1722_v6  ;;  %v1013_v6 = vld [vmem:[%s14312_s8 + $0x15f8] sm:$0x3]  ;;  %v1775_v36 = vcombine.high %v1773_v28, %v1773_v28 }
 0x1be   : > { %13446 = vmatpush1.bf16.xpose.msra.mxu1 %v13445_v39  ;;  %6593 = vmatprep.subr.mxu0 %v1007_v40  ;;  %v725_v39 = vld [vmem:[%s14312_s8 + $0xcf8] sm:$0xff] }
 0x1bf   : > { %6663 = vmatprep.subr.mxu1 %v1009_v42  ;;  %6653 = vmatprep.mubr.f32.mxu0 %v1740_v41  ;;  %v433_v40 = vld [vmem:[%s14312_s8 + $0x3d8] sm:$0xff]  ;;  %v727_v41 = vld [vmem:[%s14312_s8 + $0xd08] sm:$0xff]  ;;  %v1776_v42 = vcombine.high %v266_v37, %v266_v37 }
 0x1c0   : > { %6723 = vmatprep.mubr.f32.mxu1 %v1741_v43  ;;  %v1014_v43 = vld [vmem:[%s14312_s8 + $0x1600] sm:$0x3]  ;;  %v13467_v49 = vpack.c.bf16 %v727_v41, %v433_v40  ;;  %v1024_v41 = vld [vmem:[%s14312_s8 + $0x1650] sm:$0x3] }
 0x1c3   : > { %v4135_v54 = vpop.f32.mrb[18].mxu0 }
 0x1c4   : > { %v4136_v60 = vadd.f32 %v4135_v54, %v4066_v38  ;;  %v4137_v61 = vpop.f32.mrb[19].mxu0  ;;  %v4205_v62 = vpop.f32.mrb[18].mxu1  ;;  %v431_v38 = vld [vmem:[%s14312_s8 + $0x3c8] sm:$0xff] }
 0x1c5   : > { %6594 = vmatpush1.xpose.msra.mxu0 %v1006_v50  ;;  %v4207_v1 = vpop.f32.mrb[19].mxu1  ;;  %v13463_v44 = vpack.c.bf16 %v725_v39, %v431_v38  ;;  %v432_v50 = vld [vmem:[%s14312_s8 + $0x3d0] sm:$0xff]  ;;  %v1019_v61 = vld [vmem:[%s14312_s8 + $0x1628] sm:$0x3]  ;;  %v438_v38 = vld [vmem:[%s14312_s8 + $0x400] sm:$0xff] }
 0x1c6   : > { %v4206_v2 = vadd.f32 %v4205_v62, %v4136_v60  ;;  %6664 = vmatpush1.xpose.msra.mxu1 %v1008_v55  ;;  %13448 = vmatprep.subr.bf16.mxu0 %v13447_v51  ;;  %v726_v51 = vld [vmem:[%s14312_s8 + $0xd00] sm:$0xff]  ;;  %v1791_v62 = vcombine.high %v1783_v52, %v1783_v52  ;;  %v732_v39 = vld [vmem:[%s14312_s8 + $0xd30] sm:$0xff] }
 0x1c7   : > { %13452 = vmatprep.subr.bf16.mxu1 %v13451_v56  ;;  %v1790_v56 = vrot.slane %v1776_v42, %v14335_v21  ;;  %v13469_v60 = vpack.c.bf16 %v726_v51, %v432_v50  ;;  %v267_v1 = vld [vmem:[%s14305_s10 + $0xf8] sm:$0xff]  ;;  %v13481_v50 = vpack.c.bf16 %v732_v39, %v438_v38 }
 0x1c8   : > { %6654 = vmatmul.mubr.f32.vlgmr.msra.gmra.mrb[54].mxu0 %v1732_v31  ;;  %v1800_v16 = vrot.slane %v267_v1, %v14335_v21 }
 0x1c9   : > { %13450 = vmatpush1.bf16.xpose.msra.mxu0 %v13449_v0  ;;  %6724 = vmatmul.mubr.f32.vlgmr.msra.gmra.mrb[54].mxu1 %v1739_v35  ;;  %v1017_v35 = vld [vmem:[%s14312_s8 + $0x1618] sm:$0x3]  ;;  %v1792_v0 = vcombine.high %v1790_v56, %v1790_v56 }
 0x1ca   : > { %13454 = vmatpush1.bf16.xpose.msra.mxu1 %v13453_v3  ;;  %6733 = vmatprep.subr.mxu0 %v1011_v4  ;;  %v729_v3 = vld [vmem:[%s14312_s8 + $0xd18] sm:$0xff] }
 0x1cb   : > { %6803 = vmatprep.subr.mxu1 %v1013_v6  ;;  %6793 = vmatprep.mubr.f32.mxu0 %v1757_v5  ;;  %v437_v4 = vld [vmem:[%s14312_s8 + $0x3f8] sm:$0xff]  ;;  %v731_v5 = vld [vmem:[%s14312_s8 + $0xd28] sm:$0xff]  ;;  %v1793_v6 = vcombine.high %v267_v1, %v267_v1 }
 0x1cc   : > { %6863 = vmatprep.mubr.f32.mxu1 %v1758_v7  ;;  %v1018_v7 = vld [vmem:[%s14312_s8 + $0x1620] sm:$0x3]  ;;  %v13475_v13 = vpack.c.bf16 %v731_v5, %v437_v4  ;;  %v1028_v5 = vld [vmem:[%s14312_s8 + $0x1670] sm:$0x3] }
 0x1cf   : > { %v4275_v18 = vpop.f32.mrb[20].mxu0 }
 0x1d0   : > { %v4276_v25 = vadd.f32 %v4275_v18, %v4206_v2  ;;  %v4277_v26 = vpop.f32.mrb[21].mxu0  ;;  %v4345_v27 = vpop.f32.mrb[20].mxu1  ;;  %v435_v2 = vld [vmem:[%s14312_s8 + $0x3e8] sm:$0xff] }
 0x1d1   : > { %6734 = vmatpush1.xpose.msra.mxu0 %v1010_v14  ;;  %v4347_v30 = vpop.f32.mrb[21].mxu1  ;;  %v13471_v8 = vpack.c.bf16 %v729_v3, %v435_v2  ;;  %v436_v14 = vld [vmem:[%s14312_s8 + $0x3f0] sm:$0xff]  ;;  %v1023_v26 = vld [vmem:[%s14312_s8 + $0x1648] sm:$0x3]  ;;  %v442_v2 = vld [vmem:[%s14312_s8 + $0x420] sm:$0xff] }
 0x1d2   : > { %v4346_v31 = vadd.f32 %v4345_v27, %v4276_v25  ;;  %6804 = vmatpush1.xpose.msra.mxu1 %v1012_v19  ;;  %13456 = vmatprep.subr.bf16.mxu0 %v13455_v15  ;;  %v730_v15 = vld [vmem:[%s14312_s8 + $0xd20] sm:$0xff]  ;;  %v1808_v27 = vcombine.high %v1800_v16, %v1800_v16  ;;  %v736_v3 = vld [vmem:[%s14312_s8 + $0xd50] sm:$0xff] }
 0x1d3   : > { %13460 = vmatprep.subr.bf16.mxu1 %v13459_v20  ;;  %v1807_v20 = vrot.slane %v1793_v6, %v14335_v21  ;;  %v13477_v25 = vpack.c.bf16 %v730_v15, %v436_v14  ;;  %v268_v30 = vld [vmem:[%s14305_s10 + $0x100] sm:$0xff]  ;;  %v13489_v14 = vpack.c.bf16 %v736_v3, %v442_v2 }
 0x1d4   : > { %6794 = vmatmul.mubr.f32.vlgmr.msra.gmra.mrb[56].mxu0 %v1749_v59  ;;  %v1817_v45 = vrot.slane %v268_v30, %v14335_v21 }
 0x1d5   : > { %13458 = vmatpush1.bf16.xpose.msra.mxu0 %v13457_v29  ;;  %6864 = vmatmul.mubr.f32.vlgmr.msra.gmra.mrb[56].mxu1 %v1756_v63  ;;  %v1021_v63 = vld [vmem:[%s14312_s8 + $0x1638] sm:$0x3]  ;;  %v1809_v29 = vcombine.high %v1807_v20, %v1807_v20 }
 0x1d6   : > { %13462 = vmatpush1.bf16.xpose.msra.mxu1 %v13461_v32  ;;  %6873 = vmatprep.subr.mxu0 %v1015_v33  ;;  %v733_v32 = vld [vmem:[%s14312_s8 + $0xd38] sm:$0xff] }
 0x1d7   : > { %6943 = vmatprep.subr.mxu1 %v1017_v35  ;;  %6933 = vmatprep.mubr.f32.mxu0 %v1774_v34  ;;  %v441_v33 = vld [vmem:[%s14312_s8 + $0x418] sm:$0xff]  ;;  %v735_v34 = vld [vmem:[%s14312_s8 + $0xd48] sm:$0xff]  ;;  %v1810_v35 = vcombine.high %v268_v30, %v268_v30 }
 0x1d8   : > { %7003 = vmatprep.mubr.f32.mxu1 %v1775_v36  ;;  %v1022_v36 = vld [vmem:[%s14312_s8 + $0x1640] sm:$0x3]  ;;  %v13483_v42 = vpack.c.bf16 %v735_v34, %v441_v33  ;;  %v1032_v34 = vld [vmem:[%s14312_s8 + $0x1690] sm:$0x3] }
 0x1db   : > { %v4415_v47 = vpop.f32.mrb[22].mxu0 }
 0x1dc   : > { %v4416_v53 = vadd.f32 %v4415_v47, %v4346_v31  ;;  %v4417_v54 = vpop.f32.mrb[23].mxu0  ;;  %v4485_v55 = vpop.f32.mrb[22].mxu1  ;;  %v439_v31 = vld [vmem:[%s14312_s8 + $0x408] sm:$0xff] }
 0x1dd   : > { %6874 = vmatpush1.xpose.msra.mxu0 %v1014_v43  ;;  %v4487_v58 = vpop.f32.mrb[23].mxu1  ;;  %v13479_v37 = vpack.c.bf16 %v733_v32, %v439_v31  ;;  %v440_v43 = vld [vmem:[%s14312_s8 + $0x410] sm:$0xff]  ;;  %v1027_v54 = vld [vmem:[%s14312_s8 + $0x1668] sm:$0x3]  ;;  %v446_v31 = vld [vmem:[%s14312_s8 + $0x440] sm:$0xff] }
 0x1de   : > { %v4486_v59 = vadd.f32 %v4485_v55, %v4416_v53  ;;  %6944 = vmatpush1.xpose.msra.mxu1 %v1016_v48  ;;  %13464 = vmatprep.subr.bf16.mxu0 %v13463_v44  ;;  %v734_v44 = vld [vmem:[%s14312_s8 + $0xd40] sm:$0xff]  ;;  %v1825_v55 = vcombine.high %v1817_v45, %v1817_v45  ;;  %v269_v58 = vld [vmem:[%s14305_s10 + $0x108] sm:$0xff] }
 0x1df   : > { %13468 = vmatprep.subr.bf16.mxu1 %v13467_v49  ;;  %v1824_v49 = vrot.slane %v1810_v35, %v14335_v21  ;;  %v13485_v53 = vpack.c.bf16 %v734_v44, %v440_v43  ;;  %v1834_v9 = vrot.slane %v269_v58, %v14335_v21  ;;  %v740_v32 = vld [vmem:[%s14312_s8 + $0xd70] sm:$0xff] }
 0x1e0   : > { %6934 = vmatmul.mubr.f32.vlgmr.msra.gmra.mrb[58].mxu0 %v1766_v24  ;;  %v13497_v43 = vpack.c.bf16 %v740_v32, %v446_v31 }
 0x1e1   : > { %13466 = vmatpush1.bf16.xpose.msra.mxu0 %v13465_v57  ;;  %7004 = vmatmul.mubr.f32.vlgmr.msra.gmra.mrb[58].mxu1 %v1773_v28  ;;  %v1025_v28 = vld [vmem:[%s14312_s8 + $0x1658] sm:$0x3]  ;;  %v1826_v57 = vcombine.high %v1824_v49, %v1824_v49 }
 0x1e2   : > { %13470 = vmatpush1.bf16.xpose.msra.mxu1 %v13469_v60  ;;  %7013 = vmatprep.subr.mxu0 %v1019_v61  ;;  %v737_v60 = vld [vmem:[%s14312_s8 + $0xd58] sm:$0xff] }
 0x1e3   : > { %7083 = vmatprep.subr.mxu1 %v1021_v63  ;;  %7073 = vmatprep.mubr.f32.mxu0 %v1791_v62  ;;  %v445_v61 = vld [vmem:[%s14312_s8 + $0x438] sm:$0xff]  ;;  %v739_v62 = vld [vmem:[%s14312_s8 + $0xd68] sm:$0xff]  ;;  %v1827_v63 = vcombine.high %v269_v58, %v269_v58 }
 0x1e4   : > { %7143 = vmatprep.mubr.f32.mxu1 %v1792_v0  ;;  %v1026_v0 = vld [vmem:[%s14312_s8 + $0x1660] sm:$0x3]  ;;  %v13491_v6 = vpack.c.bf16 %v739_v62, %v445_v61  ;;  %v1036_v62 = vld [vmem:[%s14312_s8 + $0x16b0] sm:$0x3] }
 0x1e7   : > { %v4555_v11 = vpop.f32.mrb[24].mxu0 }
 0x1e8   : > { %v4556_v17 = vadd.f32 %v4555_v11, %v4486_v59  ;;  %v4557_v18 = vpop.f32.mrb[25].mxu0  ;;  %v4625_v19 = vpop.f32.mrb[24].mxu1  ;;  %v443_v59 = vld [vmem:[%s14312_s8 + $0x428] sm:$0xff] }
 0x1e9   : > { %7014 = vmatpush1.xpose.msra.mxu0 %v1018_v7  ;;  %v4627_v23 = vpop.f32.mrb[25].mxu1  ;;  %v13487_v1 = vpack.c.bf16 %v737_v60, %v443_v59  ;;  %v444_v7 = vld [vmem:[%s14312_s8 + $0x430] sm:$0xff]  ;;  %v1031_v18 = vld [vmem:[%s14312_s8 + $0x1688] sm:$0x3]  ;;  %v450_v59 = vld [vmem:[%s14312_s8 + $0x460] sm:$0xff] }
 0x1ea   : > { %v4626_v24 = vadd.f32 %v4625_v19, %v4556_v17  ;;  %7084 = vmatpush1.xpose.msra.mxu1 %v1020_v12  ;;  %13472 = vmatprep.subr.bf16.mxu0 %v13471_v8  ;;  %v738_v8 = vld [vmem:[%s14312_s8 + $0xd60] sm:$0xff]  ;;  %v1842_v19 = vcombine.high %v1834_v9, %v1834_v9  ;;  %v270_v23 = vld [vmem:[%s14305_s10 + $0x110] sm:$0xff] }
 0x1eb   : > { %13476 = vmatprep.subr.bf16.mxu1 %v13475_v13  ;;  %v1841_v13 = vrot.slane %v1827_v63, %v14335_v21  ;;  %v13493_v17 = vpack.c.bf16 %v738_v8, %v444_v7  ;;  %v1851_v38 = vrot.slane %v270_v23, %v14335_v21  ;;  %v744_v60 = vld [vmem:[%s14312_s8 + $0xd90] sm:$0xff] }
 0x1ec   : > { %7074 = vmatmul.mubr.f32.vlgmr.msra.gmra.mrb[60].mxu0 %v1783_v52  ;;  %v13505_v7 = vpack.c.bf16 %v744_v60, %v450_v59 }
 0x1ed   : > { %13474 = vmatpush1.bf16.xpose.msra.mxu0 %v13473_v22  ;;  %7144 = vmatmul.mubr.f32.vlgmr.msra.gmra.mrb[60].mxu1 %v1790_v56  ;;  %v1029_v56 = vld [vmem:[%s14312_s8 + $0x1678] sm:$0x3]  ;;  %v1843_v22 = vcombine.high %v1841_v13, %v1841_v13 }
 0x1ee   : > { %13478 = vmatpush1.bf16.xpose.msra.mxu1 %v13477_v25  ;;  %7153 = vmatprep.subr.mxu0 %v1023_v26  ;;  %v741_v25 = vld [vmem:[%s14312_s8 + $0xd78] sm:$0xff] }
 0x1ef   : > { %7223 = vmatprep.subr.mxu1 %v1025_v28  ;;  %7213 = vmatprep.mubr.f32.mxu0 %v1808_v27  ;;  %v449_v26 = vld [vmem:[%s14312_s8 + $0x458] sm:$0xff]  ;;  %v743_v27 = vld [vmem:[%s14312_s8 + $0xd88] sm:$0xff]  ;;  %v1844_v28 = vcombine.high %v270_v23, %v270_v23 }
 0x1f0   : > { %7283 = vmatprep.mubr.f32.mxu1 %v1809_v29  ;;  %v1030_v29 = vld [vmem:[%s14312_s8 + $0x1680] sm:$0x3]  ;;  %v13499_v35 = vpack.c.bf16 %v743_v27, %v449_v26  ;;  %v1040_v27 = vld [vmem:[%s14312_s8 + $0x16d0] sm:$0x3] }
 0x1f3   : > { %v4695_v40 = vpop.f32.mrb[26].mxu0 }
 0x1f4   : > { %v4696_v46 = vadd.f32 %v4695_v40, %v4626_v24  ;;  %v4697_v47 = vpop.f32.mrb[27].mxu0  ;;  %v4765_v48 = vpop.f32.mrb[26].mxu1  ;;  %v447_v24 = vld [vmem:[%s14312_s8 + $0x448] sm:$0xff] }
 0x1f5   : > { %7154 = vmatpush1.xpose.msra.mxu0 %v1022_v36  ;;  %v4767_v51 = vpop.f32.mrb[27].mxu1  ;;  %v13495_v30 = vpack.c.bf16 %v741_v25, %v447_v24  ;;  %v448_v36 = vld [vmem:[%s14312_s8 + $0x450] sm:$0xff]  ;;  %v1035_v47 = vld [vmem:[%s14312_s8 + $0x16a8] sm:$0x3]  ;;  %v454_v24 = vld [vmem:[%s14312_s8 + $0x480] sm:$0xff] }
 0x1f6   : > { %v4766_v52 = vadd.f32 %v4765_v48, %v4696_v46  ;;  %7224 = vmatpush1.xpose.msra.mxu1 %v1024_v41  ;;  %13480 = vmatprep.subr.bf16.mxu0 %v13479_v37  ;;  %v742_v37 = vld [vmem:[%s14312_s8 + $0xd80] sm:$0xff]  ;;  %v1859_v48 = vcombine.high %v1851_v38, %v1851_v38  ;;  %v748_v25 = vld [vmem:[%s14312_s8 + $0xdb0] sm:$0xff] }
 0x1f7   : > { %13484 = vmatprep.subr.bf16.mxu1 %v13483_v42  ;;  %v1858_v42 = vrot.slane %v1844_v28, %v14335_v21  ;;  %v13501_v46 = vpack.c.bf16 %v742_v37, %v448_v36  ;;  %v271_v51 = vld [vmem:[%s14305_s10 + $0x118] sm:$0xff]  ;;  %v13513_v36 = vpack.c.bf16 %v748_v25, %v454_v24 }
 0x1f8   : > { %7214 = vmatmul.mubr.f32.vlgmr.msra.gmra.mrb[62].mxu0 %v1800_v16  ;;  %v1868_v2 = vrot.slane %v271_v51, %v14335_v21 }
 0x1f9   : > { %13482 = vmatpush1.bf16.xpose.msra.mxu0 %v13481_v50  ;;  %7284 = vmatmul.mubr.f32.vlgmr.msra.gmra.mrb[62].mxu1 %v1807_v20  ;;  %v1033_v20 = vld [vmem:[%s14312_s8 + $0x1698] sm:$0x3]  ;;  %v1860_v50 = vcombine.high %v1858_v42, %v1858_v42 }
 0x1fa   : > { %13486 = vmatpush1.bf16.xpose.msra.mxu1 %v13485_v53  ;;  %7293 = vmatprep.subr.mxu0 %v1027_v54  ;;  %v745_v53 = vld [vmem:[%s14312_s8 + $0xd98] sm:$0xff] }
 0x1fb   : > { %7363 = vmatprep.subr.mxu1 %v1029_v56  ;;  %7353 = vmatprep.mubr.f32.mxu0 %v1825_v55  ;;  %v453_v54 = vld [vmem:[%s14312_s8 + $0x478] sm:$0xff]  ;;  %v747_v55 = vld [vmem:[%s14312_s8 + $0xda8] sm:$0xff]  ;;  %v1861_v56 = vcombine.high %v271_v51, %v271_v51 }
 0x1fc   : > { %7423 = vmatprep.mubr.f32.mxu1 %v1826_v57  ;;  %v1034_v57 = vld [vmem:[%s14312_s8 + $0x16a0] sm:$0x3]  ;;  %v13507_v63 = vpack.c.bf16 %v747_v55, %v453_v54  ;;  %v1044_v55 = vld [vmem:[%s14312_s8 + $0x16f0] sm:$0x3] }
 0x1ff   : > { %v4835_v4 = vpop.f32.mrb[28].mxu0 }
 0x200   : > { %v4836_v10 = vadd.f32 %v4835_v4, %v4766_v52  ;;  %v4837_v11 = vpop.f32.mrb[29].mxu0  ;;  %v4905_v12 = vpop.f32.mrb[28].mxu1  ;;  %v451_v52 = vld [vmem:[%s14312_s8 + $0x468] sm:$0xff] }
 0x201   : > { %7294 = vmatpush1.xpose.msra.mxu0 %v1026_v0  ;;  %v4907_v15 = vpop.f32.mrb[29].mxu1  ;;  %v13503_v58 = vpack.c.bf16 %v745_v53, %v451_v52  ;;  %v452_v0 = vld [vmem:[%s14312_s8 + $0x470] sm:$0xff]  ;;  %v1039_v11 = vld [vmem:[%s14312_s8 + $0x16c8] sm:$0x3]  ;;  %v458_v52 = vld [vmem:[%s14312_s8 + $0x4a0] sm:$0xff] }
 0x202   : > { %v4906_v16 = vadd.f32 %v4905_v12, %v4836_v10  ;;  %7364 = vmatpush1.xpose.msra.mxu1 %v1028_v5  ;;  %13488 = vmatprep.subr.bf16.mxu0 %v13487_v1  ;;  %v746_v1 = vld [vmem:[%s14312_s8 + $0xda0] sm:$0xff]  ;;  %v1876_v12 = vcombine.high %v1868_v2, %v1868_v2  ;;  %v752_v53 = vld [vmem:[%s14312_s8 + $0xdd0] sm:$0xff] }
 0x203   : > { %13492 = vmatprep.subr.bf16.mxu1 %v13491_v6  ;;  %v1875_v6 = vrot.slane %v1861_v56, %v14335_v21  ;;  %v13509_v10 = vpack.c.bf16 %v746_v1, %v452_v0  ;;  %v272_v15 = vld [vmem:[%s14305_s10 + $0x120] sm:$0xff]  ;;  %v13521_v0 = vpack.c.bf16 %v752_v53, %v458_v52 }
 0x204   : > { %7354 = vmatmul.mubr.f32.vlgmr.msra.gmra.mrb[64].mxu0 %v1817_v45  ;;  %v1885_v31 = vrot.slane %v272_v15, %v14335_v21 }
 0x205   : > { %13490 = vmatpush1.bf16.xpose.msra.mxu0 %v13489_v14  ;;  %7424 = vmatmul.mubr.f32.vlgmr.msra.gmra.mrb[64].mxu1 %v1824_v49  ;;  %v1037_v49 = vld [vmem:[%s14312_s8 + $0x16b8] sm:$0x3]  ;;  %v1877_v14 = vcombine.high %v1875_v6, %v1875_v6 }
 0x206   : > { %13494 = vmatpush1.bf16.xpose.msra.mxu1 %v13493_v17  ;;  %7433 = vmatprep.subr.mxu0 %v1031_v18  ;;  %v749_v17 = vld [vmem:[%s14312_s8 + $0xdb8] sm:$0xff] }
 0x207   : > { %7503 = vmatprep.subr.mxu1 %v1033_v20  ;;  %7493 = vmatprep.mubr.f32.mxu0 %v1842_v19  ;;  %v457_v18 = vld [vmem:[%s14312_s8 + $0x498] sm:$0xff]  ;;  %v751_v19 = vld [vmem:[%s14312_s8 + $0xdc8] sm:$0xff]  ;;  %v1878_v20 = vcombine.high %v272_v15, %v272_v15 }
 0x208   : > { %7563 = vmatprep.mubr.f32.mxu1 %v1843_v22  ;;  %v1038_v22 = vld [vmem:[%s14312_s8 + $0x16c0] sm:$0x3]  ;;  %v13515_v28 = vpack.c.bf16 %v751_v19, %v457_v18  ;;  %v1048_v19 = vld [vmem:[%s14312_s8 + $0x1710] sm:$0x3] }
 0x20b   : > { %v4975_v33 = vpop.f32.mrb[30].mxu0 }
 0x20c   : > { %v4976_v39 = vadd.f32 %v4975_v33, %v4906_v16  ;;  %v4977_v40 = vpop.f32.mrb[31].mxu0  ;;  %v5045_v41 = vpop.f32.mrb[30].mxu1  ;;  %v455_v16 = vld [vmem:[%s14312_s8 + $0x488] sm:$0xff] }
 0x20d   : > { %7434 = vmatpush1.xpose.msra.mxu0 %v1030_v29  ;;  %v5047_v44 = vpop.f32.mrb[31].mxu1  ;;  %v13511_v23 = vpack.c.bf16 %v749_v17, %v455_v16  ;;  %v456_v29 = vld [vmem:[%s14312_s8 + $0x490] sm:$0xff]  ;;  %v1043_v40 = vld [vmem:[%s14312_s8 + $0x16e8] sm:$0x3]  ;;  %v462_v16 = vld [vmem:[%s14312_s8 + $0x4c0] sm:$0xff] }
 0x20e   : > { %v5046_v45 = vadd.f32 %v5045_v41, %v4976_v39  ;;  %7504 = vmatpush1.xpose.msra.mxu1 %v1032_v34  ;;  %13496 = vmatprep.subr.bf16.mxu0 %v13495_v30  ;;  %v750_v30 = vld [vmem:[%s14312_s8 + $0xdc0] sm:$0xff]  ;;  %v1893_v41 = vcombine.high %v1885_v31, %v1885_v31  ;;  %v273_v44 = vld [vmem:[%s14305_s10 + $0x128] sm:$0xff] }
 0x20f   : > { %13500 = vmatprep.subr.bf16.mxu1 %v13499_v35  ;;  %v1892_v35 = vrot.slane %v1878_v20, %v14335_v21  ;;  %v13517_v39 = vpack.c.bf16 %v750_v30, %v456_v29  ;;  %v1902_v59 = vrot.slane %v273_v44, %v14335_v21  ;;  %v756_v17 = vld [vmem:[%s14312_s8 + $0xdf0] sm:$0xff] }
 0x210   : > { %7494 = vmatmul.mubr.f32.vlgmr.msra.gmra.mrb[66].mxu0 %v1834_v9  ;;  %v13529_v29 = vpack.c.bf16 %v756_v17, %v462_v16 }
 0x211   : > { %13498 = vmatpush1.bf16.xpose.msra.mxu0 %v13497_v43  ;;  %7564 = vmatmul.mubr.f32.vlgmr.msra.gmra.mrb[66].mxu1 %v1841_v13  ;;  %v1041_v13 = vld [vmem:[%s14312_s8 + $0x16d8] sm:$0x3]  ;;  %v1894_v43 = vcombine.high %v1892_v35, %v1892_v35 }
 0x212   : > { %13502 = vmatpush1.bf16.xpose.msra.mxu1 %v13501_v46  ;;  %7573 = vmatprep.subr.mxu0 %v1035_v47  ;;  %v753_v46 = vld [vmem:[%s14312_s8 + $0xdd8] sm:$0xff] }
 0x213   : > { %7643 = vmatprep.subr.mxu1 %v1037_v49  ;;  %7633 = vmatprep.mubr.f32.mxu0 %v1859_v48  ;;  %v461_v47 = vld [vmem:[%s14312_s8 + $0x4b8] sm:$0xff]  ;;  %v755_v48 = vld [vmem:[%s14312_s8 + $0xde8] sm:$0xff]  ;;  %v1895_v49 = vcombine.high %v273_v44, %v273_v44 }
 0x214   : > { %7703 = vmatprep.mubr.f32.mxu1 %v1860_v50  ;;  %v1042_v50 = vld [vmem:[%s14312_s8 + $0x16e0] sm:$0x3]  ;;  %v13523_v56 = vpack.c.bf16 %v755_v48, %v461_v47  ;;  %v1052_v48 = vld [vmem:[%s14312_s8 + $0x1730] sm:$0x3] }
 0x217   : > { %v5115_v61 = vpop.f32.mrb[32].mxu0 }
 0x218   : > { %v5116_v3 = vadd.f32 %v5115_v61, %v5046_v45  ;;  %v5117_v4 = vpop.f32.mrb[33].mxu0  ;;  %v5185_v5 = vpop.f32.mrb[32].mxu1  ;;  %v459_v45 = vld [vmem:[%s14312_s8 + $0x4a8] sm:$0xff] }
 0x219   : > { %7574 = vmatpush1.xpose.msra.mxu0 %v1034_v57  ;;  %v5187_v8 = vpop.f32.mrb[33].mxu1  ;;  %v13519_v51 = vpack.c.bf16 %v753_v46, %v459_v45  ;;  %v460_v57 = vld [vmem:[%s14312_s8 + $0x4b0] sm:$0xff]  ;;  %v1047_v4 = vld [vmem:[%s14312_s8 + $0x1708] sm:$0x3]  ;;  %v466_v45 = vld [vmem:[%s14312_s8 + $0x4e0] sm:$0xff] }
 0x21a   : > { %v5186_v9 = vadd.f32 %v5185_v5, %v5116_v3  ;;  %7644 = vmatpush1.xpose.msra.mxu1 %v1036_v62  ;;  %13504 = vmatprep.subr.bf16.mxu0 %v13503_v58  ;;  %v754_v58 = vld [vmem:[%s14312_s8 + $0xde0] sm:$0xff]  ;;  %v1910_v5 = vcombine.high %v1902_v59, %v1902_v59  ;;  %v274_v8 = vld [vmem:[%s14305_s10 + $0x130] sm:$0xff] }
 0x21b   : > { %13508 = vmatprep.subr.bf16.mxu1 %v13507_v63  ;;  %v1909_v63 = vrot.slane %v1895_v49, %v14335_v21  ;;  %v13525_v3 = vpack.c.bf16 %v754_v58, %v460_v57  ;;  %v1919_v24 = vrot.slane %v274_v8, %v14335_v21  ;;  %v760_v46 = vld [vmem:[%s14312_s8 + $0xe10] sm:$0xff] }
 0x21c   : > { %7634 = vmatmul.mubr.f32.vlgmr.msra.gmra.mrb[68].mxu0 %v1851_v38  ;;  %v13537_v57 = vpack.c.bf16 %v760_v46, %v466_v45 }
 0x21d   : > { %13506 = vmatpush1.bf16.xpose.msra.mxu0 %v13505_v7  ;;  %7704 = vmatmul.mubr.f32.vlgmr.msra.gmra.mrb[68].mxu1 %v1858_v42  ;;  %v1045_v42 = vld [vmem:[%s14312_s8 + $0x16f8] sm:$0x3]  ;;  %v1911_v7 = vcombine.high %v1909_v63, %v1909_v63 }
 0x21e   : > { %13510 = vmatpush1.bf16.xpose.msra.mxu1 %v13509_v10  ;;  %7713 = vmatprep.subr.mxu0 %v1039_v11  ;;  %v757_v10 = vld [vmem:[%s14312_s8 + $0xdf8] sm:$0xff] }
 0x21f   : > { %7783 = vmatprep.subr.mxu1 %v1041_v13  ;;  %7773 = vmatprep.mubr.f32.mxu0 %v1876_v12  ;;  %v465_v11 = vld [vmem:[%s14312_s8 + $0x4d8] sm:$0xff]  ;;  %v759_v12 = vld [vmem:[%s14312_s8 + $0xe08] sm:$0xff]  ;;  %v1912_v13 = vcombine.high %v274_v8, %v274_v8 }
 0x220   : > { %7843 = vmatprep.mubr.f32.mxu1 %v1877_v14  ;;  %v1046_v14 = vld [vmem:[%s14312_s8 + $0x1700] sm:$0x3]  ;;  %v13531_v20 = vpack.c.bf16 %v759_v12, %v465_v11  ;;  %v1056_v12 = vld [vmem:[%s14312_s8 + $0x1750] sm:$0x3] }
 0x223   : > { %v5255_v26 = vpop.f32.mrb[34].mxu0 }
 0x224   : > { %v5256_v32 = vadd.f32 %v5255_v26, %v5186_v9  ;;  %v5257_v33 = vpop.f32.mrb[35].mxu0  ;;  %v5325_v34 = vpop.f32.mrb[34].mxu1  ;;  %v463_v9 = vld [vmem:[%s14312_s8 + $0x4c8] sm:$0xff] }
 0x225   : > { %7714 = vmatpush1.xpose.msra.mxu0 %v1038_v22  ;;  %v5327_v37 = vpop.f32.mrb[35].mxu1  ;;  %v13527_v15 = vpack.c.bf16 %v757_v10, %v463_v9  ;;  %v464_v22 = vld [vmem:[%s14312_s8 + $0x4d0] sm:$0xff]  ;;  %v1051_v33 = vld [vmem:[%s14312_s8 + $0x1728] sm:$0x3]  ;;  %v470_v9 = vld [vmem:[%s14312_s8 + $0x500] sm:$0xff] }
 0x226   : > { %v5326_v38 = vadd.f32 %v5325_v34, %v5256_v32  ;;  %7784 = vmatpush1.xpose.msra.mxu1 %v1040_v27  ;;  %13512 = vmatprep.subr.bf16.mxu0 %v13511_v23  ;;  %v758_v23 = vld [vmem:[%s14312_s8 + $0xe00] sm:$0xff]  ;;  %v1927_v34 = vcombine.high %v1919_v24, %v1919_v24  ;;  %v764_v10 = vld [vmem:[%s14312_s8 + $0xe30] sm:$0xff] }
 0x227   : > { %13516 = vmatprep.subr.bf16.mxu1 %v13515_v28  ;;  %v1926_v28 = vrot.slane %v1912_v13, %v14335_v21  ;;  %v13533_v32 = vpack.c.bf16 %v758_v23, %v464_v22  ;;  %v275_v37 = vld [vmem:[%s14305_s10 + $0x138] sm:$0xff]  ;;  %v13545_v22 = vpack.c.bf16 %v764_v10, %v470_v9 }
 0x228   : > { %7774 = vmatmul.mubr.f32.vlgmr.msra.gmra.mrb[70].mxu0 %v1868_v2  ;;  %v1936_v52 = vrot.slane %v275_v37, %v14335_v21 }
 0x229   : > { %13514 = vmatpush1.bf16.xpose.msra.mxu0 %v13513_v36  ;;  %7844 = vmatmul.mubr.f32.vlgmr.msra.gmra.mrb[70].mxu1 %v1875_v6  ;;  %v1049_v6 = vld [vmem:[%s14312_s8 + $0x1718] sm:$0x3]  ;;  %v1928_v36 = vcombine.high %v1926_v28, %v1926_v28 }
 0x22a   : > { %13518 = vmatpush1.bf16.xpose.msra.mxu1 %v13517_v39  ;;  %7853 = vmatprep.subr.mxu0 %v1043_v40  ;;  %v761_v39 = vld [vmem:[%s14312_s8 + $0xe18] sm:$0xff] }
 0x22b   : > { %7923 = vmatprep.subr.mxu1 %v1045_v42  ;;  %7913 = vmatprep.mubr.f32.mxu0 %v1893_v41  ;;  %v469_v40 = vld [vmem:[%s14312_s8 + $0x4f8] sm:$0xff]  ;;  %v763_v41 = vld [vmem:[%s14312_s8 + $0xe28] sm:$0xff]  ;;  %v1929_v42 = vcombine.high %v275_v37, %v275_v37 }
 0x22c   : > { %7983 = vmatprep.mubr.f32.mxu1 %v1894_v43  ;;  %v1050_v43 = vld [vmem:[%s14312_s8 + $0x1720] sm:$0x3]  ;;  %v13539_v49 = vpack.c.bf16 %v763_v41, %v469_v40  ;;  %v1060_v41 = vld [vmem:[%s14312_s8 + $0x1770] sm:$0x3] }
 0x22f   : > { %v5395_v54 = vpop.f32.mrb[36].mxu0 }
 0x230   : > { %v5396_v60 = vadd.f32 %v5395_v54, %v5326_v38  ;;  %v5397_v61 = vpop.f32.mrb[37].mxu0  ;;  %v5465_v62 = vpop.f32.mrb[36].mxu1  ;;  %v467_v38 = vld [vmem:[%s14312_s8 + $0x4e8] sm:$0xff] }
 0x231   : > { %7854 = vmatpush1.xpose.msra.mxu0 %v1042_v50  ;;  %v5467_v1 = vpop.f32.mrb[37].mxu1  ;;  %v13535_v44 = vpack.c.bf16 %v761_v39, %v467_v38  ;;  %v468_v50 = vld [vmem:[%s14312_s8 + $0x4f0] sm:$0xff]  ;;  %v1055_v61 = vld [vmem:[%s14312_s8 + $0x1748] sm:$0x3]  ;;  %v474_v38 = vld [vmem:[%s14312_s8 + $0x520] sm:$0xff] }
 0x232   : > { %v5466_v2 = vadd.f32 %v5465_v62, %v5396_v60  ;;  %7924 = vmatpush1.xpose.msra.mxu1 %v1044_v55  ;;  %13520 = vmatprep.subr.bf16.mxu0 %v13519_v51  ;;  %v762_v51 = vld [vmem:[%s14312_s8 + $0xe20] sm:$0xff]  ;;  %v1944_v62 = vcombine.high %v1936_v52, %v1936_v52  ;;  %v768_v39 = vld [vmem:[%s14312_s8 + $0xe50] sm:$0xff] }
 0x233   : > { %13524 = vmatprep.subr.bf16.mxu1 %v13523_v56  ;;  %v1943_v56 = vrot.slane %v1929_v42, %v14335_v21  ;;  %v13541_v60 = vpack.c.bf16 %v762_v51, %v468_v50  ;;  %v276_v1 = vld [vmem:[%s14305_s10 + $0x140] sm:$0xff]  ;;  %v13553_v50 = vpack.c.bf16 %v768_v39, %v474_v38 }
 0x234   : > { %7914 = vmatmul.mubr.f32.vlgmr.msra.gmra.mrb[72].mxu0 %v1885_v31  ;;  %v1953_v16 = vrot.slane %v276_v1, %v14335_v21 }
 0x235   : > { %13522 = vmatpush1.bf16.xpose.msra.mxu0 %v13521_v0  ;;  %7984 = vmatmul.mubr.f32.vlgmr.msra.gmra.mrb[72].mxu1 %v1892_v35  ;;  %v1053_v35 = vld [vmem:[%s14312_s8 + $0x1738] sm:$0x3]  ;;  %v1945_v0 = vcombine.high %v1943_v56, %v1943_v56 }
 0x236   : > { %13526 = vmatpush1.bf16.xpose.msra.mxu1 %v13525_v3  ;;  %7993 = vmatprep.subr.mxu0 %v1047_v4  ;;  %v765_v3 = vld [vmem:[%s14312_s8 + $0xe38] sm:$0xff] }
 0x237   : > { %8063 = vmatprep.subr.mxu1 %v1049_v6  ;;  %8053 = vmatprep.mubr.f32.mxu0 %v1910_v5  ;;  %v473_v4 = vld [vmem:[%s14312_s8 + $0x518] sm:$0xff]  ;;  %v767_v5 = vld [vmem:[%s14312_s8 + $0xe48] sm:$0xff]  ;;  %v1946_v6 = vcombine.high %v276_v1, %v276_v1 }
 0x238   : > { %8123 = vmatprep.mubr.f32.mxu1 %v1911_v7  ;;  %v1054_v7 = vld [vmem:[%s14312_s8 + $0x1740] sm:$0x3]  ;;  %v13547_v13 = vpack.c.bf16 %v767_v5, %v473_v4  ;;  %v1064_v5 = vld [vmem:[%s14312_s8 + $0x1790] sm:$0x3] }
 0x23b   : > { %v5535_v18 = vpop.f32.mrb[38].mxu0 }
 0x23c   : > { %v5536_v25 = vadd.f32 %v5535_v18, %v5466_v2  ;;  %v5537_v26 = vpop.f32.mrb[39].mxu0  ;;  %v5605_v27 = vpop.f32.mrb[38].mxu1  ;;  %v471_v2 = vld [vmem:[%s14312_s8 + $0x508] sm:$0xff] }
 0x23d   : > { %7994 = vmatpush1.xpose.msra.mxu0 %v1046_v14  ;;  %v5607_v30 = vpop.f32.mrb[39].mxu1  ;;  %v13543_v8 = vpack.c.bf16 %v765_v3, %v471_v2  ;;  %v472_v14 = vld [vmem:[%s14312_s8 + $0x510] sm:$0xff]  ;;  %v1059_v26 = vld [vmem:[%s14312_s8 + $0x1768] sm:$0x3]  ;;  %v478_v2 = vld [vmem:[%s14312_s8 + $0x540] sm:$0xff] }
 0x23e   : > { %v5606_v31 = vadd.f32 %v5605_v27, %v5536_v25  ;;  %8064 = vmatpush1.xpose.msra.mxu1 %v1048_v19  ;;  %13528 = vmatprep.subr.bf16.mxu0 %v13527_v15  ;;  %v766_v15 = vld [vmem:[%s14312_s8 + $0xe40] sm:$0xff]  ;;  %v1961_v27 = vcombine.high %v1953_v16, %v1953_v16  ;;  %v277_v30 = vld [vmem:[%s14305_s10 + $0x148] sm:$0xff] }
 0x23f   : > { %13532 = vmatprep.subr.bf16.mxu1 %v13531_v20  ;;  %v1960_v20 = vrot.slane %v1946_v6, %v14335_v21  ;;  %v13549_v25 = vpack.c.bf16 %v766_v15, %v472_v14  ;;  %v1970_v45 = vrot.slane %v277_v30, %v14335_v21  ;;  %v772_v3 = vld [vmem:[%s14312_s8 + $0xe70] sm:$0xff] }
 0x240   : > { %8054 = vmatmul.mubr.f32.vlgmr.msra.gmra.mrb[74].mxu0 %v1902_v59  ;;  %v13561_v14 = vpack.c.bf16 %v772_v3, %v478_v2 }
 0x241   : > { %13530 = vmatpush1.bf16.xpose.msra.mxu0 %v13529_v29  ;;  %8124 = vmatmul.mubr.f32.vlgmr.msra.gmra.mrb[74].mxu1 %v1909_v63  ;;  %v1057_v63 = vld [vmem:[%s14312_s8 + $0x1758] sm:$0x3]  ;;  %v1962_v29 = vcombine.high %v1960_v20, %v1960_v20 }
 0x242   : > { %13534 = vmatpush1.bf16.xpose.msra.mxu1 %v13533_v32  ;;  %8133 = vmatprep.subr.mxu0 %v1051_v33  ;;  %v769_v32 = vld [vmem:[%s14312_s8 + $0xe58] sm:$0xff] }
 0x243   : > { %8203 = vmatprep.subr.mxu1 %v1053_v35  ;;  %8193 = vmatprep.mubr.f32.mxu0 %v1927_v34  ;;  %v477_v33 = vld [vmem:[%s14312_s8 + $0x538] sm:$0xff]  ;;  %v771_v34 = vld [vmem:[%s14312_s8 + $0xe68] sm:$0xff]  ;;  %v1963_v35 = vcombine.high %v277_v30, %v277_v30 }
 0x244   : > { %8263 = vmatprep.mubr.f32.mxu1 %v1928_v36  ;;  %v1058_v36 = vld [vmem:[%s14312_s8 + $0x1760] sm:$0x3]  ;;  %v13555_v42 = vpack.c.bf16 %v771_v34, %v477_v33  ;;  %v1068_v34 = vld [vmem:[%s14312_s8 + $0x17b0] sm:$0x3] }
 0x247   : > { %v5675_v47 = vpop.f32.mrb[40].mxu0 }
 0x248   : > { %v5676_v53 = vadd.f32 %v5675_v47, %v5606_v31  ;;  %v5677_v54 = vpop.f32.mrb[41].mxu0  ;;  %v5745_v55 = vpop.f32.mrb[40].mxu1  ;;  %v475_v31 = vld [vmem:[%s14312_s8 + $0x528] sm:$0xff] }
 0x249   : > { %8134 = vmatpush1.xpose.msra.mxu0 %v1050_v43  ;;  %v5747_v58 = vpop.f32.mrb[41].mxu1  ;;  %v13551_v37 = vpack.c.bf16 %v769_v32, %v475_v31  ;;  %v476_v43 = vld [vmem:[%s14312_s8 + $0x530] sm:$0xff]  ;;  %v1063_v54 = vld [vmem:[%s14312_s8 + $0x1788] sm:$0x3]  ;;  %v482_v31 = vld [vmem:[%s14312_s8 + $0x560] sm:$0xff] }
 0x24a   : > { %v5746_v59 = vadd.f32 %v5745_v55, %v5676_v53  ;;  %8204 = vmatpush1.xpose.msra.mxu1 %v1052_v48  ;;  %13536 = vmatprep.subr.bf16.mxu0 %v13535_v44  ;;  %v770_v44 = vld [vmem:[%s14312_s8 + $0xe60] sm:$0xff]  ;;  %v1978_v55 = vcombine.high %v1970_v45, %v1970_v45  ;;  %v278_v58 = vld [vmem:[%s14305_s10 + $0x150] sm:$0xff] }
 0x24b   : > { %13540 = vmatprep.subr.bf16.mxu1 %v13539_v49  ;;  %v1977_v49 = vrot.slane %v1963_v35, %v14335_v21  ;;  %v13557_v53 = vpack.c.bf16 %v770_v44, %v476_v43  ;;  %v1987_v9 = vrot.slane %v278_v58, %v14335_v21  ;;  %v776_v32 = vld [vmem:[%s14312_s8 + $0xe90] sm:$0xff] }
 0x24c   : > { %8194 = vmatmul.mubr.f32.vlgmr.msra.gmra.mrb[76].mxu0 %v1919_v24  ;;  %v13569_v43 = vpack.c.bf16 %v776_v32, %v482_v31 }
 0x24d   : > { %13538 = vmatpush1.bf16.xpose.msra.mxu0 %v13537_v57  ;;  %8264 = vmatmul.mubr.f32.vlgmr.msra.gmra.mrb[76].mxu1 %v1926_v28  ;;  %v1061_v28 = vld [vmem:[%s14312_s8 + $0x1778] sm:$0x3]  ;;  %v1979_v57 = vcombine.high %v1977_v49, %v1977_v49 }
 0x24e   : > { %13542 = vmatpush1.bf16.xpose.msra.mxu1 %v13541_v60  ;;  %8273 = vmatprep.subr.mxu0 %v1055_v61  ;;  %v773_v60 = vld [vmem:[%s14312_s8 + $0xe78] sm:$0xff] }
 0x24f   : > { %8343 = vmatprep.subr.mxu1 %v1057_v63  ;;  %8333 = vmatprep.mubr.f32.mxu0 %v1944_v62  ;;  %v481_v61 = vld [vmem:[%s14312_s8 + $0x558] sm:$0xff]  ;;  %v775_v62 = vld [vmem:[%s14312_s8 + $0xe88] sm:$0xff]  ;;  %v1980_v63 = vcombine.high %v278_v58, %v278_v58 }
 0x250   : > { %8403 = vmatprep.mubr.f32.mxu1 %v1945_v0  ;;  %v1062_v0 = vld [vmem:[%s14312_s8 + $0x1780] sm:$0x3]  ;;  %v13563_v6 = vpack.c.bf16 %v775_v62, %v481_v61  ;;  %v1072_v62 = vld [vmem:[%s14312_s8 + $0x17d0] sm:$0x3] }
 0x253   : > { %v5815_v11 = vpop.f32.mrb[42].mxu0 }
 0x254   : > { %v5816_v17 = vadd.f32 %v5815_v11, %v5746_v59  ;;  %v5817_v18 = vpop.f32.mrb[43].mxu0  ;;  %v5885_v19 = vpop.f32.mrb[42].mxu1  ;;  %v479_v59 = vld [vmem:[%s14312_s8 + $0x548] sm:$0xff] }
 0x255   : > { %8274 = vmatpush1.xpose.msra.mxu0 %v1054_v7  ;;  %v5887_v23 = vpop.f32.mrb[43].mxu1  ;;  %v13559_v1 = vpack.c.bf16 %v773_v60, %v479_v59  ;;  %v480_v7 = vld [vmem:[%s14312_s8 + $0x550] sm:$0xff]  ;;  %v1067_v18 = vld [vmem:[%s14312_s8 + $0x17a8] sm:$0x3]  ;;  %v486_v59 = vld [vmem:[%s14312_s8 + $0x580] sm:$0xff] }
 0x256   : > { %v5886_v24 = vadd.f32 %v5885_v19, %v5816_v17  ;;  %8344 = vmatpush1.xpose.msra.mxu1 %v1056_v12  ;;  %13544 = vmatprep.subr.bf16.mxu0 %v13543_v8  ;;  %v774_v8 = vld [vmem:[%s14312_s8 + $0xe80] sm:$0xff]  ;;  %v1995_v19 = vcombine.high %v1987_v9, %v1987_v9  ;;  %v780_v60 = vld [vmem:[%s14312_s8 + $0xeb0] sm:$0xff] }
 0x257   : > { %13548 = vmatprep.subr.bf16.mxu1 %v13547_v13  ;;  %v1994_v13 = vrot.slane %v1980_v63, %v14335_v21  ;;  %v13565_v17 = vpack.c.bf16 %v774_v8, %v480_v7  ;;  %v279_v23 = vld [vmem:[%s14305_s10 + $0x158] sm:$0xff]  ;;  %v13577_v7 = vpack.c.bf16 %v780_v60, %v486_v59 }
 0x258   : > { %8334 = vmatmul.mubr.f32.vlgmr.msra.gmra.mrb[78].mxu0 %v1936_v52  ;;  %v2004_v38 = vrot.slane %v279_v23, %v14335_v21 }
 0x259   : > { %13546 = vmatpush1.bf16.xpose.msra.mxu0 %v13545_v22  ;;  %8404 = vmatmul.mubr.f32.vlgmr.msra.gmra.mrb[78].mxu1 %v1943_v56  ;;  %v1065_v56 = vld [vmem:[%s14312_s8 + $0x1798] sm:$0x3]  ;;  %v1996_v22 = vcombine.high %v1994_v13, %v1994_v13 }
 0x25a   : > { %13550 = vmatpush1.bf16.xpose.msra.mxu1 %v13549_v25  ;;  %8413 = vmatprep.subr.mxu0 %v1059_v26  ;;  %v777_v25 = vld [vmem:[%s14312_s8 + $0xe98] sm:$0xff] }
 0x25b   : > { %8483 = vmatprep.subr.mxu1 %v1061_v28  ;;  %8473 = vmatprep.mubr.f32.mxu0 %v1961_v27  ;;  %v485_v26 = vld [vmem:[%s14312_s8 + $0x578] sm:$0xff]  ;;  %v779_v27 = vld [vmem:[%s14312_s8 + $0xea8] sm:$0xff]  ;;  %v1997_v28 = vcombine.high %v279_v23, %v279_v23 }
 0x25c   : > { %8543 = vmatprep.mubr.f32.mxu1 %v1962_v29  ;;  %v1066_v29 = vld [vmem:[%s14312_s8 + $0x17a0] sm:$0x3]  ;;  %v13571_v35 = vpack.c.bf16 %v779_v27, %v485_v26  ;;  %v1076_v27 = vld [vmem:[%s14312_s8 + $0x17f0] sm:$0x3] }
 0x25f   : > { %v5955_v40 = vpop.f32.mrb[44].mxu0 }
 0x260   : > { %v5956_v46 = vadd.f32 %v5955_v40, %v5886_v24  ;;  %v5957_v47 = vpop.f32.mrb[45].mxu0  ;;  %v6025_v48 = vpop.f32.mrb[44].mxu1  ;;  %v483_v24 = vld [vmem:[%s14312_s8 + $0x568] sm:$0xff] }
 0x261   : > { %8414 = vmatpush1.xpose.msra.mxu0 %v1058_v36  ;;  %v6027_v51 = vpop.f32.mrb[45].mxu1  ;;  %v13567_v30 = vpack.c.bf16 %v777_v25, %v483_v24  ;;  %v484_v36 = vld [vmem:[%s14312_s8 + $0x570] sm:$0xff]  ;;  %v1071_v47 = vld [vmem:[%s14312_s8 + $0x17c8] sm:$0x3]  ;;  %v490_v24 = vld [vmem:[%s14312_s8 + $0x5a0] sm:$0xff] }
 0x262   : > { %v6026_v52 = vadd.f32 %v6025_v48, %v5956_v46  ;;  %8484 = vmatpush1.xpose.msra.mxu1 %v1060_v41  ;;  %13552 = vmatprep.subr.bf16.mxu0 %v13551_v37  ;;  %v778_v37 = vld [vmem:[%s14312_s8 + $0xea0] sm:$0xff]  ;;  %v2012_v48 = vcombine.high %v2004_v38, %v2004_v38  ;;  %v784_v25 = vld [vmem:[%s14312_s8 + $0xed0] sm:$0xff] }
 0x263   : > { %13556 = vmatprep.subr.bf16.mxu1 %v13555_v42  ;;  %v2011_v42 = vrot.slane %v1997_v28, %v14335_v21  ;;  %v13573_v46 = vpack.c.bf16 %v778_v37, %v484_v36  ;;  %v280_v51 = vld [vmem:[%s14305_s10 + $0x160] sm:$0xff]  ;;  %v13585_v36 = vpack.c.bf16 %v784_v25, %v490_v24 }
 0x264   : > { %8474 = vmatmul.mubr.f32.vlgmr.msra.gmra.mrb[80].mxu0 %v1953_v16  ;;  %v2021_v2 = vrot.slane %v280_v51, %v14335_v21 }
 0x265   : > { %13554 = vmatpush1.bf16.xpose.msra.mxu0 %v13553_v50  ;;  %8544 = vmatmul.mubr.f32.vlgmr.msra.gmra.mrb[80].mxu1 %v1960_v20  ;;  %v1069_v20 = vld [vmem:[%s14312_s8 + $0x17b8] sm:$0x3]  ;;  %v2013_v50 = vcombine.high %v2011_v42, %v2011_v42 }
 0x266   : > { %13558 = vmatpush1.bf16.xpose.msra.mxu1 %v13557_v53  ;;  %8553 = vmatprep.subr.mxu0 %v1063_v54  ;;  %v781_v53 = vld [vmem:[%s14312_s8 + $0xeb8] sm:$0xff] }
 0x267   : > { %8623 = vmatprep.subr.mxu1 %v1065_v56  ;;  %8613 = vmatprep.mubr.f32.mxu0 %v1978_v55  ;;  %v489_v54 = vld [vmem:[%s14312_s8 + $0x598] sm:$0xff]  ;;  %v783_v55 = vld [vmem:[%s14312_s8 + $0xec8] sm:$0xff]  ;;  %v2014_v56 = vcombine.high %v280_v51, %v280_v51 }
 0x268   : > { %8683 = vmatprep.mubr.f32.mxu1 %v1979_v57  ;;  %v1070_v57 = vld [vmem:[%s14312_s8 + $0x17c0] sm:$0x3]  ;;  %v13579_v63 = vpack.c.bf16 %v783_v55, %v489_v54  ;;  %v1080_v55 = vld [vmem:[%s14312_s8 + $0x1810] sm:$0x3] }
 0x26b   : > { %v6095_v4 = vpop.f32.mrb[46].mxu0 }
 0x26c   : > { %v6096_v10 = vadd.f32 %v6095_v4, %v6026_v52  ;;  %v6097_v11 = vpop.f32.mrb[47].mxu0  ;;  %v6165_v12 = vpop.f32.mrb[46].mxu1  ;;  %v487_v52 = vld [vmem:[%s14312_s8 + $0x588] sm:$0xff] }
 0x26d   : > { %8554 = vmatpush1.xpose.msra.mxu0 %v1062_v0  ;;  %v6167_v15 = vpop.f32.mrb[47].mxu1  ;;  %v13575_v58 = vpack.c.bf16 %v781_v53, %v487_v52  ;;  %v488_v0 = vld [vmem:[%s14312_s8 + $0x590] sm:$0xff]  ;;  %v1075_v11 = vld [vmem:[%s14312_s8 + $0x17e8] sm:$0x3]  ;;  %v494_v52 = vld [vmem:[%s14312_s8 + $0x5c0] sm:$0xff] }
 0x26e   : > { %v6166_v16 = vadd.f32 %v6165_v12, %v6096_v10  ;;  %8624 = vmatpush1.xpose.msra.mxu1 %v1064_v5  ;;  %13560 = vmatprep.subr.bf16.mxu0 %v13559_v1  ;;  %v782_v1 = vld [vmem:[%s14312_s8 + $0xec0] sm:$0xff]  ;;  %v2029_v12 = vcombine.high %v2021_v2, %v2021_v2  ;;  %v281_v15 = vld [vmem:[%s14305_s10 + $0x168] sm:$0xff] }
 0x26f   : > { %13564 = vmatprep.subr.bf16.mxu1 %v13563_v6  ;;  %v2028_v6 = vrot.slane %v2014_v56, %v14335_v21  ;;  %v13581_v10 = vpack.c.bf16 %v782_v1, %v488_v0  ;;  %v2038_v31 = vrot.slane %v281_v15, %v14335_v21  ;;  %v788_v53 = vld [vmem:[%s14312_s8 + $0xef0] sm:$0xff] }
 0x270   : > { %8614 = vmatmul.mubr.f32.vlgmr.msra.gmra.mrb[82].mxu0 %v1970_v45  ;;  %v13593_v0 = vpack.c.bf16 %v788_v53, %v494_v52 }
 0x271   : > { %13562 = vmatpush1.bf16.xpose.msra.mxu0 %v13561_v14  ;;  %8684 = vmatmul.mubr.f32.vlgmr.msra.gmra.mrb[82].mxu1 %v1977_v49  ;;  %v1073_v49 = vld [vmem:[%s14312_s8 + $0x17d8] sm:$0x3]  ;;  %v2030_v14 = vcombine.high %v2028_v6, %v2028_v6 }
 0x272   : > { %13566 = vmatpush1.bf16.xpose.msra.mxu1 %v13565_v17  ;;  %8693 = vmatprep.subr.mxu0 %v1067_v18  ;;  %v785_v17 = vld [vmem:[%s14312_s8 + $0xed8] sm:$0xff] }
 0x273   : > { %8763 = vmatprep.subr.mxu1 %v1069_v20  ;;  %8753 = vmatprep.mubr.f32.mxu0 %v1995_v19  ;;  %v493_v18 = vld [vmem:[%s14312_s8 + $0x5b8] sm:$0xff]  ;;  %v787_v19 = vld [vmem:[%s14312_s8 + $0xee8] sm:$0xff]  ;;  %v2031_v20 = vcombine.high %v281_v15, %v281_v15 }
 0x274   : > { %8823 = vmatprep.mubr.f32.mxu1 %v1996_v22  ;;  %v1074_v22 = vld [vmem:[%s14312_s8 + $0x17e0] sm:$0x3]  ;;  %v13587_v28 = vpack.c.bf16 %v787_v19, %v493_v18  ;;  %v1084_v19 = vld [vmem:[%s14312_s8 + $0x1830] sm:$0x3] }
 0x277   : > { %v6235_v33 = vpop.f32.mrb[48].mxu0 }
 0x278   : > { %v6236_v39 = vadd.f32 %v6235_v33, %v6166_v16  ;;  %v6237_v40 = vpop.f32.mrb[49].mxu0  ;;  %v6305_v41 = vpop.f32.mrb[48].mxu1  ;;  %v491_v16 = vld [vmem:[%s14312_s8 + $0x5a8] sm:$0xff] }
 0x279   : > { %8694 = vmatpush1.xpose.msra.mxu0 %v1066_v29  ;;  %v6307_v44 = vpop.f32.mrb[49].mxu1  ;;  %v13583_v23 = vpack.c.bf16 %v785_v17, %v491_v16  ;;  %v492_v29 = vld [vmem:[%s14312_s8 + $0x5b0] sm:$0xff]  ;;  %v1079_v40 = vld [vmem:[%s14312_s8 + $0x1808] sm:$0x3]  ;;  %v498_v16 = vld [vmem:[%s14312_s8 + $0x5e0] sm:$0xff] }
 0x27a   : > { %v6306_v45 = vadd.f32 %v6305_v41, %v6236_v39  ;;  %8764 = vmatpush1.xpose.msra.mxu1 %v1068_v34  ;;  %13568 = vmatprep.subr.bf16.mxu0 %v13567_v30  ;;  %v786_v30 = vld [vmem:[%s14312_s8 + $0xee0] sm:$0xff]  ;;  %v2046_v41 = vcombine.high %v2038_v31, %v2038_v31  ;;  %v282_v44 = vld [vmem:[%s14305_s10 + $0x170] sm:$0xff] }
 0x27b   : > { %13572 = vmatprep.subr.bf16.mxu1 %v13571_v35  ;;  %v2045_v35 = vrot.slane %v2031_v20, %v14335_v21  ;;  %v13589_v39 = vpack.c.bf16 %v786_v30, %v492_v29  ;;  %v2055_v59 = vrot.slane %v282_v44, %v14335_v21  ;;  %v792_v17 = vld [vmem:[%s14312_s8 + $0xf10] sm:$0xff] }
 0x27c   : > { %8754 = vmatmul.mubr.f32.vlgmr.msra.gmra.mrb[84].mxu0 %v1987_v9  ;;  %v13601_v29 = vpack.c.bf16 %v792_v17, %v498_v16 }
 0x27d   : > { %13570 = vmatpush1.bf16.xpose.msra.mxu0 %v13569_v43  ;;  %8824 = vmatmul.mubr.f32.vlgmr.msra.gmra.mrb[84].mxu1 %v1994_v13  ;;  %v1077_v13 = vld [vmem:[%s14312_s8 + $0x17f8] sm:$0x3]  ;;  %v2047_v43 = vcombine.high %v2045_v35, %v2045_v35 }
 0x27e   : > { %13574 = vmatpush1.bf16.xpose.msra.mxu1 %v13573_v46  ;;  %8833 = vmatprep.subr.mxu0 %v1071_v47  ;;  %v789_v46 = vld [vmem:[%s14312_s8 + $0xef8] sm:$0xff] }
 0x27f   : > { %8903 = vmatprep.subr.mxu1 %v1073_v49  ;;  %8893 = vmatprep.mubr.f32.mxu0 %v2012_v48  ;;  %v497_v47 = vld [vmem:[%s14312_s8 + $0x5d8] sm:$0xff]  ;;  %v791_v48 = vld [vmem:[%s14312_s8 + $0xf08] sm:$0xff]  ;;  %v2048_v49 = vcombine.high %v282_v44, %v282_v44 }
 0x280   : > { %8963 = vmatprep.mubr.f32.mxu1 %v2013_v50  ;;  %v1078_v50 = vld [vmem:[%s14312_s8 + $0x1800] sm:$0x3]  ;;  %v13595_v56 = vpack.c.bf16 %v791_v48, %v497_v47  ;;  %v1088_v48 = vld [vmem:[%s14312_s8 + $0x1850] sm:$0x3] }
 0x283   : > { %v6375_v61 = vpop.f32.mrb[50].mxu0 }
 0x284   : > { %v6376_v3 = vadd.f32 %v6375_v61, %v6306_v45  ;;  %v6377_v4 = vpop.f32.mrb[51].mxu0  ;;  %v6445_v5 = vpop.f32.mrb[50].mxu1  ;;  %v495_v45 = vld [vmem:[%s14312_s8 + $0x5c8] sm:$0xff] }
 0x285   : > { %8834 = vmatpush1.xpose.msra.mxu0 %v1070_v57  ;;  %v6447_v8 = vpop.f32.mrb[51].mxu1  ;;  %v13591_v51 = vpack.c.bf16 %v789_v46, %v495_v45  ;;  %v496_v57 = vld [vmem:[%s14312_s8 + $0x5d0] sm:$0xff]  ;;  %v1083_v4 = vld [vmem:[%s14312_s8 + $0x1828] sm:$0x3]  ;;  %v502_v45 = vld [vmem:[%s14312_s8 + $0x600] sm:$0xff] }
 0x286   : > { %v6446_v9 = vadd.f32 %v6445_v5, %v6376_v3  ;;  %8904 = vmatpush1.xpose.msra.mxu1 %v1072_v62  ;;  %13576 = vmatprep.subr.bf16.mxu0 %v13575_v58  ;;  %v790_v58 = vld [vmem:[%s14312_s8 + $0xf00] sm:$0xff]  ;;  %v2063_v5 = vcombine.high %v2055_v59, %v2055_v59  ;;  %v796_v46 = vld [vmem:[%s14312_s8 + $0xf30] sm:$0xff] }
 0x287   : > { %13580 = vmatprep.subr.bf16.mxu1 %v13579_v63  ;;  %v2062_v63 = vrot.slane %v2048_v49, %v14335_v21  ;;  %v13597_v3 = vpack.c.bf16 %v790_v58, %v496_v57  ;;  %v283_v8 = vld [vmem:[%s14305_s10 + $0x178] sm:$0xff]  ;;  %v13609_v57 = vpack.c.bf16 %v796_v46, %v502_v45 }
 0x288   : > { %8894 = vmatmul.mubr.f32.vlgmr.msra.gmra.mrb[86].mxu0 %v2004_v38  ;;  %v2072_v24 = vrot.slane %v283_v8, %v14335_v21 }
 0x289   : > { %13578 = vmatpush1.bf16.xpose.msra.mxu0 %v13577_v7  ;;  %8964 = vmatmul.mubr.f32.vlgmr.msra.gmra.mrb[86].mxu1 %v2011_v42  ;;  %v1081_v42 = vld [vmem:[%s14312_s8 + $0x1818] sm:$0x3]  ;;  %v2064_v7 = vcombine.high %v2062_v63, %v2062_v63 }
 0x28a   : > { %13582 = vmatpush1.bf16.xpose.msra.mxu1 %v13581_v10  ;;  %8973 = vmatprep.subr.mxu0 %v1075_v11  ;;  %v793_v10 = vld [vmem:[%s14312_s8 + $0xf18] sm:$0xff] }
 0x28b   : > { %9043 = vmatprep.subr.mxu1 %v1077_v13  ;;  %9033 = vmatprep.mubr.f32.mxu0 %v2029_v12  ;;  %v501_v11 = vld [vmem:[%s14312_s8 + $0x5f8] sm:$0xff]  ;;  %v795_v12 = vld [vmem:[%s14312_s8 + $0xf28] sm:$0xff]  ;;  %v2065_v13 = vcombine.high %v283_v8, %v283_v8 }
 0x28c   : > { %9103 = vmatprep.mubr.f32.mxu1 %v2030_v14  ;;  %v1082_v14 = vld [vmem:[%s14312_s8 + $0x1820] sm:$0x3]  ;;  %v13603_v20 = vpack.c.bf16 %v795_v12, %v501_v11  ;;  %v1092_v12 = vld [vmem:[%s14312_s8 + $0x1870] sm:$0x3] }
 0x28f   : > { %v6515_v26 = vpop.f32.mrb[52].mxu0 }
 0x290   : > { %v6516_v32 = vadd.f32 %v6515_v26, %v6446_v9  ;;  %v6517_v33 = vpop.f32.mrb[53].mxu0  ;;  %v6585_v34 = vpop.f32.mrb[52].mxu1  ;;  %v499_v9 = vld [vmem:[%s14312_s8 + $0x5e8] sm:$0xff] }
 0x291   : > { %8974 = vmatpush1.xpose.msra.mxu0 %v1074_v22  ;;  %v6587_v37 = vpop.f32.mrb[53].mxu1  ;;  %v13599_v15 = vpack.c.bf16 %v793_v10, %v499_v9  ;;  %v500_v22 = vld [vmem:[%s14312_s8 + $0x5f0] sm:$0xff]  ;;  %v1087_v33 = vld [vmem:[%s14312_s8 + $0x1848] sm:$0x3]  ;;  %v506_v9 = vld [vmem:[%s14312_s8 + $0x620] sm:$0xff] }
 0x292   : > { %v6586_v38 = vadd.f32 %v6585_v34, %v6516_v32  ;;  %9044 = vmatpush1.xpose.msra.mxu1 %v1076_v27  ;;  %13584 = vmatprep.subr.bf16.mxu0 %v13583_v23  ;;  %v794_v23 = vld [vmem:[%s14312_s8 + $0xf20] sm:$0xff]  ;;  %v2080_v34 = vcombine.high %v2072_v24, %v2072_v24  ;;  %v800_v10 = vld [vmem:[%s14312_s8 + $0xf50] sm:$0xff] }
 0x293   : > { %13588 = vmatprep.subr.bf16.mxu1 %v13587_v28  ;;  %v2079_v28 = vrot.slane %v2065_v13, %v14335_v21  ;;  %v13605_v32 = vpack.c.bf16 %v794_v23, %v500_v22  ;;  %v284_v37 = vld [vmem:[%s14305_s10 + $0x180] sm:$0xff]  ;;  %v13617_v22 = vpack.c.bf16 %v800_v10, %v506_v9 }
 0x294   : > { %9034 = vmatmul.mubr.f32.vlgmr.msra.gmra.mrb[88].mxu0 %v2021_v2  ;;  %v2089_v52 = vrot.slane %v284_v37, %v14335_v21 }
 0x295   : > { %13586 = vmatpush1.bf16.xpose.msra.mxu0 %v13585_v36  ;;  %9104 = vmatmul.mubr.f32.vlgmr.msra.gmra.mrb[88].mxu1 %v2028_v6  ;;  %v1085_v6 = vld [vmem:[%s14312_s8 + $0x1838] sm:$0x3]  ;;  %v2081_v36 = vcombine.high %v2079_v28, %v2079_v28 }
 0x296   : > { %13590 = vmatpush1.bf16.xpose.msra.mxu1 %v13589_v39  ;;  %9113 = vmatprep.subr.mxu0 %v1079_v40  ;;  %v797_v39 = vld [vmem:[%s14312_s8 + $0xf38] sm:$0xff] }
 0x297   : > { %9183 = vmatprep.subr.mxu1 %v1081_v42  ;;  %9173 = vmatprep.mubr.f32.mxu0 %v2046_v41  ;;  %v505_v40 = vld [vmem:[%s14312_s8 + $0x618] sm:$0xff]  ;;  %v799_v41 = vld [vmem:[%s14312_s8 + $0xf48] sm:$0xff]  ;;  %v2082_v42 = vcombine.high %v284_v37, %v284_v37 }
 0x298   : > { %9243 = vmatprep.mubr.f32.mxu1 %v2047_v43  ;;  %v1086_v43 = vld [vmem:[%s14312_s8 + $0x1840] sm:$0x3]  ;;  %v13611_v49 = vpack.c.bf16 %v799_v41, %v505_v40  ;;  %v1096_v41 = vld [vmem:[%s14312_s8 + $0x1890] sm:$0x3] }
 0x29b   : > { %v6655_v54 = vpop.f32.mrb[54].mxu0 }
 0x29c   : > { %v6656_v60 = vadd.f32 %v6655_v54, %v6586_v38  ;;  %v6657_v61 = vpop.f32.mrb[55].mxu0  ;;  %v6725_v62 = vpop.f32.mrb[54].mxu1  ;;  %v503_v38 = vld [vmem:[%s14312_s8 + $0x608] sm:$0xff] }
 0x29d   : > { %9114 = vmatpush1.xpose.msra.mxu0 %v1078_v50  ;;  %v6727_v1 = vpop.f32.mrb[55].mxu1  ;;  %v13607_v44 = vpack.c.bf16 %v797_v39, %v503_v38  ;;  %v504_v50 = vld [vmem:[%s14312_s8 + $0x610] sm:$0xff]  ;;  %v1091_v61 = vld [vmem:[%s14312_s8 + $0x1868] sm:$0x3]  ;;  %v510_v38 = vld [vmem:[%s14312_s8 + $0x640] sm:$0xff] }
 0x29e   : > { %v6726_v2 = vadd.f32 %v6725_v62, %v6656_v60  ;;  %9184 = vmatpush1.xpose.msra.mxu1 %v1080_v55  ;;  %13592 = vmatprep.subr.bf16.mxu0 %v13591_v51  ;;  %v798_v51 = vld [vmem:[%s14312_s8 + $0xf40] sm:$0xff]  ;;  %v2097_v62 = vcombine.high %v2089_v52, %v2089_v52  ;;  %v285_v1 = vld [vmem:[%s14305_s10 + $0x188] sm:$0xff] }
 0x29f   : > { %13596 = vmatprep.subr.bf16.mxu1 %v13595_v56  ;;  %v2096_v56 = vrot.slane %v2082_v42, %v14335_v21  ;;  %v13613_v60 = vpack.c.bf16 %v798_v51, %v504_v50  ;;  %v2106_v16 = vrot.slane %v285_v1, %v14335_v21  ;;  %v804_v39 = vld [vmem:[%s14312_s8 + $0xf70] sm:$0xff] }
 0x2a0   : > { %9174 = vmatmul.mubr.f32.vlgmr.msra.gmra.mrb[90].mxu0 %v2038_v31  ;;  %v13625_v50 = vpack.c.bf16 %v804_v39, %v510_v38 }
 0x2a1   : > { %13594 = vmatpush1.bf16.xpose.msra.mxu0 %v13593_v0  ;;  %9244 = vmatmul.mubr.f32.vlgmr.msra.gmra.mrb[90].mxu1 %v2045_v35  ;;  %v1089_v35 = vld [vmem:[%s14312_s8 + $0x1858] sm:$0x3]  ;;  %v2098_v0 = vcombine.high %v2096_v56, %v2096_v56 }
 0x2a2   : > { %13598 = vmatpush1.bf16.xpose.msra.mxu1 %v13597_v3  ;;  %9253 = vmatprep.subr.mxu0 %v1083_v4  ;;  %v801_v3 = vld [vmem:[%s14312_s8 + $0xf58] sm:$0xff] }
 0x2a3   : > { %9323 = vmatprep.subr.mxu1 %v1085_v6  ;;  %9313 = vmatprep.mubr.f32.mxu0 %v2063_v5  ;;  %v509_v4 = vld [vmem:[%s14312_s8 + $0x638] sm:$0xff]  ;;  %v803_v5 = vld [vmem:[%s14312_s8 + $0xf68] sm:$0xff]  ;;  %v2099_v6 = vcombine.high %v285_v1, %v285_v1 }
 0x2a4   : > { %9383 = vmatprep.mubr.f32.mxu1 %v2064_v7  ;;  %v1090_v7 = vld [vmem:[%s14312_s8 + $0x1860] sm:$0x3]  ;;  %v13619_v13 = vpack.c.bf16 %v803_v5, %v509_v4  ;;  %v1100_v5 = vld [vmem:[%s14312_s8 + $0x18b0] sm:$0x3] }
 0x2a7   : > { %v6795_v18 = vpop.f32.mrb[56].mxu0 }
 0x2a8   : > { %v6796_v25 = vadd.f32 %v6795_v18, %v6726_v2  ;;  %v6797_v26 = vpop.f32.mrb[57].mxu0  ;;  %v6865_v27 = vpop.f32.mrb[56].mxu1  ;;  %v507_v2 = vld [vmem:[%s14312_s8 + $0x628] sm:$0xff] }
 0x2a9   : > { %9254 = vmatpush1.xpose.msra.mxu0 %v1082_v14  ;;  %v6867_v30 = vpop.f32.mrb[57].mxu1  ;;  %v13615_v8 = vpack.c.bf16 %v801_v3, %v507_v2  ;;  %v508_v14 = vld [vmem:[%s14312_s8 + $0x630] sm:$0xff]  ;;  %v1095_v26 = vld [vmem:[%s14312_s8 + $0x1888] sm:$0x3]  ;;  %v514_v2 = vld [vmem:[%s14312_s8 + $0x660] sm:$0xff] }
 0x2aa   : > { %v6866_v31 = vadd.f32 %v6865_v27, %v6796_v25  ;;  %9324 = vmatpush1.xpose.msra.mxu1 %v1084_v19  ;;  %13600 = vmatprep.subr.bf16.mxu0 %v13599_v15  ;;  %v802_v15 = vld [vmem:[%s14312_s8 + $0xf60] sm:$0xff]  ;;  %v2114_v27 = vcombine.high %v2106_v16, %v2106_v16  ;;  %v286_v30 = vld [vmem:[%s14305_s10 + $0x190] sm:$0xff] }
 0x2ab   : > { %13604 = vmatprep.subr.bf16.mxu1 %v13603_v20  ;;  %v2113_v20 = vrot.slane %v2099_v6, %v14335_v21  ;;  %v13621_v25 = vpack.c.bf16 %v802_v15, %v508_v14  ;;  %v2123_v45 = vrot.slane %v286_v30, %v14335_v21  ;;  %v808_v3 = vld [vmem:[%s14312_s8 + $0xf90] sm:$0xff] }
 0x2ac   : > { %9314 = vmatmul.mubr.f32.vlgmr.msra.gmra.mrb[92].mxu0 %v2055_v59  ;;  %v13633_v14 = vpack.c.bf16 %v808_v3, %v514_v2 }
 0x2ad   : > { %13602 = vmatpush1.bf16.xpose.msra.mxu0 %v13601_v29  ;;  %9384 = vmatmul.mubr.f32.vlgmr.msra.gmra.mrb[92].mxu1 %v2062_v63  ;;  %v1093_v63 = vld [vmem:[%s14312_s8 + $0x1878] sm:$0x3]  ;;  %v2115_v29 = vcombine.high %v2113_v20, %v2113_v20 }
 0x2ae   : > { %13606 = vmatpush1.bf16.xpose.msra.mxu1 %v13605_v32  ;;  %9393 = vmatprep.subr.mxu0 %v1087_v33  ;;  %v805_v32 = vld [vmem:[%s14312_s8 + $0xf78] sm:$0xff] }
 0x2af   : > { %9463 = vmatprep.subr.mxu1 %v1089_v35  ;;  %9453 = vmatprep.mubr.f32.mxu0 %v2080_v34  ;;  %v513_v33 = vld [vmem:[%s14312_s8 + $0x658] sm:$0xff]  ;;  %v807_v34 = vld [vmem:[%s14312_s8 + $0xf88] sm:$0xff]  ;;  %v2116_v35 = vcombine.high %v286_v30, %v286_v30 }
 0x2b0   : > { %9523 = vmatprep.mubr.f32.mxu1 %v2081_v36  ;;  %v1094_v36 = vld [vmem:[%s14312_s8 + $0x1880] sm:$0x3]  ;;  %v13627_v42 = vpack.c.bf16 %v807_v34, %v513_v33  ;;  %v1104_v34 = vld [vmem:[%s14312_s8 + $0x18d0] sm:$0x3] }
 0x2b3   : > { %v6935_v47 = vpop.f32.mrb[58].mxu0 }
 0x2b4   : > { %v6936_v53 = vadd.f32 %v6935_v47, %v6866_v31  ;;  %v6937_v54 = vpop.f32.mrb[59].mxu0  ;;  %v7005_v55 = vpop.f32.mrb[58].mxu1  ;;  %v511_v31 = vld [vmem:[%s14312_s8 + $0x648] sm:$0xff] }
 0x2b5   : > { %9394 = vmatpush1.xpose.msra.mxu0 %v1086_v43  ;;  %v7007_v58 = vpop.f32.mrb[59].mxu1  ;;  %v13623_v37 = vpack.c.bf16 %v805_v32, %v511_v31  ;;  %v512_v43 = vld [vmem:[%s14312_s8 + $0x650] sm:$0xff]  ;;  %v1099_v54 = vld [vmem:[%s14312_s8 + $0x18a8] sm:$0x3]  ;;  %v518_v31 = vld [vmem:[%s14312_s8 + $0x680] sm:$0xff] }
 0x2b6   : > { %v7006_v59 = vadd.f32 %v7005_v55, %v6936_v53  ;;  %9464 = vmatpush1.xpose.msra.mxu1 %v1088_v48  ;;  %13608 = vmatprep.subr.bf16.mxu0 %v13607_v44  ;;  %v806_v44 = vld [vmem:[%s14312_s8 + $0xf80] sm:$0xff]  ;;  %v2131_v55 = vcombine.high %v2123_v45, %v2123_v45  ;;  %v812_v32 = vld [vmem:[%s14312_s8 + $0xfb0] sm:$0xff] }
 0x2b7   : > { %13612 = vmatprep.subr.bf16.mxu1 %v13611_v49  ;;  %v2130_v49 = vrot.slane %v2116_v35, %v14335_v21  ;;  %v13629_v53 = vpack.c.bf16 %v806_v44, %v512_v43  ;;  %v287_v58 = vld [vmem:[%s14305_s10 + $0x198] sm:$0xff]  ;;  %v13641_v43 = vpack.c.bf16 %v812_v32, %v518_v31 }
 0x2b8   : > { %9454 = vmatmul.mubr.f32.vlgmr.msra.gmra.mrb[94].mxu0 %v2072_v24  ;;  %v2140_v9 = vrot.slane %v287_v58, %v14335_v21 }
 0x2b9   : > { %13610 = vmatpush1.bf16.xpose.msra.mxu0 %v13609_v57  ;;  %9524 = vmatmul.mubr.f32.vlgmr.msra.gmra.mrb[94].mxu1 %v2079_v28  ;;  %v1097_v28 = vld [vmem:[%s14312_s8 + $0x1898] sm:$0x3]  ;;  %v2132_v57 = vcombine.high %v2130_v49, %v2130_v49 }
 0x2ba   : > { %13614 = vmatpush1.bf16.xpose.msra.mxu1 %v13613_v60  ;;  %9533 = vmatprep.subr.mxu0 %v1091_v61  ;;  %v809_v60 = vld [vmem:[%s14312_s8 + $0xf98] sm:$0xff] }
 0x2bb   : > { %9603 = vmatprep.subr.mxu1 %v1093_v63  ;;  %9593 = vmatprep.mubr.f32.mxu0 %v2097_v62  ;;  %v517_v61 = vld [vmem:[%s14312_s8 + $0x678] sm:$0xff]  ;;  %v811_v62 = vld [vmem:[%s14312_s8 + $0xfa8] sm:$0xff]  ;;  %v2133_v63 = vcombine.high %v287_v58, %v287_v58 }
 0x2bc   : > { %9663 = vmatprep.mubr.f32.mxu1 %v2098_v0  ;;  %v1098_v0 = vld [vmem:[%s14312_s8 + $0x18a0] sm:$0x3]  ;;  %v13635_v6 = vpack.c.bf16 %v811_v62, %v517_v61  ;;  %v1108_v62 = vld [vmem:[%s14312_s8 + $0x18f0] sm:$0x3] }
 0x2bf   : > { %v7075_v11 = vpop.f32.mrb[60].mxu0 }
 0x2c0   : > { %v7076_v17 = vadd.f32 %v7075_v11, %v7006_v59  ;;  %v7077_v18 = vpop.f32.mrb[61].mxu0  ;;  %v7145_v19 = vpop.f32.mrb[60].mxu1  ;;  %v515_v59 = vld [vmem:[%s14312_s8 + $0x668] sm:$0xff] }
 0x2c1   : > { %9534 = vmatpush1.xpose.msra.mxu0 %v1090_v7  ;;  %v7147_v23 = vpop.f32.mrb[61].mxu1  ;;  %v13631_v1 = vpack.c.bf16 %v809_v60, %v515_v59  ;;  %v516_v7 = vld [vmem:[%s14312_s8 + $0x670] sm:$0xff]  ;;  %v1103_v18 = vld [vmem:[%s14312_s8 + $0x18c8] sm:$0x3]  ;;  %v522_v59 = vld [vmem:[%s14312_s8 + $0x6a0] sm:$0xff] }
 0x2c2   : > { %v7146_v24 = vadd.f32 %v7145_v19, %v7076_v17  ;;  %9604 = vmatpush1.xpose.msra.mxu1 %v1092_v12  ;;  %13616 = vmatprep.subr.bf16.mxu0 %v13615_v8  ;;  %v810_v8 = vld [vmem:[%s14312_s8 + $0xfa0] sm:$0xff]  ;;  %v2148_v19 = vcombine.high %v2140_v9, %v2140_v9  ;;  %v816_v60 = vld [vmem:[%s14312_s8 + $0xfd0] sm:$0xff] }
 0x2c3   : > { %13620 = vmatprep.subr.bf16.mxu1 %v13619_v13  ;;  %v2147_v13 = vrot.slane %v2133_v63, %v14335_v21  ;;  %v13637_v17 = vpack.c.bf16 %v810_v8, %v516_v7  ;;  %v288_v23 = vld [vmem:[%s14305_s10 + $0x1a0] sm:$0xff]  ;;  %v13649_v7 = vpack.c.bf16 %v816_v60, %v522_v59 }
 0x2c4   : > { %9594 = vmatmul.mubr.f32.vlgmr.msra.gmra.mrb[96].mxu0 %v2089_v52  ;;  %v2157_v38 = vrot.slane %v288_v23, %v14335_v21 }
 0x2c5   : > { %13618 = vmatpush1.bf16.xpose.msra.mxu0 %v13617_v22  ;;  %9664 = vmatmul.mubr.f32.vlgmr.msra.gmra.mrb[96].mxu1 %v2096_v56  ;;  %v1101_v56 = vld [vmem:[%s14312_s8 + $0x18b8] sm:$0x3]  ;;  %v2149_v22 = vcombine.high %v2147_v13, %v2147_v13 }
 0x2c6   : > { %13622 = vmatpush1.bf16.xpose.msra.mxu1 %v13621_v25  ;;  %9673 = vmatprep.subr.mxu0 %v1095_v26  ;;  %v813_v25 = vld [vmem:[%s14312_s8 + $0xfb8] sm:$0xff] }
 0x2c7   : > { %9743 = vmatprep.subr.mxu1 %v1097_v28  ;;  %9733 = vmatprep.mubr.f32.mxu0 %v2114_v27  ;;  %v521_v26 = vld [vmem:[%s14312_s8 + $0x698] sm:$0xff]  ;;  %v815_v27 = vld [vmem:[%s14312_s8 + $0xfc8] sm:$0xff]  ;;  %v2150_v28 = vcombine.high %v288_v23, %v288_v23 }
 0x2c8   : > { %9803 = vmatprep.mubr.f32.mxu1 %v2115_v29  ;;  %v1102_v29 = vld [vmem:[%s14312_s8 + $0x18c0] sm:$0x3]  ;;  %v13643_v35 = vpack.c.bf16 %v815_v27, %v521_v26  ;;  %v1112_v27 = vld [vmem:[%s14312_s8 + $0x1910] sm:$0x3] }
 0x2cb   : > { %v7215_v40 = vpop.f32.mrb[62].mxu0 }
 0x2cc   : > { %v7216_v46 = vadd.f32 %v7215_v40, %v7146_v24  ;;  %v7217_v47 = vpop.f32.mrb[63].mxu0  ;;  %v7285_v48 = vpop.f32.mrb[62].mxu1  ;;  %v519_v24 = vld [vmem:[%s14312_s8 + $0x688] sm:$0xff] }
 0x2cd   : > { %9674 = vmatpush1.xpose.msra.mxu0 %v1094_v36  ;;  %v7287_v51 = vpop.f32.mrb[63].mxu1  ;;  %v13639_v30 = vpack.c.bf16 %v813_v25, %v519_v24  ;;  %v520_v36 = vld [vmem:[%s14312_s8 + $0x690] sm:$0xff]  ;;  %v1107_v47 = vld [vmem:[%s14312_s8 + $0x18e8] sm:$0x3]  ;;  %v526_v24 = vld [vmem:[%s14312_s8 + $0x6c0] sm:$0xff] }
 0x2ce   : > { %v7286_v52 = vadd.f32 %v7285_v48, %v7216_v46  ;;  %9744 = vmatpush1.xpose.msra.mxu1 %v1096_v41  ;;  %13624 = vmatprep.subr.bf16.mxu0 %v13623_v37  ;;  %v814_v37 = vld [vmem:[%s14312_s8 + $0xfc0] sm:$0xff]  ;;  %v2165_v48 = vcombine.high %v2157_v38, %v2157_v38  ;;  %v289_v51 = vld [vmem:[%s14305_s10 + $0x1a8] sm:$0xff] }
 0x2cf   : > { %13628 = vmatprep.subr.bf16.mxu1 %v13627_v42  ;;  %v2164_v42 = vrot.slane %v2150_v28, %v14335_v21  ;;  %v13645_v46 = vpack.c.bf16 %v814_v37, %v520_v36  ;;  %v2174_v2 = vrot.slane %v289_v51, %v14335_v21  ;;  %v820_v25 = vld [vmem:[%s14312_s8 + $0xff0] sm:$0xff] }
 0x2d0   : > { %9734 = vmatmul.mubr.f32.vlgmr.msra.gmra.mrb[98].mxu0 %v2106_v16  ;;  %v13657_v36 = vpack.c.bf16 %v820_v25, %v526_v24 }
 0x2d1   : > { %13626 = vmatpush1.bf16.xpose.msra.mxu0 %v13625_v50  ;;  %9804 = vmatmul.mubr.f32.vlgmr.msra.gmra.mrb[98].mxu1 %v2113_v20  ;;  %v1105_v20 = vld [vmem:[%s14312_s8 + $0x18d8] sm:$0x3]  ;;  %v2166_v50 = vcombine.high %v2164_v42, %v2164_v42 }
 0x2d2   : > { %13630 = vmatpush1.bf16.xpose.msra.mxu1 %v13629_v53  ;;  %9813 = vmatprep.subr.mxu0 %v1099_v54  ;;  %v817_v53 = vld [vmem:[%s14312_s8 + $0xfd8] sm:$0xff] }
 0x2d3   : > { %9883 = vmatprep.subr.mxu1 %v1101_v56  ;;  %9873 = vmatprep.mubr.f32.mxu0 %v2131_v55  ;;  %v525_v54 = vld [vmem:[%s14312_s8 + $0x6b8] sm:$0xff]  ;;  %v819_v55 = vld [vmem:[%s14312_s8 + $0xfe8] sm:$0xff]  ;;  %v2167_v56 = vcombine.high %v289_v51, %v289_v51 }
 0x2d4   : > { %9943 = vmatprep.mubr.f32.mxu1 %v2132_v57  ;;  %v1106_v57 = vld [vmem:[%s14312_s8 + $0x18e0] sm:$0x3]  ;;  %v13651_v63 = vpack.c.bf16 %v819_v55, %v525_v54  ;;  %v1116_v55 = vld [vmem:[%s14312_s8 + $0x1930] sm:$0x3] }
 0x2d7   : > { %v7355_v4 = vpop.f32.mrb[64].mxu0 }
 0x2d8   : > { %v7356_v10 = vadd.f32 %v7355_v4, %v7286_v52  ;;  %v7357_v11 = vpop.f32.mrb[65].mxu0  ;;  %v7425_v12 = vpop.f32.mrb[64].mxu1  ;;  %v523_v52 = vld [vmem:[%s14312_s8 + $0x6a8] sm:$0xff] }
 0x2d9   : > { %9814 = vmatpush1.xpose.msra.mxu0 %v1098_v0  ;;  %v7427_v15 = vpop.f32.mrb[65].mxu1  ;;  %v13647_v58 = vpack.c.bf16 %v817_v53, %v523_v52  ;;  %v524_v0 = vld [vmem:[%s14312_s8 + $0x6b0] sm:$0xff]  ;;  %v1111_v11 = vld [vmem:[%s14312_s8 + $0x1908] sm:$0x3]  ;;  %v530_v52 = vld [vmem:[%s14312_s8 + $0x6e0] sm:$0xff] }
 0x2da   : > { %v7426_v16 = vadd.f32 %v7425_v12, %v7356_v10  ;;  %9884 = vmatpush1.xpose.msra.mxu1 %v1100_v5  ;;  %13632 = vmatprep.subr.bf16.mxu0 %v13631_v1  ;;  %v818_v1 = vld [vmem:[%s14312_s8 + $0xfe0] sm:$0xff]  ;;  %v2182_v12 = vcombine.high %v2174_v2, %v2174_v2  ;;  %v290_v15 = vld [vmem:[%s14305_s10 + $0x1b0] sm:$0xff] }
 0x2db   : > { %13636 = vmatprep.subr.bf16.mxu1 %v13635_v6  ;;  %v2181_v6 = vrot.slane %v2167_v56, %v14335_v21  ;;  %v13653_v10 = vpack.c.bf16 %v818_v1, %v524_v0  ;;  %v2191_v31 = vrot.slane %v290_v15, %v14335_v21  ;;  %v824_v53 = vld [vmem:[%s14312_s8 + $0x1010] sm:$0xff] }
 0x2dc   : > { %9874 = vmatmul.mubr.f32.vlgmr.msra.gmra.mrb[100].mxu0 %v2123_v45  ;;  %v13665_v0 = vpack.c.bf16 %v824_v53, %v530_v52 }
 0x2dd   : > { %13634 = vmatpush1.bf16.xpose.msra.mxu0 %v13633_v14  ;;  %9944 = vmatmul.mubr.f32.vlgmr.msra.gmra.mrb[100].mxu1 %v2130_v49  ;;  %v1109_v49 = vld [vmem:[%s14312_s8 + $0x18f8] sm:$0x3]  ;;  %v2183_v14 = vcombine.high %v2181_v6, %v2181_v6 }
 0x2de   : > { %13638 = vmatpush1.bf16.xpose.msra.mxu1 %v13637_v17  ;;  %9953 = vmatprep.subr.mxu0 %v1103_v18  ;;  %v821_v17 = vld [vmem:[%s14312_s8 + $0xff8] sm:$0xff] }
 0x2df   : > { %10023 = vmatprep.subr.mxu1 %v1105_v20  ;;  %10013 = vmatprep.mubr.f32.mxu0 %v2148_v19  ;;  %v529_v18 = vld [vmem:[%s14312_s8 + $0x6d8] sm:$0xff]  ;;  %v823_v19 = vld [vmem:[%s14312_s8 + $0x1008] sm:$0xff]  ;;  %v2184_v20 = vcombine.high %v290_v15, %v290_v15 }
 0x2e0   : > { %10083 = vmatprep.mubr.f32.mxu1 %v2149_v22  ;;  %v1110_v22 = vld [vmem:[%s14312_s8 + $0x1900] sm:$0x3]  ;;  %v13659_v28 = vpack.c.bf16 %v823_v19, %v529_v18  ;;  %v1120_v19 = vld [vmem:[%s14312_s8 + $0x1950] sm:$0x3] }
 0x2e3   : > { %v7495_v33 = vpop.f32.mrb[66].mxu0 }
 0x2e4   : > { %v7496_v39 = vadd.f32 %v7495_v33, %v7426_v16  ;;  %v7497_v40 = vpop.f32.mrb[67].mxu0  ;;  %v7565_v41 = vpop.f32.mrb[66].mxu1  ;;  %v527_v16 = vld [vmem:[%s14312_s8 + $0x6c8] sm:$0xff] }
 0x2e5   : > { %9954 = vmatpush1.xpose.msra.mxu0 %v1102_v29  ;;  %v7567_v44 = vpop.f32.mrb[67].mxu1  ;;  %v13655_v23 = vpack.c.bf16 %v821_v17, %v527_v16  ;;  %v528_v29 = vld [vmem:[%s14312_s8 + $0x6d0] sm:$0xff]  ;;  %v1115_v40 = vld [vmem:[%s14312_s8 + $0x1928] sm:$0x3]  ;;  %v534_v16 = vld [vmem:[%s14312_s8 + $0x700] sm:$0xff] }
 0x2e6   : > { %v7566_v45 = vadd.f32 %v7565_v41, %v7496_v39  ;;  %10024 = vmatpush1.xpose.msra.mxu1 %v1104_v34  ;;  %13640 = vmatprep.subr.bf16.mxu0 %v13639_v30  ;;  %v822_v30 = vld [vmem:[%s14312_s8 + $0x1000] sm:$0xff]  ;;  %v2199_v41 = vcombine.high %v2191_v31, %v2191_v31  ;;  %v828_v17 = vld [vmem:[%s14312_s8 + $0x1030] sm:$0xff] }
 0x2e7   : > { %13644 = vmatprep.subr.bf16.mxu1 %v13643_v35  ;;  %v2198_v35 = vrot.slane %v2184_v20, %v14335_v21  ;;  %v13661_v39 = vpack.c.bf16 %v822_v30, %v528_v29  ;;  %v291_v44 = vld [vmem:[%s14305_s10 + $0x1b8] sm:$0xff]  ;;  %v13673_v29 = vpack.c.bf16 %v828_v17, %v534_v16 }
 0x2e8   : > { %10014 = vmatmul.mubr.f32.vlgmr.msra.gmra.mrb[102].mxu0 %v2140_v9  ;;  %v2208_v59 = vrot.slane %v291_v44, %v14335_v21 }
 0x2e9   : > { %13642 = vmatpush1.bf16.xpose.msra.mxu0 %v13641_v43  ;;  %10084 = vmatmul.mubr.f32.vlgmr.msra.gmra.mrb[102].mxu1 %v2147_v13  ;;  %v1113_v13 = vld [vmem:[%s14312_s8 + $0x1918] sm:$0x3]  ;;  %v2200_v43 = vcombine.high %v2198_v35, %v2198_v35 }
 0x2ea   : > { %13646 = vmatpush1.bf16.xpose.msra.mxu1 %v13645_v46  ;;  %10093 = vmatprep.subr.mxu0 %v1107_v47  ;;  %v825_v46 = vld [vmem:[%s14312_s8 + $0x1018] sm:$0xff] }
 0x2eb   : > { %10163 = vmatprep.subr.mxu1 %v1109_v49  ;;  %10153 = vmatprep.mubr.f32.mxu0 %v2165_v48  ;;  %v533_v47 = vld [vmem:[%s14312_s8 + $0x6f8] sm:$0xff]  ;;  %v827_v48 = vld [vmem:[%s14312_s8 + $0x1028] sm:$0xff]  ;;  %v2201_v49 = vcombine.high %v291_v44, %v291_v44 }
 0x2ec   : > { %10223 = vmatprep.mubr.f32.mxu1 %v2166_v50  ;;  %v1114_v50 = vld [vmem:[%s14312_s8 + $0x1920] sm:$0x3]  ;;  %v13667_v56 = vpack.c.bf16 %v827_v48, %v533_v47  ;;  %v1124_v48 = vld [vmem:[%s14312_s8 + $0x1970] sm:$0x3] }
 0x2ef   : > { %v7635_v61 = vpop.f32.mrb[68].mxu0 }
 0x2f0   : > { %v7636_v3 = vadd.f32 %v7635_v61, %v7566_v45  ;;  %v7637_v4 = vpop.f32.mrb[69].mxu0  ;;  %v7705_v5 = vpop.f32.mrb[68].mxu1  ;;  %v531_v45 = vld [vmem:[%s14312_s8 + $0x6e8] sm:$0xff] }
 0x2f1   : > { %10094 = vmatpush1.xpose.msra.mxu0 %v1106_v57  ;;  %v7707_v8 = vpop.f32.mrb[69].mxu1  ;;  %v13663_v51 = vpack.c.bf16 %v825_v46, %v531_v45  ;;  %v532_v57 = vld [vmem:[%s14312_s8 + $0x6f0] sm:$0xff]  ;;  %v1119_v4 = vld [vmem:[%s14312_s8 + $0x1948] sm:$0x3]  ;;  %v538_v45 = vld [vmem:[%s14312_s8 + $0x720] sm:$0xff] }
 0x2f2   : > { %v7706_v9 = vadd.f32 %v7705_v5, %v7636_v3  ;;  %10164 = vmatpush1.xpose.msra.mxu1 %v1108_v62  ;;  %13648 = vmatprep.subr.bf16.mxu0 %v13647_v58  ;;  %v826_v58 = vld [vmem:[%s14312_s8 + $0x1020] sm:$0xff]  ;;  %v2216_v5 = vcombine.high %v2208_v59, %v2208_v59  ;;  %v832_v46 = vld [vmem:[%s14312_s8 + $0x1050] sm:$0xff] }
 0x2f3   : > { %13652 = vmatprep.subr.bf16.mxu1 %v13651_v63  ;;  %v2215_v63 = vrot.slane %v2201_v49, %v14335_v21  ;;  %v13669_v3 = vpack.c.bf16 %v826_v58, %v532_v57  ;;  %v292_v8 = vld [vmem:[%s14305_s10 + $0x1c0] sm:$0xff]  ;;  %v13681_v57 = vpack.c.bf16 %v832_v46, %v538_v45 }
 0x2f4   : > { %10154 = vmatmul.mubr.f32.vlgmr.msra.gmra.mrb[104].mxu0 %v2157_v38  ;;  %v2225_v24 = vrot.slane %v292_v8, %v14335_v21 }
 0x2f5   : > { %13650 = vmatpush1.bf16.xpose.msra.mxu0 %v13649_v7  ;;  %10224 = vmatmul.mubr.f32.vlgmr.msra.gmra.mrb[104].mxu1 %v2164_v42  ;;  %v1117_v42 = vld [vmem:[%s14312_s8 + $0x1938] sm:$0x3]  ;;  %v2217_v7 = vcombine.high %v2215_v63, %v2215_v63 }
 0x2f6   : > { %13654 = vmatpush1.bf16.xpose.msra.mxu1 %v13653_v10  ;;  %10233 = vmatprep.subr.mxu0 %v1111_v11  ;;  %v829_v10 = vld [vmem:[%s14312_s8 + $0x1038] sm:$0xff] }
 0x2f7   : > { %10303 = vmatprep.subr.mxu1 %v1113_v13  ;;  %10293 = vmatprep.mubr.f32.mxu0 %v2182_v12  ;;  %v537_v11 = vld [vmem:[%s14312_s8 + $0x718] sm:$0xff]  ;;  %v831_v12 = vld [vmem:[%s14312_s8 + $0x1048] sm:$0xff]  ;;  %v2218_v13 = vcombine.high %v292_v8, %v292_v8 }
 0x2f8   : > { %10363 = vmatprep.mubr.f32.mxu1 %v2183_v14  ;;  %v1118_v14 = vld [vmem:[%s14312_s8 + $0x1940] sm:$0x3]  ;;  %v13675_v20 = vpack.c.bf16 %v831_v12, %v537_v11  ;;  %v1128_v12 = vld [vmem:[%s14312_s8 + $0x1990] sm:$0x3] }
 0x2fb   : > { %v7775_v26 = vpop.f32.mrb[70].mxu0 }
 0x2fc   : > { %v7776_v32 = vadd.f32 %v7775_v26, %v7706_v9  ;;  %v7777_v33 = vpop.f32.mrb[71].mxu0  ;;  %v7845_v34 = vpop.f32.mrb[70].mxu1  ;;  %v535_v9 = vld [vmem:[%s14312_s8 + $0x708] sm:$0xff] }
 0x2fd   : > { %10234 = vmatpush1.xpose.msra.mxu0 %v1110_v22  ;;  %v7847_v37 = vpop.f32.mrb[71].mxu1  ;;  %v13671_v15 = vpack.c.bf16 %v829_v10, %v535_v9  ;;  %v536_v22 = vld [vmem:[%s14312_s8 + $0x710] sm:$0xff]  ;;  %v1123_v33 = vld [vmem:[%s14312_s8 + $0x1968] sm:$0x3]  ;;  %v542_v9 = vld [vmem:[%s14312_s8 + $0x740] sm:$0xff] }
 0x2fe   : > { %v7846_v38 = vadd.f32 %v7845_v34, %v7776_v32  ;;  %10304 = vmatpush1.xpose.msra.mxu1 %v1112_v27  ;;  %13656 = vmatprep.subr.bf16.mxu0 %v13655_v23  ;;  %v830_v23 = vld [vmem:[%s14312_s8 + $0x1040] sm:$0xff]  ;;  %v2233_v34 = vcombine.high %v2225_v24, %v2225_v24  ;;  %v293_v37 = vld [vmem:[%s14305_s10 + $0x1c8] sm:$0xff] }
 0x2ff   : > { %13660 = vmatprep.subr.bf16.mxu1 %v13659_v28  ;;  %v2232_v28 = vrot.slane %v2218_v13, %v14335_v21  ;;  %v13677_v32 = vpack.c.bf16 %v830_v23, %v536_v22  ;;  %v2242_v52 = vrot.slane %v293_v37, %v14335_v21  ;;  %v836_v10 = vld [vmem:[%s14312_s8 + $0x1070] sm:$0xff] }
 0x300   : > { %10294 = vmatmul.mubr.f32.vlgmr.msra.gmra.mrb[106].mxu0 %v2174_v2  ;;  %v13689_v22 = vpack.c.bf16 %v836_v10, %v542_v9 }
 0x301   : > { %13658 = vmatpush1.bf16.xpose.msra.mxu0 %v13657_v36  ;;  %10364 = vmatmul.mubr.f32.vlgmr.msra.gmra.mrb[106].mxu1 %v2181_v6  ;;  %v1121_v6 = vld [vmem:[%s14312_s8 + $0x1958] sm:$0x3]  ;;  %v2234_v36 = vcombine.high %v2232_v28, %v2232_v28 }
 0x302   : > { %13662 = vmatpush1.bf16.xpose.msra.mxu1 %v13661_v39  ;;  %10373 = vmatprep.subr.mxu0 %v1115_v40  ;;  %v833_v39 = vld [vmem:[%s14312_s8 + $0x1058] sm:$0xff] }
 0x303   : > { %10443 = vmatprep.subr.mxu1 %v1117_v42  ;;  %10433 = vmatprep.mubr.f32.mxu0 %v2199_v41  ;;  %v541_v40 = vld [vmem:[%s14312_s8 + $0x738] sm:$0xff]  ;;  %v835_v41 = vld [vmem:[%s14312_s8 + $0x1068] sm:$0xff]  ;;  %v2235_v42 = vcombine.high %v293_v37, %v293_v37 }
 0x304   : > { %10503 = vmatprep.mubr.f32.mxu1 %v2200_v43  ;;  %v1122_v43 = vld [vmem:[%s14312_s8 + $0x1960] sm:$0x3]  ;;  %v13683_v49 = vpack.c.bf16 %v835_v41, %v541_v40  ;;  %v1132_v41 = vld [vmem:[%s14312_s8 + $0x19b0] sm:$0x3] }
 0x307   : > { %v7915_v54 = vpop.f32.mrb[72].mxu0 }
 0x308   : > { %v7916_v60 = vadd.f32 %v7915_v54, %v7846_v38  ;;  %v7917_v61 = vpop.f32.mrb[73].mxu0  ;;  %v7985_v62 = vpop.f32.mrb[72].mxu1  ;;  %v539_v38 = vld [vmem:[%s14312_s8 + $0x728] sm:$0xff] }
 0x309   : > { %10374 = vmatpush1.xpose.msra.mxu0 %v1114_v50  ;;  %v7987_v1 = vpop.f32.mrb[73].mxu1  ;;  %v13679_v44 = vpack.c.bf16 %v833_v39, %v539_v38  ;;  %v540_v50 = vld [vmem:[%s14312_s8 + $0x730] sm:$0xff]  ;;  %v1127_v61 = vld [vmem:[%s14312_s8 + $0x1988] sm:$0x3]  ;;  %v546_v38 = vld [vmem:[%s14312_s8 + $0x760] sm:$0xff] }
 0x30a   : > { %v7986_v2 = vadd.f32 %v7985_v62, %v7916_v60  ;;  %10444 = vmatpush1.xpose.msra.mxu1 %v1116_v55  ;;  %13664 = vmatprep.subr.bf16.mxu0 %v13663_v51  ;;  %v834_v51 = vld [vmem:[%s14312_s8 + $0x1060] sm:$0xff]  ;;  %v2250_v62 = vcombine.high %v2242_v52, %v2242_v52  ;;  %v294_v1 = vld [vmem:[%s14305_s10 + $0x1d0] sm:$0xff] }
 0x30b   : > { %13668 = vmatprep.subr.bf16.mxu1 %v13667_v56  ;;  %v2249_v56 = vrot.slane %v2235_v42, %v14335_v21  ;;  %v13685_v60 = vpack.c.bf16 %v834_v51, %v540_v50  ;;  %v2259_v16 = vrot.slane %v294_v1, %v14335_v21  ;;  %v840_v39 = vld [vmem:[%s14312_s8 + $0x1090] sm:$0xff] }
 0x30c   : > { %10434 = vmatmul.mubr.f32.vlgmr.msra.gmra.mrb[108].mxu0 %v2191_v31  ;;  %v13697_v50 = vpack.c.bf16 %v840_v39, %v546_v38 }
 0x30d   : > { %13666 = vmatpush1.bf16.xpose.msra.mxu0 %v13665_v0  ;;  %10504 = vmatmul.mubr.f32.vlgmr.msra.gmra.mrb[108].mxu1 %v2198_v35  ;;  %v1125_v35 = vld [vmem:[%s14312_s8 + $0x1978] sm:$0x3]  ;;  %v2251_v0 = vcombine.high %v2249_v56, %v2249_v56 }
 0x30e   : > { %13670 = vmatpush1.bf16.xpose.msra.mxu1 %v13669_v3  ;;  %10513 = vmatprep.subr.mxu0 %v1119_v4  ;;  %v837_v3 = vld [vmem:[%s14312_s8 + $0x1078] sm:$0xff] }
 0x30f   : > { %10583 = vmatprep.subr.mxu1 %v1121_v6  ;;  %10573 = vmatprep.mubr.f32.mxu0 %v2216_v5  ;;  %v545_v4 = vld [vmem:[%s14312_s8 + $0x758] sm:$0xff]  ;;  %v839_v5 = vld [vmem:[%s14312_s8 + $0x1088] sm:$0xff]  ;;  %v2252_v6 = vcombine.high %v294_v1, %v294_v1 }
 0x310   : > { %10643 = vmatprep.mubr.f32.mxu1 %v2217_v7  ;;  %v1126_v7 = vld [vmem:[%s14312_s8 + $0x1980] sm:$0x3]  ;;  %v13691_v13 = vpack.c.bf16 %v839_v5, %v545_v4  ;;  %v1136_v5 = vld [vmem:[%s14312_s8 + $0x19d0] sm:$0x3] }
 0x313   : > { %v8055_v18 = vpop.f32.mrb[74].mxu0 }
 0x314   : > { %v8056_v25 = vadd.f32 %v8055_v18, %v7986_v2  ;;  %v8057_v26 = vpop.f32.mrb[75].mxu0  ;;  %v8125_v27 = vpop.f32.mrb[74].mxu1  ;;  %v543_v2 = vld [vmem:[%s14312_s8 + $0x748] sm:$0xff] }
 0x315   : > { %10514 = vmatpush1.xpose.msra.mxu0 %v1118_v14  ;;  %v8127_v30 = vpop.f32.mrb[75].mxu1  ;;  %v13687_v8 = vpack.c.bf16 %v837_v3, %v543_v2  ;;  %v544_v14 = vld [vmem:[%s14312_s8 + $0x750] sm:$0xff]  ;;  %v1131_v26 = vld [vmem:[%s14312_s8 + $0x19a8] sm:$0x3]  ;;  %v550_v2 = vld [vmem:[%s14312_s8 + $0x780] sm:$0xff] }
 0x316   : > { %v8126_v31 = vadd.f32 %v8125_v27, %v8056_v25  ;;  %10584 = vmatpush1.xpose.msra.mxu1 %v1120_v19  ;;  %13672 = vmatprep.subr.bf16.mxu0 %v13671_v15  ;;  %v838_v15 = vld [vmem:[%s14312_s8 + $0x1080] sm:$0xff]  ;;  %v2267_v27 = vcombine.high %v2259_v16, %v2259_v16  ;;  %v844_v3 = vld [vmem:[%s14312_s8 + $0x10b0] sm:$0xff] }
 0x317   : > { %13676 = vmatprep.subr.bf16.mxu1 %v13675_v20  ;;  %v2266_v20 = vrot.slane %v2252_v6, %v14335_v21  ;;  %v13693_v25 = vpack.c.bf16 %v838_v15, %v544_v14  ;;  %v295_v30 = vld [vmem:[%s14305_s10 + $0x1d8] sm:$0xff]  ;;  %v13705_v14 = vpack.c.bf16 %v844_v3, %v550_v2 }
 0x318   : > { %10574 = vmatmul.mubr.f32.vlgmr.msra.gmra.mrb[110].mxu0 %v2208_v59  ;;  %v2276_v45 = vrot.slane %v295_v30, %v14335_v21 }
 0x319   : > { %13674 = vmatpush1.bf16.xpose.msra.mxu0 %v13673_v29  ;;  %10644 = vmatmul.mubr.f32.vlgmr.msra.gmra.mrb[110].mxu1 %v2215_v63  ;;  %v1129_v63 = vld [vmem:[%s14312_s8 + $0x1998] sm:$0x3]  ;;  %v2268_v29 = vcombine.high %v2266_v20, %v2266_v20 }
 0x31a   : > { %13678 = vmatpush1.bf16.xpose.msra.mxu1 %v13677_v32  ;;  %10653 = vmatprep.subr.mxu0 %v1123_v33  ;;  %v841_v32 = vld [vmem:[%s14312_s8 + $0x1098] sm:$0xff] }
 0x31b   : > { %10723 = vmatprep.subr.mxu1 %v1125_v35  ;;  %10713 = vmatprep.mubr.f32.mxu0 %v2233_v34  ;;  %v549_v33 = vld [vmem:[%s14312_s8 + $0x778] sm:$0xff]  ;;  %v843_v34 = vld [vmem:[%s14312_s8 + $0x10a8] sm:$0xff]  ;;  %v2269_v35 = vcombine.high %v295_v30, %v295_v30 }
 0x31c   : > { %10783 = vmatprep.mubr.f32.mxu1 %v2234_v36  ;;  %v1130_v36 = vld [vmem:[%s14312_s8 + $0x19a0] sm:$0x3]  ;;  %v13699_v42 = vpack.c.bf16 %v843_v34, %v549_v33  ;;  %v1140_v34 = vld [vmem:[%s14312_s8 + $0x19f0] sm:$0x3] }
 0x31f   : > { %v8195_v47 = vpop.f32.mrb[76].mxu0 }
 0x320   : > { %v8196_v53 = vadd.f32 %v8195_v47, %v8126_v31  ;;  %v8197_v54 = vpop.f32.mrb[77].mxu0  ;;  %v8265_v55 = vpop.f32.mrb[76].mxu1  ;;  %v547_v31 = vld [vmem:[%s14312_s8 + $0x768] sm:$0xff] }
 0x321   : > { %10654 = vmatpush1.xpose.msra.mxu0 %v1122_v43  ;;  %v8267_v58 = vpop.f32.mrb[77].mxu1  ;;  %v13695_v37 = vpack.c.bf16 %v841_v32, %v547_v31  ;;  %v548_v43 = vld [vmem:[%s14312_s8 + $0x770] sm:$0xff]  ;;  %v1135_v54 = vld [vmem:[%s14312_s8 + $0x19c8] sm:$0x3]  ;;  %v554_v31 = vld [vmem:[%s14312_s8 + $0x7a0] sm:$0xff] }
 0x322   : > { %v8266_v59 = vadd.f32 %v8265_v55, %v8196_v53  ;;  %10724 = vmatpush1.xpose.msra.mxu1 %v1124_v48  ;;  %13680 = vmatprep.subr.bf16.mxu0 %v13679_v44  ;;  %v842_v44 = vld [vmem:[%s14312_s8 + $0x10a0] sm:$0xff]  ;;  %v2284_v55 = vcombine.high %v2276_v45, %v2276_v45  ;;  %v848_v32 = vld [vmem:[%s14312_s8 + $0x10d0] sm:$0xff] }
 0x323   : > { %13684 = vmatprep.subr.bf16.mxu1 %v13683_v49  ;;  %v2283_v49 = vrot.slane %v2269_v35, %v14335_v21  ;;  %v13701_v53 = vpack.c.bf16 %v842_v44, %v548_v43  ;;  %v296_v58 = vld [vmem:[%s14305_s10 + $0x1e0] sm:$0xff]  ;;  %v13713_v43 = vpack.c.bf16 %v848_v32, %v554_v31 }
 0x324   : > { %10714 = vmatmul.mubr.f32.vlgmr.msra.gmra.mrb[112].mxu0 %v2225_v24  ;;  %v2293_v9 = vrot.slane %v296_v58, %v14335_v21 }
 0x325   : > { %13682 = vmatpush1.bf16.xpose.msra.mxu0 %v13681_v57  ;;  %10784 = vmatmul.mubr.f32.vlgmr.msra.gmra.mrb[112].mxu1 %v2232_v28  ;;  %v1133_v28 = vld [vmem:[%s14312_s8 + $0x19b8] sm:$0x3]  ;;  %v2285_v57 = vcombine.high %v2283_v49, %v2283_v49 }
 0x326   : > { %13686 = vmatpush1.bf16.xpose.msra.mxu1 %v13685_v60  ;;  %10793 = vmatprep.subr.mxu0 %v1127_v61  ;;  %v845_v60 = vld [vmem:[%s14312_s8 + $0x10b8] sm:$0xff] }
 0x327   : > { %10863 = vmatprep.subr.mxu1 %v1129_v63  ;;  %10853 = vmatprep.mubr.f32.mxu0 %v2250_v62  ;;  %v553_v61 = vld [vmem:[%s14312_s8 + $0x798] sm:$0xff]  ;;  %v847_v62 = vld [vmem:[%s14312_s8 + $0x10c8] sm:$0xff]  ;;  %v2286_v63 = vcombine.high %v296_v58, %v296_v58 }
 0x328   : > { %10923 = vmatprep.mubr.f32.mxu1 %v2251_v0  ;;  %v1134_v0 = vld [vmem:[%s14312_s8 + $0x19c0] sm:$0x3]  ;;  %v13707_v6 = vpack.c.bf16 %v847_v62, %v553_v61  ;;  %v1144_v62 = vld [vmem:[%s14312_s8 + $0x1a10] sm:$0x3] }
 0x32b   : > { %v8335_v11 = vpop.f32.mrb[78].mxu0 }
 0x32c   : > { %v8336_v17 = vadd.f32 %v8335_v11, %v8266_v59  ;;  %v8337_v18 = vpop.f32.mrb[79].mxu0  ;;  %v8405_v19 = vpop.f32.mrb[78].mxu1  ;;  %v551_v59 = vld [vmem:[%s14312_s8 + $0x788] sm:$0xff] }
 0x32d   : > { %10794 = vmatpush1.xpose.msra.mxu0 %v1126_v7  ;;  %v8407_v23 = vpop.f32.mrb[79].mxu1  ;;  %v13703_v1 = vpack.c.bf16 %v845_v60, %v551_v59  ;;  %v552_v7 = vld [vmem:[%s14312_s8 + $0x790] sm:$0xff]  ;;  %v1139_v18 = vld [vmem:[%s14312_s8 + $0x19e8] sm:$0x3]  ;;  %v558_v59 = vld [vmem:[%s14312_s8 + $0x7c0] sm:$0xff] }
 0x32e   : > { %v8406_v24 = vadd.f32 %v8405_v19, %v8336_v17  ;;  %10864 = vmatpush1.xpose.msra.mxu1 %v1128_v12  ;;  %13688 = vmatprep.subr.bf16.mxu0 %v13687_v8  ;;  %v846_v8 = vld [vmem:[%s14312_s8 + $0x10c0] sm:$0xff]  ;;  %v2301_v19 = vcombine.high %v2293_v9, %v2293_v9  ;;  %v297_v23 = vld [vmem:[%s14305_s10 + $0x1e8] sm:$0xff] }
 0x32f   : > { %13692 = vmatprep.subr.bf16.mxu1 %v13691_v13  ;;  %v2300_v13 = vrot.slane %v2286_v63, %v14335_v21  ;;  %v13709_v17 = vpack.c.bf16 %v846_v8, %v552_v7  ;;  %v2310_v38 = vrot.slane %v297_v23, %v14335_v21  ;;  %v852_v60 = vld [vmem:[%s14312_s8 + $0x10f0] sm:$0xff] }
 0x330   : > { %10854 = vmatmul.mubr.f32.vlgmr.msra.gmra.mrb[114].mxu0 %v2242_v52  ;;  %v13721_v7 = vpack.c.bf16 %v852_v60, %v558_v59 }
 0x331   : > { %13690 = vmatpush1.bf16.xpose.msra.mxu0 %v13689_v22  ;;  %10924 = vmatmul.mubr.f32.vlgmr.msra.gmra.mrb[114].mxu1 %v2249_v56  ;;  %v1137_v56 = vld [vmem:[%s14312_s8 + $0x19d8] sm:$0x3]  ;;  %v2302_v22 = vcombine.high %v2300_v13, %v2300_v13 }
 0x332   : > { %13694 = vmatpush1.bf16.xpose.msra.mxu1 %v13693_v25  ;;  %10933 = vmatprep.subr.mxu0 %v1131_v26  ;;  %v849_v25 = vld [vmem:[%s14312_s8 + $0x10d8] sm:$0xff] }
 0x333   : > { %11003 = vmatprep.subr.mxu1 %v1133_v28  ;;  %10993 = vmatprep.mubr.f32.mxu0 %v2267_v27  ;;  %v557_v26 = vld [vmem:[%s14312_s8 + $0x7b8] sm:$0xff]  ;;  %v851_v27 = vld [vmem:[%s14312_s8 + $0x10e8] sm:$0xff]  ;;  %v2303_v28 = vcombine.high %v297_v23, %v297_v23 }
 0x334   : > { %11063 = vmatprep.mubr.f32.mxu1 %v2268_v29  ;;  %v1138_v29 = vld [vmem:[%s14312_s8 + $0x19e0] sm:$0x3]  ;;  %v13715_v35 = vpack.c.bf16 %v851_v27, %v557_v26  ;;  %v1148_v27 = vld [vmem:[%s14312_s8 + $0x1a30] sm:$0x3] }
 0x337   : > { %v8475_v40 = vpop.f32.mrb[80].mxu0 }
 0x338   : > { %v8476_v46 = vadd.f32 %v8475_v40, %v8406_v24  ;;  %v8477_v47 = vpop.f32.mrb[81].mxu0  ;;  %v8545_v48 = vpop.f32.mrb[80].mxu1  ;;  %v555_v24 = vld [vmem:[%s14312_s8 + $0x7a8] sm:$0xff] }
 0x339   : > { %10934 = vmatpush1.xpose.msra.mxu0 %v1130_v36  ;;  %v8547_v51 = vpop.f32.mrb[81].mxu1  ;;  %v13711_v30 = vpack.c.bf16 %v849_v25, %v555_v24  ;;  %v556_v36 = vld [vmem:[%s14312_s8 + $0x7b0] sm:$0xff]  ;;  %v1143_v47 = vld [vmem:[%s14312_s8 + $0x1a08] sm:$0x3]  ;;  %v562_v24 = vld [vmem:[%s14312_s8 + $0x7e0] sm:$0xff] }
 0x33a   : > { %v8546_v52 = vadd.f32 %v8545_v48, %v8476_v46  ;;  %11004 = vmatpush1.xpose.msra.mxu1 %v1132_v41  ;;  %13696 = vmatprep.subr.bf16.mxu0 %v13695_v37  ;;  %v850_v37 = vld [vmem:[%s14312_s8 + $0x10e0] sm:$0xff]  ;;  %v2318_v48 = vcombine.high %v2310_v38, %v2310_v38  ;;  %v298_v51 = vld [vmem:[%s14305_s10 + $0x1f0] sm:$0xff] }
 0x33b   : > { %13700 = vmatprep.subr.bf16.mxu1 %v13699_v42  ;;  %v2317_v42 = vrot.slane %v2303_v28, %v14335_v21  ;;  %v13717_v46 = vpack.c.bf16 %v850_v37, %v556_v36  ;;  %v2327_v2 = vrot.slane %v298_v51, %v14335_v21  ;;  %v856_v25 = vld [vmem:[%s14312_s8 + $0x1110] sm:$0xff] }
 0x33c   : > { %10994 = vmatmul.mubr.f32.vlgmr.msra.gmra.mrb[116].mxu0 %v2259_v16  ;;  %v13729_v36 = vpack.c.bf16 %v856_v25, %v562_v24 }
 0x33d   : > { %13698 = vmatpush1.bf16.xpose.msra.mxu0 %v13697_v50  ;;  %11064 = vmatmul.mubr.f32.vlgmr.msra.gmra.mrb[116].mxu1 %v2266_v20  ;;  %v1141_v20 = vld [vmem:[%s14312_s8 + $0x19f8] sm:$0x3]  ;;  %v2319_v50 = vcombine.high %v2317_v42, %v2317_v42 }
 0x33e   : > { %13702 = vmatpush1.bf16.xpose.msra.mxu1 %v13701_v53  ;;  %11073 = vmatprep.subr.mxu0 %v1135_v54  ;;  %v853_v53 = vld [vmem:[%s14312_s8 + $0x10f8] sm:$0xff] }
 0x33f   : > { %11143 = vmatprep.subr.mxu1 %v1137_v56  ;;  %11133 = vmatprep.mubr.f32.mxu0 %v2284_v55  ;;  %v561_v54 = vld [vmem:[%s14312_s8 + $0x7d8] sm:$0xff]  ;;  %v855_v55 = vld [vmem:[%s14312_s8 + $0x1108] sm:$0xff]  ;;  %v2320_v56 = vcombine.high %v298_v51, %v298_v51 }
 0x340   : > { %11203 = vmatprep.mubr.f32.mxu1 %v2285_v57  ;;  %v1142_v57 = vld [vmem:[%s14312_s8 + $0x1a00] sm:$0x3]  ;;  %v13723_v63 = vpack.c.bf16 %v855_v55, %v561_v54  ;;  %v1152_v55 = vld [vmem:[%s14312_s8 + $0x1a50] sm:$0x3] }
 0x343   : > { %v8615_v4 = vpop.f32.mrb[82].mxu0 }
 0x344   : > { %v8616_v10 = vadd.f32 %v8615_v4, %v8546_v52  ;;  %v8617_v11 = vpop.f32.mrb[83].mxu0  ;;  %v8685_v12 = vpop.f32.mrb[82].mxu1  ;;  %v559_v52 = vld [vmem:[%s14312_s8 + $0x7c8] sm:$0xff] }
 0x345   : > { %11074 = vmatpush1.xpose.msra.mxu0 %v1134_v0  ;;  %v8687_v15 = vpop.f32.mrb[83].mxu1  ;;  %v13719_v58 = vpack.c.bf16 %v853_v53, %v559_v52  ;;  %v560_v0 = vld [vmem:[%s14312_s8 + $0x7d0] sm:$0xff]  ;;  %v1147_v11 = vld [vmem:[%s14312_s8 + $0x1a28] sm:$0x3]  ;;  %v566_v52 = vld [vmem:[%s14312_s8 + $0x800] sm:$0xff] }
 0x346   : > { %v8686_v16 = vadd.f32 %v8685_v12, %v8616_v10  ;;  %11144 = vmatpush1.xpose.msra.mxu1 %v1136_v5  ;;  %13704 = vmatprep.subr.bf16.mxu0 %v13703_v1  ;;  %v854_v1 = vld [vmem:[%s14312_s8 + $0x1100] sm:$0xff]  ;;  %v2335_v12 = vcombine.high %v2327_v2, %v2327_v2  ;;  %v860_v53 = vld [vmem:[%s14312_s8 + $0x1130] sm:$0xff] }
 0x347   : > { %13708 = vmatprep.subr.bf16.mxu1 %v13707_v6  ;;  %v2334_v6 = vrot.slane %v2320_v56, %v14335_v21  ;;  %v13725_v10 = vpack.c.bf16 %v854_v1, %v560_v0  ;;  %v299_v15 = vld [vmem:[%s14305_s10 + $0x1f8] sm:$0xff]  ;;  %v13737_v0 = vpack.c.bf16 %v860_v53, %v566_v52 }
 0x348   : > { %11134 = vmatmul.mubr.f32.vlgmr.msra.gmra.mrb[118].mxu0 %v2276_v45  ;;  %v2344_v31 = vrot.slane %v299_v15, %v14335_v21 }
 0x349   : > { %13706 = vmatpush1.bf16.xpose.msra.mxu0 %v13705_v14  ;;  %11204 = vmatmul.mubr.f32.vlgmr.msra.gmra.mrb[118].mxu1 %v2283_v49  ;;  %v1145_v49 = vld [vmem:[%s14312_s8 + $0x1a18] sm:$0x3]  ;;  %v2336_v14 = vcombine.high %v2334_v6, %v2334_v6 }
 0x34a   : > { %13710 = vmatpush1.bf16.xpose.msra.mxu1 %v13709_v17  ;;  %11213 = vmatprep.subr.mxu0 %v1139_v18  ;;  %v857_v17 = vld [vmem:[%s14312_s8 + $0x1118] sm:$0xff] }
 0x34b   : > { %11283 = vmatprep.subr.mxu1 %v1141_v20  ;;  %11273 = vmatprep.mubr.f32.mxu0 %v2301_v19  ;;  %v565_v18 = vld [vmem:[%s14312_s8 + $0x7f8] sm:$0xff]  ;;  %v859_v19 = vld [vmem:[%s14312_s8 + $0x1128] sm:$0xff]  ;;  %v2337_v20 = vcombine.high %v299_v15, %v299_v15 }
 0x34c   : > { %11343 = vmatprep.mubr.f32.mxu1 %v2302_v22  ;;  %v1146_v22 = vld [vmem:[%s14312_s8 + $0x1a20] sm:$0x3]  ;;  %v13731_v28 = vpack.c.bf16 %v859_v19, %v565_v18  ;;  %v1156_v19 = vld [vmem:[%s14312_s8 + $0x1a70] sm:$0x3] }
 0x34f   : > { %v8755_v33 = vpop.f32.mrb[84].mxu0 }
 0x350   : > { %v8756_v39 = vadd.f32 %v8755_v33, %v8686_v16  ;;  %v8757_v40 = vpop.f32.mrb[85].mxu0  ;;  %v8825_v41 = vpop.f32.mrb[84].mxu1  ;;  %v563_v16 = vld [vmem:[%s14312_s8 + $0x7e8] sm:$0xff] }
 0x351   : > { %11214 = vmatpush1.xpose.msra.mxu0 %v1138_v29  ;;  %v8827_v44 = vpop.f32.mrb[85].mxu1  ;;  %v13727_v23 = vpack.c.bf16 %v857_v17, %v563_v16  ;;  %v564_v29 = vld [vmem:[%s14312_s8 + $0x7f0] sm:$0xff]  ;;  %v1151_v40 = vld [vmem:[%s14312_s8 + $0x1a48] sm:$0x3]  ;;  %v570_v16 = vld [vmem:[%s14312_s8 + $0x820] sm:$0xff] }
 0x352   : > { %v8826_v45 = vadd.f32 %v8825_v41, %v8756_v39  ;;  %11284 = vmatpush1.xpose.msra.mxu1 %v1140_v34  ;;  %13712 = vmatprep.subr.bf16.mxu0 %v13711_v30  ;;  %v858_v30 = vld [vmem:[%s14312_s8 + $0x1120] sm:$0xff]  ;;  %v2352_v41 = vcombine.high %v2344_v31, %v2344_v31  ;;  %v864_v17 = vld [vmem:[%s14312_s8 + $0x1150] sm:$0xff] }
 0x353   : > { %13716 = vmatprep.subr.bf16.mxu1 %v13715_v35  ;;  %v2351_v35 = vrot.slane %v2337_v20, %v14335_v21  ;;  %v13733_v39 = vpack.c.bf16 %v858_v30, %v564_v29  ;;  %v300_v44 = vld [vmem:[%s14305_s10 + $0x200] sm:$0xff]  ;;  %v13745_v29 = vpack.c.bf16 %v864_v17, %v570_v16 }
 0x354   : > { %11274 = vmatmul.mubr.f32.vlgmr.msra.gmra.mrb[120].mxu0 %v2293_v9  ;;  %v2361_v59 = vrot.slane %v300_v44, %v14335_v21 }
 0x355   : > { %13714 = vmatpush1.bf16.xpose.msra.mxu0 %v13713_v43  ;;  %11344 = vmatmul.mubr.f32.vlgmr.msra.gmra.mrb[120].mxu1 %v2300_v13  ;;  %v1149_v13 = vld [vmem:[%s14312_s8 + $0x1a38] sm:$0x3]  ;;  %v2353_v43 = vcombine.high %v2351_v35, %v2351_v35 }
 0x356   : > { %13718 = vmatpush1.bf16.xpose.msra.mxu1 %v13717_v46  ;;  %11353 = vmatprep.subr.mxu0 %v1143_v47  ;;  %v861_v46 = vld [vmem:[%s14312_s8 + $0x1138] sm:$0xff] }
 0x357   : > { %11423 = vmatprep.subr.mxu1 %v1145_v49  ;;  %11413 = vmatprep.mubr.f32.mxu0 %v2318_v48  ;;  %v569_v47 = vld [vmem:[%s14312_s8 + $0x818] sm:$0xff]  ;;  %v863_v48 = vld [vmem:[%s14312_s8 + $0x1148] sm:$0xff]  ;;  %v2354_v49 = vcombine.high %v300_v44, %v300_v44 }
 0x358   : > { %11483 = vmatprep.mubr.f32.mxu1 %v2319_v50  ;;  %v1150_v50 = vld [vmem:[%s14312_s8 + $0x1a40] sm:$0x3]  ;;  %v13739_v56 = vpack.c.bf16 %v863_v48, %v569_v47  ;;  %v1160_v48 = vld [vmem:[%s14312_s8 + $0x1a90] sm:$0x3] }
 0x35b   : > { %v8895_v61 = vpop.f32.mrb[86].mxu0 }
 0x35c   : > { %v8896_v3 = vadd.f32 %v8895_v61, %v8826_v45  ;;  %v8897_v4 = vpop.f32.mrb[87].mxu0  ;;  %v8965_v5 = vpop.f32.mrb[86].mxu1  ;;  %v567_v45 = vld [vmem:[%s14312_s8 + $0x808] sm:$0xff] }
 0x35d   : > { %11354 = vmatpush1.xpose.msra.mxu0 %v1142_v57  ;;  %v8967_v8 = vpop.f32.mrb[87].mxu1  ;;  %v13735_v51 = vpack.c.bf16 %v861_v46, %v567_v45  ;;  %v568_v57 = vld [vmem:[%s14312_s8 + $0x810] sm:$0xff]  ;;  %v1155_v4 = vld [vmem:[%s14312_s8 + $0x1a68] sm:$0x3]  ;;  %v574_v45 = vld [vmem:[%s14312_s8 + $0x840] sm:$0xff] }
 0x35e   : > { %v8966_v9 = vadd.f32 %v8965_v5, %v8896_v3  ;;  %11424 = vmatpush1.xpose.msra.mxu1 %v1144_v62  ;;  %13720 = vmatprep.subr.bf16.mxu0 %v13719_v58  ;;  %v862_v58 = vld [vmem:[%s14312_s8 + $0x1140] sm:$0xff]  ;;  %v2369_v5 = vcombine.high %v2361_v59, %v2361_v59  ;;  %v301_v8 = vld [vmem:[%s14305_s10 + $0x208] sm:$0xff] }
 0x35f   : > { %13724 = vmatprep.subr.bf16.mxu1 %v13723_v63  ;;  %v2368_v63 = vrot.slane %v2354_v49, %v14335_v21  ;;  %v13741_v3 = vpack.c.bf16 %v862_v58, %v568_v57  ;;  %v2378_v24 = vrot.slane %v301_v8, %v14335_v21  ;;  %v868_v46 = vld [vmem:[%s14312_s8 + $0x1170] sm:$0xff] }
 0x360   : > { %11414 = vmatmul.mubr.f32.vlgmr.msra.gmra.mrb[122].mxu0 %v2310_v38  ;;  %v13753_v57 = vpack.c.bf16 %v868_v46, %v574_v45 }
 0x361   : > { %13722 = vmatpush1.bf16.xpose.msra.mxu0 %v13721_v7  ;;  %11484 = vmatmul.mubr.f32.vlgmr.msra.gmra.mrb[122].mxu1 %v2317_v42  ;;  %v1153_v42 = vld [vmem:[%s14312_s8 + $0x1a58] sm:$0x3]  ;;  %v2370_v7 = vcombine.high %v2368_v63, %v2368_v63 }
 0x362   : > { %13726 = vmatpush1.bf16.xpose.msra.mxu1 %v13725_v10  ;;  %11493 = vmatprep.subr.mxu0 %v1147_v11  ;;  %v865_v10 = vld [vmem:[%s14312_s8 + $0x1158] sm:$0xff] }
 0x363   : > { %11563 = vmatprep.subr.mxu1 %v1149_v13  ;;  %11553 = vmatprep.mubr.f32.mxu0 %v2335_v12  ;;  %v573_v11 = vld [vmem:[%s14312_s8 + $0x838] sm:$0xff]  ;;  %v867_v12 = vld [vmem:[%s14312_s8 + $0x1168] sm:$0xff]  ;;  %v2371_v13 = vcombine.high %v301_v8, %v301_v8 }
 0x364   : > { %11623 = vmatprep.mubr.f32.mxu1 %v2336_v14  ;;  %v1154_v14 = vld [vmem:[%s14312_s8 + $0x1a60] sm:$0x3]  ;;  %v13747_v20 = vpack.c.bf16 %v867_v12, %v573_v11  ;;  %v1164_v12 = vld [vmem:[%s14312_s8 + $0x1ab0] sm:$0x3] }
 0x367   : > { %v9035_v26 = vpop.f32.mrb[88].mxu0 }
 0x368   : > { %v9036_v32 = vadd.f32 %v9035_v26, %v8966_v9  ;;  %v9037_v33 = vpop.f32.mrb[89].mxu0  ;;  %v9105_v34 = vpop.f32.mrb[88].mxu1  ;;  %v571_v9 = vld [vmem:[%s14312_s8 + $0x828] sm:$0xff] }
 0x369   : > { %11494 = vmatpush1.xpose.msra.mxu0 %v1146_v22  ;;  %v9107_v37 = vpop.f32.mrb[89].mxu1  ;;  %v13743_v15 = vpack.c.bf16 %v865_v10, %v571_v9  ;;  %v572_v22 = vld [vmem:[%s14312_s8 + $0x830] sm:$0xff]  ;;  %v1159_v33 = vld [vmem:[%s14312_s8 + $0x1a88] sm:$0x3]  ;;  %v578_v9 = vld [vmem:[%s14312_s8 + $0x860] sm:$0xff] }
 0x36a   : > { %v9106_v38 = vadd.f32 %v9105_v34, %v9036_v32  ;;  %11564 = vmatpush1.xpose.msra.mxu1 %v1148_v27  ;;  %13728 = vmatprep.subr.bf16.mxu0 %v13727_v23  ;;  %v866_v23 = vld [vmem:[%s14312_s8 + $0x1160] sm:$0xff]  ;;  %v2386_v34 = vcombine.high %v2378_v24, %v2378_v24  ;;  %v302_v37 = vld [vmem:[%s14305_s10 + $0x210] sm:$0xff] }
 0x36b   : > { %13732 = vmatprep.subr.bf16.mxu1 %v13731_v28  ;;  %v2385_v28 = vrot.slane %v2371_v13, %v14335_v21  ;;  %v13749_v32 = vpack.c.bf16 %v866_v23, %v572_v22  ;;  %v2395_v52 = vrot.slane %v302_v37, %v14335_v21  ;;  %v872_v10 = vld [vmem:[%s14312_s8 + $0x1190] sm:$0xff] }
 0x36c   : > { %11554 = vmatmul.mubr.f32.vlgmr.msra.gmra.mrb[124].mxu0 %v2327_v2  ;;  %v13761_v22 = vpack.c.bf16 %v872_v10, %v578_v9 }
 0x36d   : > { %13730 = vmatpush1.bf16.xpose.msra.mxu0 %v13729_v36  ;;  %11624 = vmatmul.mubr.f32.vlgmr.msra.gmra.mrb[124].mxu1 %v2334_v6  ;;  %v1157_v6 = vld [vmem:[%s14312_s8 + $0x1a78] sm:$0x3]  ;;  %v2387_v36 = vcombine.high %v2385_v28, %v2385_v28 }
 0x36e   : > { %13734 = vmatpush1.bf16.xpose.msra.mxu1 %v13733_v39  ;;  %11633 = vmatprep.subr.mxu0 %v1151_v40  ;;  %v869_v39 = vld [vmem:[%s14312_s8 + $0x1178] sm:$0xff] }
 0x36f   : > { %11703 = vmatprep.subr.mxu1 %v1153_v42  ;;  %11693 = vmatprep.mubr.f32.mxu0 %v2352_v41  ;;  %v577_v40 = vld [vmem:[%s14312_s8 + $0x858] sm:$0xff]  ;;  %v871_v41 = vld [vmem:[%s14312_s8 + $0x1188] sm:$0xff]  ;;  %v2388_v42 = vcombine.high %v302_v37, %v302_v37 }
 0x370   : > { %11763 = vmatprep.mubr.f32.mxu1 %v2353_v43  ;;  %v1158_v43 = vld [vmem:[%s14312_s8 + $0x1a80] sm:$0x3]  ;;  %v13755_v49 = vpack.c.bf16 %v871_v41, %v577_v40  ;;  %v1168_v41 = vld [vmem:[%s14312_s8 + $0x1ad0] sm:$0x3] }
 0x373   : > { %v9175_v54 = vpop.f32.mrb[90].mxu0 }
 0x374   : > { %v9176_v60 = vadd.f32 %v9175_v54, %v9106_v38  ;;  %v9177_v61 = vpop.f32.mrb[91].mxu0  ;;  %v9245_v62 = vpop.f32.mrb[90].mxu1  ;;  %v575_v38 = vld [vmem:[%s14312_s8 + $0x848] sm:$0xff] }
 0x375   : > { %11634 = vmatpush1.xpose.msra.mxu0 %v1150_v50  ;;  %v9247_v1 = vpop.f32.mrb[91].mxu1  ;;  %v13751_v44 = vpack.c.bf16 %v869_v39, %v575_v38  ;;  %v576_v50 = vld [vmem:[%s14312_s8 + $0x850] sm:$0xff]  ;;  %v1163_v61 = vld [vmem:[%s14312_s8 + $0x1aa8] sm:$0x3]  ;;  %v582_v38 = vld [vmem:[%s14312_s8 + $0x880] sm:$0xff] }
 0x376   : > { %v9246_v2 = vadd.f32 %v9245_v62, %v9176_v60  ;;  %11704 = vmatpush1.xpose.msra.mxu1 %v1152_v55  ;;  %13736 = vmatprep.subr.bf16.mxu0 %v13735_v51  ;;  %v870_v51 = vld [vmem:[%s14312_s8 + $0x1180] sm:$0xff]  ;;  %v2403_v62 = vcombine.high %v2395_v52, %v2395_v52  ;;  %v876_v39 = vld [vmem:[%s14312_s8 + $0x11b0] sm:$0xff] }
 0x377   : > { %13740 = vmatprep.subr.bf16.mxu1 %v13739_v56  ;;  %v2402_v56 = vrot.slane %v2388_v42, %v14335_v21  ;;  %v13757_v60 = vpack.c.bf16 %v870_v51, %v576_v50  ;;  %v303_v1 = vld [vmem:[%s14305_s10 + $0x218] sm:$0xff]  ;;  %v13769_v50 = vpack.c.bf16 %v876_v39, %v582_v38 }
 0x378   : > { %11694 = vmatmul.mubr.f32.vlgmr.msra.gmra.mrb[126].mxu0 %v2344_v31  ;;  %v2412_v16 = vrot.slane %v303_v1, %v14335_v21 }
 0x379   : > { %13738 = vmatpush1.bf16.xpose.msra.mxu0 %v13737_v0  ;;  %11764 = vmatmul.mubr.f32.vlgmr.msra.gmra.mrb[126].mxu1 %v2351_v35  ;;  %v1161_v35 = vld [vmem:[%s14312_s8 + $0x1a98] sm:$0x3]  ;;  %v2404_v0 = vcombine.high %v2402_v56, %v2402_v56 }
 0x37a   : > { %13742 = vmatpush1.bf16.xpose.msra.mxu1 %v13741_v3  ;;  %11773 = vmatprep.subr.mxu0 %v1155_v4  ;;  %v873_v3 = vld [vmem:[%s14312_s8 + $0x1198] sm:$0xff] }
 0x37b   : > { %11843 = vmatprep.subr.mxu1 %v1157_v6  ;;  %11833 = vmatprep.mubr.f32.mxu0 %v2369_v5  ;;  %v581_v4 = vld [vmem:[%s14312_s8 + $0x878] sm:$0xff]  ;;  %v875_v5 = vld [vmem:[%s14312_s8 + $0x11a8] sm:$0xff]  ;;  %v2405_v6 = vcombine.high %v303_v1, %v303_v1 }
 0x37c   : > { %11903 = vmatprep.mubr.f32.mxu1 %v2370_v7  ;;  %v1162_v7 = vld [vmem:[%s14312_s8 + $0x1aa0] sm:$0x3]  ;;  %v13763_v13 = vpack.c.bf16 %v875_v5, %v581_v4  ;;  %v1172_v5 = vld [vmem:[%s14312_s8 + $0x1af0] sm:$0x3] }
 0x37f   : > { %v9315_v18 = vpop.f32.mrb[92].mxu0 }
 0x380   : > { %v9316_v25 = vadd.f32 %v9315_v18, %v9246_v2  ;;  %v9317_v26 = vpop.f32.mrb[93].mxu0  ;;  %v9385_v27 = vpop.f32.mrb[92].mxu1  ;;  %v579_v2 = vld [vmem:[%s14312_s8 + $0x868] sm:$0xff] }
 0x381   : > { %11774 = vmatpush1.xpose.msra.mxu0 %v1154_v14  ;;  %v9387_v30 = vpop.f32.mrb[93].mxu1  ;;  %v13759_v8 = vpack.c.bf16 %v873_v3, %v579_v2  ;;  %v580_v14 = vld [vmem:[%s14312_s8 + $0x870] sm:$0xff]  ;;  %v1167_v26 = vld [vmem:[%s14312_s8 + $0x1ac8] sm:$0x3]  ;;  %v586_v2 = vld [vmem:[%s14312_s8 + $0x8a0] sm:$0xff] }
 0x382   : > { %v9386_v31 = vadd.f32 %v9385_v27, %v9316_v25  ;;  %11844 = vmatpush1.xpose.msra.mxu1 %v1156_v19  ;;  %13744 = vmatprep.subr.bf16.mxu0 %v13743_v15  ;;  %v874_v15 = vld [vmem:[%s14312_s8 + $0x11a0] sm:$0xff]  ;;  %v2420_v27 = vcombine.high %v2412_v16, %v2412_v16  ;;  %v880_v3 = vld [vmem:[%s14312_s8 + $0x11d0] sm:$0xff] }
 0x383   : > { %13748 = vmatprep.subr.bf16.mxu1 %v13747_v20  ;;  %v2419_v20 = vrot.slane %v2405_v6, %v14335_v21  ;;  %v13765_v25 = vpack.c.bf16 %v874_v15, %v580_v14  ;;  %v304_v30 = vld [vmem:[%s14305_s10 + $0x220] sm:$0xff]  ;;  %v13777_v14 = vpack.c.bf16 %v880_v3, %v586_v2 }
 0x384   : > { %11834 = vmatmul.mubr.f32.vlgmr.msra.gmra.mrb[128].mxu0 %v2361_v59  ;;  %v2429_v45 = vrot.slane %v304_v30, %v14335_v21 }
 0x385   : > { %13746 = vmatpush1.bf16.xpose.msra.mxu0 %v13745_v29  ;;  %11904 = vmatmul.mubr.f32.vlgmr.msra.gmra.mrb[128].mxu1 %v2368_v63  ;;  %v1165_v63 = vld [vmem:[%s14312_s8 + $0x1ab8] sm:$0x3]  ;;  %v2421_v29 = vcombine.high %v2419_v20, %v2419_v20 }
 0x386   : > { %13750 = vmatpush1.bf16.xpose.msra.mxu1 %v13749_v32  ;;  %11913 = vmatprep.subr.mxu0 %v1159_v33  ;;  %v877_v32 = vld [vmem:[%s14312_s8 + $0x11b8] sm:$0xff] }
 0x387   : > { %11983 = vmatprep.subr.mxu1 %v1161_v35  ;;  %11973 = vmatprep.mubr.f32.mxu0 %v2386_v34  ;;  %v585_v33 = vld [vmem:[%s14312_s8 + $0x898] sm:$0xff]  ;;  %v879_v34 = vld [vmem:[%s14312_s8 + $0x11c8] sm:$0xff]  ;;  %v2422_v35 = vcombine.high %v304_v30, %v304_v30 }
 0x388   : > { %12043 = vmatprep.mubr.f32.mxu1 %v2387_v36  ;;  %v1166_v36 = vld [vmem:[%s14312_s8 + $0x1ac0] sm:$0x3]  ;;  %v13771_v42 = vpack.c.bf16 %v879_v34, %v585_v33  ;;  %v1176_v34 = vld [vmem:[%s14312_s8 + $0x1b10] sm:$0x3] }
 0x38b   : > { %v9455_v47 = vpop.f32.mrb[94].mxu0 }
 0x38c   : > { %v9456_v53 = vadd.f32 %v9455_v47, %v9386_v31  ;;  %v9457_v54 = vpop.f32.mrb[95].mxu0  ;;  %v9525_v55 = vpop.f32.mrb[94].mxu1  ;;  %v583_v31 = vld [vmem:[%s14312_s8 + $0x888] sm:$0xff] }
 0x38d   : > { %11914 = vmatpush1.xpose.msra.mxu0 %v1158_v43  ;;  %v9527_v58 = vpop.f32.mrb[95].mxu1  ;;  %v13767_v37 = vpack.c.bf16 %v877_v32, %v583_v31  ;;  %v584_v43 = vld [vmem:[%s14312_s8 + $0x890] sm:$0xff]  ;;  %v1171_v54 = vld [vmem:[%s14312_s8 + $0x1ae8] sm:$0x3]  ;;  %v590_v31 = vld [vmem:[%s14312_s8 + $0x8c0] sm:$0xff] }
 0x38e   : > { %v9526_v59 = vadd.f32 %v9525_v55, %v9456_v53  ;;  %11984 = vmatpush1.xpose.msra.mxu1 %v1160_v48  ;;  %13752 = vmatprep.subr.bf16.mxu0 %v13751_v44  ;;  %v878_v44 = vld [vmem:[%s14312_s8 + $0x11c0] sm:$0xff]  ;;  %v2437_v55 = vcombine.high %v2429_v45, %v2429_v45  ;;  %v305_v58 = vld [vmem:[%s14305_s10 + $0x228] sm:$0xff] }
 0x38f   : > { %13756 = vmatprep.subr.bf16.mxu1 %v13755_v49  ;;  %v2436_v49 = vrot.slane %v2422_v35, %v14335_v21  ;;  %v13773_v53 = vpack.c.bf16 %v878_v44, %v584_v43  ;;  %v2446_v9 = vrot.slane %v305_v58, %v14335_v21  ;;  %v884_v32 = vld [vmem:[%s14312_s8 + $0x11f0] sm:$0xff] }
 0x390   : > { %11974 = vmatmul.mubr.f32.vlgmr.msra.gmra.mrb[130].mxu0 %v2378_v24  ;;  %v13785_v43 = vpack.c.bf16 %v884_v32, %v590_v31 }
 0x391   : > { %13754 = vmatpush1.bf16.xpose.msra.mxu0 %v13753_v57  ;;  %12044 = vmatmul.mubr.f32.vlgmr.msra.gmra.mrb[130].mxu1 %v2385_v28  ;;  %v1169_v28 = vld [vmem:[%s14312_s8 + $0x1ad8] sm:$0x3]  ;;  %v2438_v57 = vcombine.high %v2436_v49, %v2436_v49 }
 0x392   : > { %13758 = vmatpush1.bf16.xpose.msra.mxu1 %v13757_v60  ;;  %12053 = vmatprep.subr.mxu0 %v1163_v61  ;;  %v881_v60 = vld [vmem:[%s14312_s8 + $0x11d8] sm:$0xff] }
 0x393   : > { %12123 = vmatprep.subr.mxu1 %v1165_v63  ;;  %12113 = vmatprep.mubr.f32.mxu0 %v2403_v62  ;;  %v589_v61 = vld [vmem:[%s14312_s8 + $0x8b8] sm:$0xff]  ;;  %v883_v62 = vld [vmem:[%s14312_s8 + $0x11e8] sm:$0xff]  ;;  %v2439_v63 = vcombine.high %v305_v58, %v305_v58 }
 0x394   : > { %12183 = vmatprep.mubr.f32.mxu1 %v2404_v0  ;;  %v1170_v0 = vld [vmem:[%s14312_s8 + $0x1ae0] sm:$0x3]  ;;  %v13779_v6 = vpack.c.bf16 %v883_v62, %v589_v61  ;;  %v1180_v62 = vld [vmem:[%s14312_s8 + $0x1b30] sm:$0x3] }
 0x397   : > { %v9595_v11 = vpop.f32.mrb[96].mxu0 }
 0x398   : > { %v9596_v17 = vadd.f32 %v9595_v11, %v9526_v59  ;;  %v9597_v18 = vpop.f32.mrb[97].mxu0  ;;  %v9665_v19 = vpop.f32.mrb[96].mxu1  ;;  %v587_v59 = vld [vmem:[%s14312_s8 + $0x8a8] sm:$0xff] }
 0x399   : > { %12054 = vmatpush1.xpose.msra.mxu0 %v1162_v7  ;;  %v9667_v23 = vpop.f32.mrb[97].mxu1  ;;  %v13775_v1 = vpack.c.bf16 %v881_v60, %v587_v59  ;;  %v588_v7 = vld [vmem:[%s14312_s8 + $0x8b0] sm:$0xff]  ;;  %v1175_v18 = vld [vmem:[%s14312_s8 + $0x1b08] sm:$0x3]  ;;  %v594_v59 = vld [vmem:[%s14312_s8 + $0x8e0] sm:$0xff] }
 0x39a   : > { %v9666_v24 = vadd.f32 %v9665_v19, %v9596_v17  ;;  %12124 = vmatpush1.xpose.msra.mxu1 %v1164_v12  ;;  %13760 = vmatprep.subr.bf16.mxu0 %v13759_v8  ;;  %v882_v8 = vld [vmem:[%s14312_s8 + $0x11e0] sm:$0xff]  ;;  %v2454_v19 = vcombine.high %v2446_v9, %v2446_v9  ;;  %v306_v23 = vld [vmem:[%s14305_s10 + $0x230] sm:$0xff] }
 0x39b   : > { %13764 = vmatprep.subr.bf16.mxu1 %v13763_v13  ;;  %v2453_v13 = vrot.slane %v2439_v63, %v14335_v21  ;;  %v13781_v17 = vpack.c.bf16 %v882_v8, %v588_v7  ;;  %v2463_v38 = vrot.slane %v306_v23, %v14335_v21  ;;  %v888_v60 = vld [vmem:[%s14312_s8 + $0x1210] sm:$0xff] }
 0x39c   : > { %12114 = vmatmul.mubr.f32.vlgmr.msra.gmra.mrb[132].mxu0 %v2395_v52  ;;  %v13793_v7 = vpack.c.bf16 %v888_v60, %v594_v59  ;;  %v1191_v59 = vld [vmem:[%s14312_s8 + $0x1b88] sm:$0x3]  ;;  %v1190_v60 = vld [vmem:[%s14312_s8 + $0x1b80] sm:$0x3] }
 0x39d   : > { %13762 = vmatpush1.bf16.xpose.msra.mxu0 %v13761_v22  ;;  %12184 = vmatmul.mubr.f32.vlgmr.msra.gmra.mrb[132].mxu1 %v2402_v56  ;;  %v1173_v56 = vld [vmem:[%s14312_s8 + $0x1af8] sm:$0x3]  ;;  %v2455_v22 = vcombine.high %v2453_v13, %v2453_v13 }
 0x39e   : > { %13766 = vmatpush1.bf16.xpose.msra.mxu1 %v13765_v25  ;;  %12193 = vmatprep.subr.mxu0 %v1167_v26  ;;  %v885_v25 = vld [vmem:[%s14312_s8 + $0x11f8] sm:$0xff] }
 0x39f   : > { %12263 = vmatprep.subr.mxu1 %v1169_v28  ;;  %12253 = vmatprep.mubr.f32.mxu0 %v2420_v27  ;;  %v593_v26 = vld [vmem:[%s14312_s8 + $0x8d8] sm:$0xff]  ;;  %v887_v27 = vld [vmem:[%s14312_s8 + $0x1208] sm:$0xff]  ;;  %v2456_v28 = vcombine.high %v306_v23, %v306_v23 }
 0x3a0   : > { %12323 = vmatprep.mubr.f32.mxu1 %v2421_v29  ;;  %v1174_v29 = vld [vmem:[%s14312_s8 + $0x1b00] sm:$0x3]  ;;  %v13787_v35 = vpack.c.bf16 %v887_v27, %v593_v26  ;;  %v1184_v27 = vld [vmem:[%s14312_s8 + $0x1b50] sm:$0x3] }
 0x3a3   : > { %v9735_v40 = vpop.f32.mrb[98].mxu0 }
 0x3a4   : > { %v9736_v46 = vadd.f32 %v9735_v40, %v9666_v24  ;;  %v9737_v47 = vpop.f32.mrb[99].mxu0  ;;  %v9805_v48 = vpop.f32.mrb[98].mxu1  ;;  %v591_v24 = vld [vmem:[%s14312_s8 + $0x8c8] sm:$0xff] }
 0x3a5   : > { %12194 = vmatpush1.xpose.msra.mxu0 %v1166_v36  ;;  %v9807_v51 = vpop.f32.mrb[99].mxu1  ;;  %v13783_v30 = vpack.c.bf16 %v885_v25, %v591_v24  ;;  %v592_v36 = vld [vmem:[%s14312_s8 + $0x8d0] sm:$0xff]  ;;  %v1179_v47 = vld [vmem:[%s14312_s8 + $0x1b28] sm:$0x3]  ;;  %v598_v24 = vld [vmem:[%s14312_s8 + $0x900] sm:$0xff] }
 0x3a6   : > { %v9806_v52 = vadd.f32 %v9805_v48, %v9736_v46  ;;  %12264 = vmatpush1.xpose.msra.mxu1 %v1168_v41  ;;  %13768 = vmatprep.subr.bf16.mxu0 %v13767_v37  ;;  %v886_v37 = vld [vmem:[%s14312_s8 + $0x1200] sm:$0xff]  ;;  %v2471_v48 = vcombine.high %v2463_v38, %v2463_v38  ;;  %v892_v25 = vld [vmem:[%s14312_s8 + $0x1230] sm:$0xff] }
 0x3a7   : > { %13772 = vmatprep.subr.bf16.mxu1 %v13771_v42  ;;  %v2470_v42 = vrot.slane %v2456_v28, %v14335_v21  ;;  %v13789_v46 = vpack.c.bf16 %v886_v37, %v592_v36  ;;  %v307_v51 = vld [vmem:[%s14305_s10 + $0x238] sm:$0xff]  ;;  %v13801_v36 = vpack.c.bf16 %v892_v25, %v598_v24 }
 0x3a8   : > { %12254 = vmatmul.mubr.f32.vlgmr.msra.gmra.mrb[134].mxu0 %v2412_v16  ;;  %v2480_v2 = vrot.slane %v307_v51, %v14335_v21 }
 0x3a9   : > { %13770 = vmatpush1.bf16.xpose.msra.mxu0 %v13769_v50  ;;  %12324 = vmatmul.mubr.f32.vlgmr.msra.gmra.mrb[134].mxu1 %v2419_v20  ;;  %v1177_v20 = vld [vmem:[%s14312_s8 + $0x1b18] sm:$0x3]  ;;  %v2472_v50 = vcombine.high %v2470_v42, %v2470_v42 }
 0x3aa   : > { %13774 = vmatpush1.bf16.xpose.msra.mxu1 %v13773_v53  ;;  %12333 = vmatprep.subr.mxu0 %v1171_v54  ;;  %v889_v53 = vld [vmem:[%s14312_s8 + $0x1218] sm:$0xff] }
 0x3ab   : > { %12403 = vmatprep.subr.mxu1 %v1173_v56  ;;  %12393 = vmatprep.mubr.f32.mxu0 %v2437_v55  ;;  %v597_v54 = vld [vmem:[%s14312_s8 + $0x8f8] sm:$0xff]  ;;  %v891_v55 = vld [vmem:[%s14312_s8 + $0x1228] sm:$0xff]  ;;  %v2473_v56 = vcombine.high %v307_v51, %v307_v51 }
 0x3ac   : > { %12463 = vmatprep.mubr.f32.mxu1 %v2438_v57  ;;  %v1178_v57 = vld [vmem:[%s14312_s8 + $0x1b20] sm:$0x3]  ;;  %v13795_v63 = vpack.c.bf16 %v891_v55, %v597_v54  ;;  %v13214_v51 = vld.sshfl [vmem:[%s14305_s10 + $0x248] sm:$0x33 pattern:$0x76325410] }
 0x3af   : > { %v9875_v4 = vpop.f32.mrb[100].mxu0 }
 0x3b0   : > { %v9876_v10 = vadd.f32 %v9875_v4, %v9806_v52  ;;  %v9877_v11 = vpop.f32.mrb[101].mxu0  ;;  %v9945_v12 = vpop.f32.mrb[100].mxu1  ;;  %v595_v52 = vld [vmem:[%s14312_s8 + $0x8e8] sm:$0xff] }
 0x3b1   : > { %12334 = vmatpush1.xpose.msra.mxu0 %v1170_v0  ;;  %v9947_v15 = vpop.f32.mrb[101].mxu1  ;;  %v13791_v58 = vpack.c.bf16 %v889_v53, %v595_v52  ;;  %v596_v0 = vld [vmem:[%s14312_s8 + $0x8f0] sm:$0xff]  ;;  %v1183_v11 = vld [vmem:[%s14312_s8 + $0x1b48] sm:$0x3] }
 0x3b2   : > { %v9946_v16 = vadd.f32 %v9945_v12, %v9876_v10  ;;  %12404 = vmatpush1.xpose.msra.mxu1 %v1172_v5  ;;  %13776 = vmatprep.subr.bf16.mxu0 %v13775_v1  ;;  %v890_v1 = vld [vmem:[%s14312_s8 + $0x1220] sm:$0xff]  ;;  %v2488_v12 = vcombine.high %v2480_v2, %v2480_v2 }
 0x3b3   : > { %13780 = vmatprep.subr.bf16.mxu1 %v13779_v6  ;;  %v2487_v6 = vrot.slane %v2473_v56, %v14335_v21  ;;  %v13797_v10 = vpack.c.bf16 %v890_v1, %v596_v0  ;;  %v308_v15 = vld [vmem:[%s14305_s10 + $0x240] sm:$0xff] }
 0x3b4   : > { %12394 = vmatmul.mubr.f32.vlgmr.msra.gmra.mrb[136].mxu0 %v2429_v45  ;;  %v2497_v31 = vrot.slane %v308_v15, %v14335_v21 }
 0x3b5   : > { %13778 = vmatpush1.bf16.xpose.msra.mxu0 %v13777_v14  ;;  %12464 = vmatmul.mubr.f32.vlgmr.msra.gmra.mrb[136].mxu1 %v2436_v49  ;;  %v1181_v49 = vld [vmem:[%s14312_s8 + $0x1b38] sm:$0x3]  ;;  %v2489_v14 = vcombine.high %v2487_v6, %v2487_v6 }
 0x3b6   : > { %13782 = vmatpush1.bf16.xpose.msra.mxu1 %v13781_v17  ;;  %12473 = vmatprep.subr.mxu0 %v1175_v18  ;;  %v893_v17 = vld [vmem:[%s14312_s8 + $0x1238] sm:$0xff] }
 0x3b7   : > { %12543 = vmatprep.subr.mxu1 %v1177_v20  ;;  %12533 = vmatprep.mubr.f32.mxu0 %v2454_v19  ;;  %v601_v18 = vld [vmem:[%s14312_s8 + $0x918] sm:$0xff]  ;;  %v895_v19 = vld [vmem:[%s14312_s8 + $0x1248] sm:$0xff]  ;;  %v2490_v20 = vcombine.high %v308_v15, %v308_v15 }
 0x3b8   : > { %12603 = vmatprep.mubr.f32.mxu1 %v2455_v22  ;;  %v1182_v22 = vld [vmem:[%s14312_s8 + $0x1b40] sm:$0x3]  ;;  %v13803_v28 = vpack.c.bf16 %v895_v19, %v601_v18 }
 0x3bb   : > { %v10015_v33 = vpop.f32.mrb[102].mxu0 }
 0x3bc   : > { %v10016_v39 = vadd.f32 %v10015_v33, %v9946_v16  ;;  %v10017_v40 = vpop.f32.mrb[103].mxu0  ;;  %v10085_v41 = vpop.f32.mrb[102].mxu1  ;;  %v599_v16 = vld [vmem:[%s14312_s8 + $0x908] sm:$0xff] }
 0x3bd   : > { %12474 = vmatpush1.xpose.msra.mxu0 %v1174_v29  ;;  %v10087_v44 = vpop.f32.mrb[103].mxu1  ;;  %v13799_v23 = vpack.c.bf16 %v893_v17, %v599_v16  ;;  %v600_v29 = vld [vmem:[%s14312_s8 + $0x910] sm:$0xff]  ;;  %v1187_v40 = vld [vmem:[%s14312_s8 + $0x1b68] sm:$0x3] }
 0x3be   : > { %v10086_v45 = vadd.f32 %v10085_v41, %v10016_v39  ;;  %12544 = vmatpush1.xpose.msra.mxu1 %v1176_v34  ;;  %13784 = vmatprep.subr.bf16.mxu0 %v13783_v30  ;;  %v894_v30 = vld [vmem:[%s14312_s8 + $0x1240] sm:$0xff]  ;;  %v2505_v41 = vcombine.high %v2497_v31, %v2497_v31  ;;  %v897_v44 = vld [vmem:[%s14312_s8 + $0x1258] sm:$0xff] }
 0x3bf   : > { %13788 = vmatprep.subr.bf16.mxu1 %v13787_v35  ;;  %v2504_v35 = vrot.slane %v2490_v20, %v14335_v21  ;;  %v13805_v39 = vpack.c.bf16 %v894_v30, %v600_v29  ;;  %v603_v21 = vld [vmem:[%s14312_s8 + $0x928] sm:$0xff] }
 0x3c0   : > { %12534 = vmatmul.mubr.f32.vlgmr.msra.gmra.mrb[138].mxu0 %v2446_v9 }
 0x3c1   : > { %13786 = vmatpush1.bf16.xpose.msra.mxu0 %v13785_v43  ;;  %12604 = vmatmul.mubr.f32.vlgmr.msra.gmra.mrb[138].mxu1 %v2453_v13  ;;  %v1185_v13 = vld [vmem:[%s14312_s8 + $0x1b58] sm:$0x3]  ;;  %v2506_v43 = vcombine.high %v2504_v35, %v2504_v35 }
 0x3c2   : > { %13790 = vmatpush1.bf16.xpose.msra.mxu1 %v13789_v46  ;;  %12613 = vmatprep.subr.mxu0 %v1179_v47  ;;  %v1188_v46 = vld [vmem:[%s14312_s8 + $0x1b70] sm:$0x3]  ;;  %v13807_v47 = vpack.c.bf16 %v897_v44, %v603_v21 }
 0x3c3   : > { %12683 = vmatprep.subr.mxu1 %v1181_v49  ;;  %12673 = vmatprep.mubr.f32.mxu0 %v2471_v48  ;;  %v602_v48 = vld [vmem:[%s14312_s8 + $0x920] sm:$0xff]  ;;  %v896_v49 = vld [vmem:[%s14312_s8 + $0x1250] sm:$0xff] }
 0x3c4   : > { %12743 = vmatprep.mubr.f32.mxu1 %v2472_v50  ;;  %v13809_v55 = vpack.c.bf16 %v896_v49, %v602_v48 }
 0x3c7   : > { %v10155_v61 = vpop.f32.mrb[104].mxu0 }
 0x3c8   : > { %v10156_v3 = vadd.f32 %v10155_v61, %v10086_v45  ;;  %v10157_v4 = vpop.f32.mrb[105].mxu0  ;;  %v10225_v5 = vpop.f32.mrb[104].mxu1  ;;  %v1186_v45 = vld [vmem:[%s14312_s8 + $0x1b60] sm:$0x3] }
 0x3c9   : > { %12614 = vmatpush1.xpose.msra.mxu0 %v1178_v57  ;;  %v10227_v8 = vpop.f32.mrb[105].mxu1 }
 0x3ca   : > { %v10226_v9 = vadd.f32 %v10225_v5, %v10156_v3  ;;  %12684 = vmatpush1.xpose.msra.mxu1 %v1180_v62  ;;  %13792 = vmatprep.subr.bf16.mxu0 %v13791_v58  ;;  %v2514_v58 = vcombine.high %v13214_v51, %v13214_v51 }
 0x3cb   : > { %13796 = vmatprep.subr.bf16.mxu1 %v13795_v63 }
 0x3cc   : > { %12674 = vmatmul.mubr.f32.vlgmr.msra.gmra.mrb[140].mxu0 %v2463_v38 }
 0x3cd   : > { %13794 = vmatpush1.bf16.xpose.msra.mxu0 %v13793_v7  ;;  %12744 = vmatmul.mubr.f32.vlgmr.msra.gmra.mrb[140].mxu1 %v2470_v42  ;;  %v1189_v42 = vld [vmem:[%s14312_s8 + $0x1b78] sm:$0x3] }
 0x3ce   : > { %13798 = vmatpush1.bf16.xpose.msra.mxu1 %v13797_v10  ;;  %12753 = vmatprep.subr.mxu0 %v1183_v11 }
 0x3cf   : > { %12823 = vmatprep.subr.mxu1 %v1185_v13  ;;  %12813 = vmatprep.mubr.f32.mxu0 %v2488_v12 }
 0x3d0   : > { %12883 = vmatprep.mubr.f32.mxu1 %v2489_v14 }
 0x3d3   : > { %v10295_v26 = vpop.f32.mrb[106].mxu0 }
 0x3d4   : > { %v10296_v32 = vadd.f32 %v10295_v26, %v10226_v9  ;;  %v10297_v33 = vpop.f32.mrb[107].mxu0  ;;  %v10365_v34 = vpop.f32.mrb[106].mxu1 }
 0x3d5   : > { %12754 = vmatpush1.xpose.msra.mxu0 %v1182_v22  ;;  %v10367_v37 = vpop.f32.mrb[107].mxu1 }
 0x3d6   : > { %v10366_v38 = vadd.f32 %v10365_v34, %v10296_v32  ;;  %12824 = vmatpush1.xpose.msra.mxu1 %v1184_v27  ;;  %13800 = vmatprep.subr.bf16.mxu0 %v13799_v23 }
 0x3d7   : > { %13804 = vmatprep.subr.bf16.mxu1 %v13803_v28 }
 0x3d8   : > { %12814 = vmatmul.mubr.f32.vlgmr.msra.gmra.mrb[142].mxu0 %v2480_v2 }
 0x3d9   : > { %13802 = vmatpush1.bf16.xpose.msra.mxu0 %v13801_v36  ;;  %12884 = vmatmul.mubr.f32.vlgmr.msra.gmra.mrb[142].mxu1 %v2487_v6 }
 0x3da   : > { %13806 = vmatpush1.bf16.xpose.msra.mxu1 %v13805_v39  ;;  %12893 = vmatprep.subr.mxu0 %v1187_v40 }
 0x3db   : > { %12963 = vmatprep.subr.mxu1 %v1189_v42  ;;  %12953 = vmatprep.mubr.f32.mxu0 %v2505_v41 }
 0x3dc   : > { %13023 = vmatprep.mubr.f32.mxu1 %v2506_v43 }
 0x3df   : > { %v10435_v50 = vpop.f32.mrb[108].mxu0 }
 0x3e0   : > { %v10436_v52 = vadd.f32 %v10435_v50, %v10366_v38  ;;  %v10437_v53 = vpop.f32.mrb[109].mxu0  ;;  %v10505_v54 = vpop.f32.mrb[108].mxu1 }
 0x3e1   : > { %12894 = vmatpush1.xpose.msra.mxu0 %v1186_v45  ;;  %v10507_v56 = vpop.f32.mrb[109].mxu1 }
 0x3e2   : > { %v10506_v57 = vadd.f32 %v10505_v54, %v10436_v52  ;;  %12964 = vmatpush1.xpose.msra.mxu1 %v1188_v46  ;;  %13808 = vmatprep.subr.bf16.mxu0 %v13807_v47 }
 0x3e4   : > { %12954 = vmatmul.mubr.f32.vlgmr.msra.gmra.mrb[144].mxu0 %v2497_v31 }
 0x3e5   : > { %13810 = vmatpush1.bf16.xpose.msra.mxu0 %v13809_v55  ;;  %13024 = vmatmul.mubr.f32.vlgmr.msra.gmra.mrb[144].mxu1 %v2504_v35 }
 0x3e6   : > { %13033 = vmatprep.subr.mxu0 %v1191_v59  ;;  %13093 = vmatprep.mubr.f32.mxu0 %v2514_v58 }
 0x3eb   : > { %v10575_v61 = vpop.f32.mrb[110].mxu0 }
 0x3ec   : > { %v10576_v62 = vadd.f32 %v10575_v61, %v10506_v57  ;;  %v10577_v63 = vpop.f32.mrb[111].mxu0  ;;  %v10645_v0 = vpop.f32.mrb[110].mxu1 }
 0x3ed   : > { %13034 = vmatpush1.xpose.msra.mxu0 %v1190_v60  ;;  %v10647_v1 = vpop.f32.mrb[111].mxu1 }
 0x3ee   : > { %v10646_v2 = vadd.f32 %v10645_v0, %v10576_v62 }
 0x3f0   : > { %13094 = vmatmul.mubr.f32.vlgmr.msra.gmra.mrb[146].mxu0 %v13214_v51 }
 0x3f7   : > { %v10715_v3 = vpop.f32.mrb[112].mxu0 }
 0x3f8   : > { %v10716_v4 = vadd.f32 %v10715_v3, %v10646_v2  ;;  %v10717_v5 = vpop.f32.mrb[113].mxu0  ;;  %v10785_v6 = vpop.f32.mrb[112].mxu1 }
 0x3f9   : > { %v10787_v7 = vpop.f32.mrb[113].mxu1 }
 0x3fa   : > { %v10786_v8 = vadd.f32 %v10785_v6, %v10716_v4 }
 0x403   : > { %v10855_v9 = vpop.f32.mrb[114].mxu0 }
 0x404   : > { %v10856_v10 = vadd.f32 %v10855_v9, %v10786_v8  ;;  %v10857_v11 = vpop.f32.mrb[115].mxu0  ;;  %v10925_v12 = vpop.f32.mrb[114].mxu1 }
 0x405   : > { %v10927_v13 = vpop.f32.mrb[115].mxu1 }
 0x406   : > { %v10926_v14 = vadd.f32 %v10925_v12, %v10856_v10 }
 0x40f   : > { %v10995_v15 = vpop.f32.mrb[116].mxu0 }
 0x410   : > { %v10996_v16 = vadd.f32 %v10995_v15, %v10926_v14  ;;  %v10997_v17 = vpop.f32.mrb[117].mxu0  ;;  %v11065_v18 = vpop.f32.mrb[116].mxu1 }
 0x411   : > { %v11067_v19 = vpop.f32.mrb[117].mxu1 }
 0x412   : > { %v11066_v20 = vadd.f32 %v11065_v18, %v10996_v16 }
 0x41b   : > { %v11135_v22 = vpop.f32.mrb[118].mxu0 }
 0x41c   : > { %v11136_v23 = vadd.f32 %v11135_v22, %v11066_v20  ;;  %v11137_v24 = vpop.f32.mrb[119].mxu0  ;;  %v11205_v25 = vpop.f32.mrb[118].mxu1 }
 0x41d   : > { %v11207_v26 = vpop.f32.mrb[119].mxu1 }
 0x41e   : > { %v11206_v27 = vadd.f32 %v11205_v25, %v11136_v23 }
 0x427   : > { %v11275_v28 = vpop.f32.mrb[120].mxu0 }
 0x428   : > { %v11276_v29 = vadd.f32 %v11275_v28, %v11206_v27  ;;  %v11277_v30 = vpop.f32.mrb[121].mxu0  ;;  %v11345_v31 = vpop.f32.mrb[120].mxu1 }
 0x429   : > { %v11347_v32 = vpop.f32.mrb[121].mxu1 }
 0x42a   : > { %v11346_v33 = vadd.f32 %v11345_v31, %v11276_v29 }
 0x433   : > { %v11415_v34 = vpop.f32.mrb[122].mxu0 }
 0x434   : > { %v11416_v35 = vadd.f32 %v11415_v34, %v11346_v33  ;;  %v11417_v36 = vpop.f32.mrb[123].mxu0  ;;  %v11485_v37 = vpop.f32.mrb[122].mxu1 }
 0x435   : > { %v11487_v38 = vpop.f32.mrb[123].mxu1 }
 0x436   : > { %v11486_v39 = vadd.f32 %v11485_v37, %v11416_v35 }
 0x43f   : > { %v11555_v40 = vpop.f32.mrb[124].mxu0 }
 0x440   : > { %v11556_v41 = vadd.f32 %v11555_v40, %v11486_v39  ;;  %v11557_v42 = vpop.f32.mrb[125].mxu0  ;;  %v11625_v43 = vpop.f32.mrb[124].mxu1 }
 0x441   : > { %v11627_v21 = vpop.f32.mrb[125].mxu1  ;;  %v235_v42 = vld [vmem:[#allocation8] sm:$0x3] }
 0x442   : > { %v11626_v44 = vadd.f32 %v11625_v43, %v11556_v41 }
 0x44b   : > { %v11695_v45 = vpop.f32.mrb[126].mxu0 }
 0x44c   : > { %v11696_v46 = vadd.f32 %v11695_v45, %v11626_v44  ;;  %v11697_v47 = vpop.f32.mrb[127].mxu0  ;;  %v11765_v48 = vpop.f32.mrb[126].mxu1 }
 0x44d   : > { %v11767_v49 = vpop.f32.mrb[127].mxu1  ;;  %v13216_v47 = vld [vmem:[#allocation7] ss:$0 sm:$0xff] (!%p13215_p12) }
 0x44e   : > { %v11766_v50 = vadd.f32 %v11765_v48, %v11696_v46 }
 0x457   : > { %v11835_v51 = vpop.f32.mrb[128].mxu0 }
 0x458   : > { %v11836_v52 = vadd.f32 %v11835_v51, %v11766_v50  ;;  %v11837_v53 = vpop.f32.mrb[129].mxu0  ;;  %v11905_v54 = vpop.f32.mrb[128].mxu1 }
 0x459   : > { %v11907_v55 = vpop.f32.mrb[129].mxu1 }
 0x45a   : > { %v11906_v56 = vadd.f32 %v11905_v54, %v11836_v52 }
 0x463   : > { %v11975_v57 = vpop.f32.mrb[130].mxu0 }
 0x464   : > { %v11976_v58 = vadd.f32 %v11975_v57, %v11906_v56  ;;  %v11977_v59 = vpop.f32.mrb[131].mxu0  ;;  %v12045_v60 = vpop.f32.mrb[130].mxu1 }
 0x465   : > { %v12047_v61 = vpop.f32.mrb[131].mxu1 }
 0x466   : > { %v12046_v62 = vadd.f32 %v12045_v60, %v11976_v58 }
 0x46f   : > { %v12115_v63 = vpop.f32.mrb[132].mxu0 }
 0x470   : > { %v12116_v0 = vadd.f32 %v12115_v63, %v12046_v62  ;;  %v12117_v1 = vpop.f32.mrb[133].mxu0  ;;  %v12185_v2 = vpop.f32.mrb[132].mxu1 }
 0x471   : > { %v12187_v3 = vpop.f32.mrb[133].mxu1 }
 0x472   : > { %v12186_v4 = vadd.f32 %v12185_v2, %v12116_v0 }
 0x47b   : > { %v12255_v5 = vpop.f32.mrb[134].mxu0 }
 0x47c   : > { %v12256_v6 = vadd.f32 %v12255_v5, %v12186_v4  ;;  %v12257_v7 = vpop.f32.mrb[135].mxu0  ;;  %v12325_v8 = vpop.f32.mrb[134].mxu1 }
 0x47d   : > { %v12327_v9 = vpop.f32.mrb[135].mxu1 }
 0x47e   : > { %v12326_v10 = vadd.f32 %v12325_v8, %v12256_v6 }
 0x487   : > { %v12395_v11 = vpop.f32.mrb[136].mxu0 }
 0x488   : > { %v12396_v12 = vadd.f32 %v12395_v11, %v12326_v10  ;;  %v12397_v13 = vpop.f32.mrb[137].mxu0  ;;  %v12465_v14 = vpop.f32.mrb[136].mxu1 }
 0x489   : > { %v12467_v15 = vpop.f32.mrb[137].mxu1 }
 0x48a   : > { %v12466_v16 = vadd.f32 %v12465_v14, %v12396_v12 }
 0x493   : > { %v12535_v17 = vpop.f32.mrb[138].mxu0 }
 0x494   : > { %v12536_v18 = vadd.f32 %v12535_v17, %v12466_v16  ;;  %v12537_v19 = vpop.f32.mrb[139].mxu0  ;;  %v12605_v20 = vpop.f32.mrb[138].mxu1 }
 0x495   : > { %v12607_v22 = vpop.f32.mrb[139].mxu1 }
 0x496   : > { %v12606_v23 = vadd.f32 %v12605_v20, %v12536_v18 }
 0x49f   : > { %v12675_v24 = vpop.f32.mrb[140].mxu0 }
 0x4a0   : > { %v12676_v25 = vadd.f32 %v12675_v24, %v12606_v23  ;;  %v12677_v26 = vpop.f32.mrb[141].mxu0  ;;  %v12745_v27 = vpop.f32.mrb[140].mxu1 }
 0x4a1   : > { %v12747_v28 = vpop.f32.mrb[141].mxu1 }
 0x4a2   : > { %v12746_v29 = vadd.f32 %v12745_v27, %v12676_v25 }
 0x4ab   : > { %v12815_v30 = vpop.f32.mrb[142].mxu0 }
 0x4ac   : > { %v12816_v31 = vadd.f32 %v12815_v30, %v12746_v29  ;;  %v12817_v32 = vpop.f32.mrb[143].mxu0  ;;  %v12885_v33 = vpop.f32.mrb[142].mxu1 }
 0x4ad   : > { %v12887_v34 = vpop.f32.mrb[143].mxu1 }
 0x4ae   : > { %v12886_v35 = vadd.f32 %v12885_v33, %v12816_v31 }
 0x4b7   : > { %v12955_v36 = vpop.f32.mrb[144].mxu0 }
 0x4b8   : > { %v12956_v37 = vadd.f32 %v12955_v36, %v12886_v35  ;;  %v12957_v38 = vpop.f32.mrb[145].mxu0  ;;  %v13025_v39 = vpop.f32.mrb[144].mxu1 }
 0x4b9   : > { %v13027_v40 = vpop.f32.mrb[145].mxu1 }
 0x4ba   : > { %v13026_v41 = vadd.f32 %v13025_v39, %v12956_v37 }
 0x4c2   : > { %13105 = sbr.rel (%p13215_p12) target bundleno = 1235 (0x4d3), region = 52 }
 0x4c3   : > { %v13095_v43 = vpop.f32.mrb[146].mxu0 }
 0x4c4   : > { %v13096_v21 = vadd.f32 %v13095_v43, %v13026_v41  ;;  %v13097_v44 = vpop.f32.mrb[147].mxu0 }
 0x4c6   : > { %v13099_v45 = vadd.f32 %v13096_v21, %v235_v42 }
 0x4c8   : > { %13101 = vst.msk [vmem:[#allocation8] sm:$0x3] %vm13100_vm1, %v13099_v45 }
 0x4cf   : > { %v13106_v46 = vld [vmem:[#allocation8] sm:$0x3] }
 0x4d0   : > { %v13114_v48 = vadd.f32 %v13216_v47, %v13106_v46 }
 0x4d2   : > { %13115 = vst.msk [vmem:[#allocation8] sm:$0x3] %vm13100_vm1, %v13114_v48 }
 0x4d3 PF: > { %p13841_p3 = scmp.eq.s32.totalorder %s14165_s16, 3  ;;  %s14125_s21 = smov [#allocation8]  }
 0x4d4   : > { %s13123_s22 = sshll.u32 %s14125_s21, 4  ;;  %s13124_s22 = int_to_ptr.vmem [resolvable:$true] %s13123_s22 }
 0x4d5   : > { %s14043_s9 = scalar_lea.vmem %s13124_s22, 32  ;;  %p14050_p13 = scmp.lt.s32.totalorder %s13124_s22, %s13124_s22 }
 0x4d6   : > { %p14044_p8 = scmp.ne.s32.totalorder %s13124_s22, %s14043_s9  ;;  %p14051_p2 = scmp.lt.s32.totalorder %s14043_s9, %s14043_s9 }
 0x4d8   : > { %p14045_p0 = pnand %p14044_p8, %p13841_p3  ;;  %p14052_p6 = por %p14051_p2, %p14050_p13 }
 0x4da   : > { %p14046_p1 = pneg %p14045_p0 }
 0x4dc   : > { %p14053_p9 = pnand %p14052_p6, %p14046_p1 }
 0x4de   : > { %14056 = shalt.err (!%p14053_p9)
}
 0x4df   : > { %s14057_s5 = scalar_lea.hbm %s15468_s3, 32 }
 0x4e0   : > { %p14058_p7 = scmp.ne.s32.totalorder %s15468_s3, %s14057_s5  ;;  %p14063_p10 = scmp.lt.u32.totalorder %s14057_s5, %s15468_s3 }
 0x4e2   : > { %p14059_p5 = pnand %p14058_p7, %p13841_p3 }
 0x4e4   : > { %p14060_p4 = pneg %p14059_p5 }
 0x4e6   : > { %p14065_p11 = pnand %p14063_p10, %p14060_p4 }
 0x4e8   : > { %14068 = shalt.err (!%p14065_p11)
}
 0x4e9   : > { %13824 = dma.vmem_to_hbm [thread:$0]  (%p13841_p3), %s13124_s22, 32, %s15468_s3, [#allocation4]  }
 0x4ea   : > { %14098 = dma.done.wait (%p13841_p3), [#allocation4], 32  }
 0x4eb   : > { %14100 = vsyncadd (%p13841_p3), [#allocation4], 4294967264 }
 0x4ec PF: > { %p17_p12 = scmp.ge.s32.totalorder %s14168_s17, 6   ;;  %s15483_s12 = smov %s14107_s13 }
 0x4ed   : > { %s15484_s13 = smov %s14111_s14  ;;  %s15485_s14 = smov %s14178_s20 }
 0x4ee   : > { %s15486_s15 = smov %s14168_s17  ;;  %19 = sbr.rel (!%p17_p12) target bundleno = 6 (0x6), region = 94 }
 0x4f5   :  { %13136 = vsyncpa [#allocation3], 1 }
 0x4f6   :  { %13138 = vsyncpa [#allocation3 + $0x1], 1 }
 0x4f7   :  { %13139 = vsyncpa [#allocation6], 1 }
 0x4f8   :  { %13141 = vsyncpa [#allocation6 + $0x1], 1 }
 0x4f9   :  { %13142 = vsyncpa [#allocation4], 1 }
 0x4fa   :  { %13144 = vsyncpa [#allocation4 + $0x1], 1 }

</bundles_post_ra>
